<compile_context>
chip_gen: v6e
topology: v6e:2x2x1
jax: 0.10.0
libtpu: 0.0.40
codegen_flags: <defaults>
</compile_context>

<pallas_src>
import numpy as np
import jax
import jax.numpy as jnp
from jax.experimental import pallas as pl
from jax.experimental.pallas import tpu as pltpu

PAD = 0

# ---- config (small, consistent with the module's __init__) -------------------
D_MODEL = 32            # encode_dim = area_dim = shot_dim = player_dim
N_HEADS = 2
D_K = D_MODEL
D_V = D_MODEL
HD = N_HEADS * D_K      # 64
SHOT_NUM = 12
PLAYER_NUM = 6
AREA_NUM = 10
ENCODE_LENGTH = 4
MAX_BALL_ROUND = 16
LN_EPS = 1e-6
HEAD_PAD = 128          # lane-dense padded head width (area 10 + shot 12 + zeros)


# ============================ the single fused kernel ==========================

def _fused_forward_kernel(
        xg_cat_ref, xg_res_ref, eg_ref,          # global A/B stream activations
        xl_cat_ref, xl_res_ref, el_ref,          # local stream activations
        smg_ref, cmg_ref, sml_ref, cml_ref,      # additive masks (batch folded)
        selA_ref, selB_ref, wgf_ref, tgt_ref,    # alternatemerge / fusion inputs
        w_slf_ref, w_sfc_ref, w_enc_ref, w_efc_ref,
        ln_g_ref, ln_b_ref, w1_ref, b1_ref, w2_ref, b2_ref,
        gfh_ref, gfg_ref, red_ref, headw_ref,
        o_ref):
    f32 = jnp.float32

    def mm(a, b):
        return jnp.dot(a, b, preferred_element_type=f32)

    def scores(q, k):
        # q (Nq, Dh), k (Nk, Dh) -> (Nq, Nk); contraction over the last dim of both.
        return jax.lax.dot_general(q, k, (((1,), (1,)), ((), ())),
                                   preferred_element_type=f32)

    def softmax(s):
        s = s - jnp.max(s, axis=-1, keepdims=True)
        p = jnp.exp(s)
        return p * pl.reciprocal(jnp.sum(p, axis=-1, keepdims=True), approx=True)

    def layernorm(x, idx):
        g = ln_g_ref[idx]
        b = ln_b_ref[idx]
        mu = jnp.mean(x, axis=-1, keepdims=True)
        var = jnp.mean((x - mu) ** 2, axis=-1, keepdims=True)
        return (x - mu) * jax.lax.rsqrt(var + LN_EPS) * g + b

    def decoder_layer(l, x_cat, x_res, enc, self_mask, cross_mask):
        # ---- disentangled type/area self-attention ---------------------------
        # x_cat = [area | shot] so x_cat @ [Wqa;Wqs] = qa+qs (scale pre-folded), etc.
        # Batch is folded into rows; cross-batch terms are killed by the additive
        # block-diagonal mask (which also carries pad+causal).
        attn = None
        for h in range(N_HEADS):
            q = mm(x_cat, w_slf_ref[l * 6 + 0 * N_HEADS + h])
            k = mm(x_cat, w_slf_ref[l * 6 + 1 * N_HEADS + h])
            v = mm(x_cat, w_slf_ref[l * 6 + 2 * N_HEADS + h])
            p = softmax(scores(q, k) + self_mask)
            part = mm(mm(p, v), w_sfc_ref[l * N_HEADS + h])   # per-head fc partial sum
            attn = part if attn is None else attn + part
        x = layernorm(attn + x_res, l * 3 + 0)

        # ---- decoder -> encoder cross-attention (mask = same-batch blocks only)
        attn2 = None
        for h in range(N_HEADS):
            q = mm(x, w_enc_ref[l * 6 + 0 * N_HEADS + h])
            k = mm(enc, w_enc_ref[l * 6 + 1 * N_HEADS + h])
            v = mm(enc, w_enc_ref[l * 6 + 2 * N_HEADS + h])
            p = softmax(scores(q, k) + cross_mask)
            part = mm(mm(p, v), w_efc_ref[l * N_HEADS + h])
            attn2 = part if attn2 is None else attn2 + part
        x2 = layernorm(attn2 + x, l * 3 + 1)

        # ---- position-wise FFN + residual + LN -------------------------------
        hdn = jnp.maximum(mm(x2, w1_ref[l]) + b1_ref[l], 0.0)
        ff = mm(hdn, w2_ref[l]) + b2_ref[l]
        return layernorm(ff + x2, l * 3 + 2)

    # layer 0 = shared "global" layer over stacked A/B streams, layer 1 = local layer
    out_g = decoder_layer(0, xg_cat_ref[...], xg_res_ref[...], eg_ref[...],
                          smg_ref[...], cmg_ref[...])               # (2B*L2, D)
    out_l = decoder_layer(1, xl_cat_ref[...], xl_res_ref[...], el_ref[...],
                          sml_ref[...], cml_ref[...])               # (B*L, D)

    # ---- alternatemerge as one-hot selection matmuls (no strided scatters) ----
    xA = mm(selA_ref[...], out_g)                                    # (B*L, D)
    xB = mm(selB_ref[...], out_g)                                    # (B*L, D)
    xL = out_l

    # ---- GatedFusionLayer on packed 96-lane tiles ------------------------------
    # hcat = [tanh(xA@h1) | tanh(xB@h2) | tanh(xL@h3)],  gcat = sigmoid(xcat@[g1|g2|g3])
    hcat = jnp.tanh(mm(xA, gfh_ref[0]) + mm(xB, gfh_ref[1]) + mm(xL, gfh_ref[2]))
    gcat = jax.nn.sigmoid(mm(xA, gfg_ref[0]) + mm(xB, gfg_ref[1]) + mm(xL, gfg_ref[2]))
    z = wgf_ref[...] * gcat * hcat                                   # (B*L, 3D)
    fused = jax.nn.sigmoid(mm(z, red_ref[...])) + tgt_ref[...]       # 3-stream reduce + tgt

    # ---- concatenated, zero-padded heads -> full 128-lane store ----------------
    o_ref[...] = mm(fused, headw_ref[...])


# ================================ model glue ==================================

def make_self_mask(seq):
    """Additive (Nb*Ls, Nb*Ls) mask: 0 where same-batch & non-pad key & causal, else -1e9."""
    nb, ls = seq.shape
    pad = (seq != PAD)
    causal = jnp.tril(jnp.ones((ls, ls), dtype=bool))
    same_batch = jnp.eye(nb, dtype=bool)
    keep = (same_batch[:, None, :, None]
            & pad[None, None, :, :]
            & causal[None, :, None, :])
    return jnp.where(keep.reshape(nb * ls, nb * ls), 0.0, -1e9).astype(jnp.float32)


def make_cross_mask(nb, lq, lk):
    """Additive (nb*lq, nb*lk) mask keeping only same-batch blocks."""
    keep = jnp.kron(jnp.eye(nb, dtype=jnp.float32), jnp.ones((lq, lk), jnp.float32))
    return jnp.where(keep > 0, 0.0, -1e9).astype(jnp.float32)


def positional_table(n_position, d_hid):
    pos = np.arange(n_position)[:, None].astype(np.float64)
    hid = np.arange(d_hid)[None, :]
    angle = pos / np.power(10000.0, 2 * (hid // 2) / d_hid)
    table = np.zeros((n_position, d_hid), np.float64)
    table[:, 0::2] = np.sin(angle[:, 0::2])
    table[:, 1::2] = np.cos(angle[:, 1::2])
    return jnp.asarray(table, jnp.float32)


def shot_gen_predictor(fp, input_shot, input_x, input_y, input_player,
                       encode_local_output, encode_global_A, encode_global_B,
                       target_player):
    B, L = input_shot.shape
    L2 = L // 2
    D = D_MODEL
    Le = encode_local_output.shape[1]
    Le2 = encode_global_A.shape[1]

    # ---- embeddings + positional encoding (tiny XLA glue fused under jit) -----
    # Area embedding = relu(x*W0 + y*W1 + b): rank-1 VPU expression, not a K=2 matmul.
    emb_area = jax.nn.relu(input_x[:, :, None] * fp["area_w0"]
                           + input_y[:, :, None] * fp["area_w1"] + fp["area_b"])
    emb_shot = jnp.take(fp["shot_emb"], input_shot, axis=0)
    emb_player = jnp.take(fp["player_emb"], input_player, axis=0)
    h_a = emb_area + emb_player
    h_s = emb_shot + emb_player

    pos = fp["pos_table"]
    pos_full = pos[ENCODE_LENGTH:ENCODE_LENGTH + L][None]
    pos_half = pos[ENCODE_LENGTH:ENCODE_LENGTH + L2][None]
    dec_area = h_a + pos_full
    dec_shot = h_s + pos_full
    # global streams: rows ordered [A_b0..A_b{B-1}, B_b0..B_b{B-1}], each of length L2
    dec_area_AB = jnp.concatenate([h_a[:, 0::2], h_a[:, 1::2]], axis=0) + pos_half
    dec_shot_AB = jnp.concatenate([h_s[:, 0::2], h_s[:, 1::2]], axis=0) + pos_half

    xl_cat = jnp.concatenate([dec_area.reshape(B * L, D),
                              dec_shot.reshape(B * L, D)], axis=1)
    xl_res = (dec_area + dec_shot).reshape(B * L, D)
    xg_cat = jnp.concatenate([dec_area_AB.reshape(2 * B * L2, D),
                              dec_shot_AB.reshape(2 * B * L2, D)], axis=1)
    xg_res = (dec_area_AB + dec_shot_AB).reshape(2 * B * L2, D)

    eg = jnp.concatenate([encode_global_A, encode_global_B],
                         axis=0).reshape(2 * B * Le2, D)
    el = encode_local_output.reshape(B * Le, D)

    # ---- additive masks (batch folded into attention rows/cols) ---------------
    seq_g = jnp.concatenate([input_shot[:, 0::2], input_shot[:, 1::2]], axis=0)
    smg = make_self_mask(seq_g)
    sml = make_self_mask(input_shot)
    cmg = make_cross_mask(2 * B, L2, Le2)
    cml = make_cross_mask(B, L, Le)

    # ---- alternatemerge selection matrices (seq_A == seq_B in the reference) --
    q_b = jnp.arange(B * L) // L
    q_t = jnp.arange(B * L) % L
    selA = jax.nn.one_hot(q_b * L2 + q_t // 2, 2 * B * L2, dtype=jnp.float32)
    selB = (jax.nn.one_hot(B * L2 + q_b * L2 + (q_t - 1) // 2,
                           2 * B * L2, dtype=jnp.float32)
            * (q_t >= 1).astype(jnp.float32)[:, None])

    # ---- gated-fusion per-position weights & target-player embedding ----------
    wgf = jnp.tile(jnp.concatenate([fp["w_A"][:L], fp["w_B"][:L], fp["w_L"][:L]],
                                   axis=1), (B, 1))                     # (B*L, 3D)
    tgt = jnp.take(fp["pred_player_emb"], target_player, axis=0).reshape(B * L, D)

    args = (xg_cat, xg_res, eg, xl_cat, xl_res, el,
            smg, cmg, sml, cml, selA, selB, wgf, tgt,
            fp["w_slf"], fp["w_sfc"], fp["w_enc"], fp["w_efc"],
            fp["ln_g"], fp["ln_b"], fp["w1"], fp["b1"], fp["w2"], fp["b2"],
            fp["gf_h"], fp["gf_g"], fp["red"], fp["head_w"])

    logits = pl.pallas_call(
        _fused_forward_kernel,
        out_shape=jax.ShapeDtypeStruct((B * L, HEAD_PAD), jnp.float32),
    )(*args)

    logits = logits.reshape(B, L, HEAD_PAD)
    area_logits = logits[..., :AREA_NUM]
    shot_logits = logits[..., AREA_NUM:AREA_NUM + SHOT_NUM]
    return area_logits, shot_logits


shot_gen_predictor_jit = jax.jit(shot_gen_predictor)


# ============================= parameter init =================================

def _nrm(key, shape, scale=0.1):
    return scale * jax.random.normal(key, shape, dtype=jnp.float32)


def _embedding(key, num, dim):
    e = _nrm(key, (num, dim))
    return e.at[PAD].set(0.0)      # padding_idx=PAD


def init_mha_params(key):
    ks = jax.random.split(key, 4)
    return dict(
        wq=_nrm(ks[0], (D_MODEL, N_HEADS * D_K)),
        wk=_nrm(ks[1], (D_MODEL, N_HEADS * D_K)),
        wv=_nrm(ks[2], (D_MODEL, N_HEADS * D_V)),
        fc=_nrm(ks[3], (N_HEADS * D_V, D_MODEL)),
        ln_g=jnp.ones((1, D_MODEL), jnp.float32),
        ln_b=jnp.zeros((1, D_MODEL), jnp.float32),
    )


def init_type_area_params(key):
    ks = jax.random.split(key, 7)
    return dict(
        wqa=_nrm(ks[0], (D_MODEL, N_HEADS * D_K)),
        wka=_nrm(ks[1], (D_MODEL, N_HEADS * D_K)),
        wva=_nrm(ks[2], (D_MODEL, N_HEADS * D_V)),
        wqs=_nrm(ks[3], (D_MODEL, N_HEADS * D_K)),
        wks=_nrm(ks[4], (D_MODEL, N_HEADS * D_K)),
        wvs=_nrm(ks[5], (D_MODEL, N_HEADS * D_V)),
        fc=_nrm(ks[6], (N_HEADS * D_V, D_MODEL)),
        ln_g=jnp.ones((1, D_MODEL), jnp.float32),
        ln_b=jnp.zeros((1, D_MODEL), jnp.float32),
    )


def init_decoder_layer_params(key):
    ks = jax.random.split(key, 4)
    return dict(
        slf=init_type_area_params(ks[0]),
        enc=init_mha_params(ks[1]),
        ffn_w1=_nrm(ks[2], (D_MODEL, 2 * D_MODEL)),
        ffn_b1=jnp.zeros((2 * D_MODEL,), jnp.float32),
        ffn_w2=_nrm(ks[3], (2 * D_MODEL, D_MODEL)),
        ffn_b2=jnp.zeros((D_MODEL,), jnp.float32),
        ffn_ln_g=jnp.ones((1, D_MODEL), jnp.float32),
        ffn_ln_b=jnp.zeros((1, D_MODEL), jnp.float32),
    )


def init_params(key):
    ks = jax.random.split(key, 17)
    decode_length = MAX_BALL_ROUND - ENCODE_LENGTH
    gated_fusion = dict(
        h1=_nrm(ks[0], (D_MODEL, D_MODEL)),
        h2=_nrm(ks[1], (D_MODEL, D_MODEL)),
        h3=_nrm(ks[2], (D_MODEL, D_MODEL)),
        g1=_nrm(ks[3], (3 * D_MODEL, D_MODEL)),
        g2=_nrm(ks[4], (3 * D_MODEL, D_MODEL)),
        g3=_nrm(ks[5], (3 * D_MODEL, D_MODEL)),
        # reference __init__ uses torch.zeros; small random keeps the gate non-degenerate
        w_A=_nrm(ks[6], (decode_length, D_MODEL)),
        w_B=_nrm(ks[7], (decode_length, D_MODEL)),
        w_L=_nrm(ks[8], (decode_length, D_MODEL)),
    )
    decoder = dict(
        area_w=_nrm(ks[9], (2, D_MODEL)),
        area_b=jnp.zeros((D_MODEL,), jnp.float32),
        shot_emb=_embedding(ks[10], SHOT_NUM, D_MODEL),
        player_emb=_embedding(ks[11], PLAYER_NUM, D_MODEL),
        pos_table=positional_table(MAX_BALL_ROUND, D_MODEL),
        global_layer=init_decoder_layer_params(ks[12]),
        local_layer=init_decoder_layer_params(ks[13]),
        gated_fusion=gated_fusion,
    )
    return dict(
        decoder=decoder,
        pred_player_emb=_embedding(ks[14], PLAYER_NUM, D_MODEL),
        area_dec_w=_nrm(ks[15], (D_MODEL, AREA_NUM)),
        shot_dec_w=_nrm(ks[16], (D_MODEL, SHOT_NUM)),
    )


def _split_heads(w):
    """(Din, H*Dh) -> (H, Din, Dh) stacked on a leading axis (no mid-tile slices in-kernel)."""
    return jnp.stack([w[:, h * D_K:(h + 1) * D_K] for h in range(N_HEADS)], axis=0)


def fuse_decoder_layer_params(p):
    """Per-layer weight packing: per-head stacking, scale folded into Q."""
    slf, enc = p["slf"], p["enc"]
    scale = 1.0 / (D_K ** 0.5)
    # [Wqa;Wqs] applied to [xa|xs] gives (qa+qs); same for K/V.
    wq = jnp.concatenate([slf["wqa"], slf["wqs"]], axis=0) * scale
    wk = jnp.concatenate([slf["wka"], slf["wks"]], axis=0)
    wv = jnp.concatenate([slf["wva"], slf["wvs"]], axis=0)
    w_slf = jnp.concatenate([_split_heads(wq), _split_heads(wk), _split_heads(wv)],
                            axis=0)                                    # (3H, 2D, Dh)
    w_sfc = jnp.stack([slf["fc"][h * D_V:(h + 1) * D_V] for h in range(N_HEADS)],
                      axis=0)                                          # (H, Dv, D)
    w_enc = jnp.concatenate([_split_heads(enc["wq"] * scale),
                             _split_heads(enc["wk"]),
                             _split_heads(enc["wv"])], axis=0)         # (3H, D, Dh)
    w_efc = jnp.stack([enc["fc"][h * D_V:(h + 1) * D_V] for h in range(N_HEADS)],
                      axis=0)                                          # (H, Dv, D)
    ln_g = jnp.stack([slf["ln_g"], enc["ln_g"], p["ffn_ln_g"]], axis=0)  # (3, 1, D)
    ln_b = jnp.stack([slf["ln_b"], enc["ln_b"], p["ffn_ln_b"]], axis=0)
    return dict(w_slf=w_slf, w_sfc=w_sfc, w_enc=w_enc, w_efc=w_efc,
                ln_g=ln_g, ln_b=ln_b,
                w1=p["ffn_w1"], b1=p["ffn_b1"].reshape(1, -1),
                w2=p["ffn_w2"], b2=p["ffn_b2"].reshape(1, -1))


def prepare_params(p):
    """Pre-pack all weights for the single fused kernel (done once, outside jit)."""
    dec = p["decoder"]
    gf = dec["gated_fusion"]
    g = fuse_decoder_layer_params(dec["global_layer"])   # layer index 0
    l = fuse_decoder_layer_params(dec["local_layer"])    # layer index 1

    def cat(k):
        return jnp.concatenate([g[k], l[k]], axis=0)

    D = D_MODEL
    zeros = jnp.zeros((D, D), jnp.float32)
    # block-diagonal hidden projection (per-stream row blocks, packed 96-wide output)
    gf_h = jnp.stack([jnp.concatenate([gf["h1"], zeros, zeros], axis=1),
                      jnp.concatenate([zeros, gf["h2"], zeros], axis=1),
                      jnp.concatenate([zeros, zeros, gf["h3"]], axis=1)], axis=0)
    # gate projection: row block j of [g1|g2|g3]
    gf_g = jnp.stack([jnp.concatenate([gf["g1"][j * D:(j + 1) * D],
                                       gf["g2"][j * D:(j + 1) * D],
                                       gf["g3"][j * D:(j + 1) * D]], axis=1)
                      for j in range(3)], axis=0)
    eye = jnp.eye(D, dtype=jnp.float32)
    red = jnp.concatenate([eye, eye, eye], axis=0)                     # (3D, D)
    head_w = jnp.concatenate(
        [p["area_dec_w"], p["shot_dec_w"],
         jnp.zeros((D, HEAD_PAD - AREA_NUM - SHOT_NUM), jnp.float32)], axis=1)  # (D, 128)

    return dict(
        area_w0=dec["area_w"][0].reshape(1, 1, D),
        area_w1=dec["area_w"][1].reshape(1, 1, D),
        area_b=dec["area_b"].reshape(1, 1, D),
        shot_emb=dec["shot_emb"],
        player_emb=dec["player_emb"],
        pos_table=dec["pos_table"],
        w_slf=cat("w_slf"),          # (12, 2D, Dh)
        w_sfc=cat("w_sfc"),          # (4, Dv, D)
        w_enc=cat("w_enc"),          # (12, D, Dh)
        w_efc=cat("w_efc"),          # (4, Dv, D)
        ln_g=cat("ln_g"),            # (6, 1, D)
        ln_b=cat("ln_b"),
        w1=jnp.stack([g["w1"], l["w1"]], axis=0),    # (2, D, 2D)
        b1=jnp.stack([g["b1"], l["b1"]], axis=0),    # (2, 1, 2D)
        w2=jnp.stack([g["w2"], l["w2"]], axis=0),    # (2, 2D, D)
        b2=jnp.stack([g["b2"], l["b2"]], axis=0),    # (2, 1, D)
        gf_h=gf_h, gf_g=gf_g, red=red,
        w_A=gf["w_A"], w_B=gf["w_B"], w_L=gf["w_L"],
        pred_player_emb=p["pred_player_emb"],
        head_w=head_w,
    )


# =================================== main =====================================

if __name__ == "__main__":
    key = jax.random.PRNGKey(0)
    kp, kd = jax.random.split(key)
    params = init_params(kp)
    fparams = prepare_params(params)

    B, L = 2, 8
    ks = jax.random.split(kd, 8)
    input_shot = jax.random.randint(ks[0], (B, L), 1, SHOT_NUM, dtype=jnp.int32)
    input_x = jax.random.uniform(ks[1], (B, L), dtype=jnp.float32)
    input_y = jax.random.uniform(ks[2], (B, L), dtype=jnp.float32)
    input_player = jax.random.randint(ks[3], (B, L), 1, PLAYER_NUM, dtype=jnp.int32)
    target_player = jax.random.randint(ks[4], (B, L), 1, PLAYER_NUM, dtype=jnp.int32)
    encode_local_output = jax.random.normal(ks[5], (B, ENCODE_LENGTH, D_MODEL), jnp.float32)
    encode_global_A = jax.random.normal(ks[6], (B, ENCODE_LENGTH // 2, D_MODEL), jnp.float32)
    encode_global_B = jax.random.normal(ks[7], (B, ENCODE_LENGTH // 2, D_MODEL), jnp.float32)

    area_logits, shot_logits = shot_gen_predictor_jit(
        fparams, input_shot, input_x, input_y, input_player,
        encode_local_output, encode_global_A, encode_global_B, target_player)
    jax.block_until_ready((area_logits, shot_logits))

    assert area_logits.shape == (B, L, AREA_NUM)
    assert shot_logits.shape == (B, L, SHOT_NUM)
    assert bool(jnp.all(jnp.isfinite(area_logits))) and bool(jnp.all(jnp.isfinite(shot_logits)))
    print("KERNEL_OK")
</pallas_src>

<mosaic_0001>
module attributes {stable_mosaic.version = 11 : i64} {
  func.func @_fused_forward_kernel(%arg0: memref<16x64xf32, #tpu.memory_space<vmem>>, %arg1: memref<16x32xf32, #tpu.memory_space<vmem>>, %arg2: memref<8x32xf32, #tpu.memory_space<vmem>>, %arg3: memref<16x64xf32, #tpu.memory_space<vmem>>, %arg4: memref<16x32xf32, #tpu.memory_space<vmem>>, %arg5: memref<8x32xf32, #tpu.memory_space<vmem>>, %arg6: memref<16x16xf32, #tpu.memory_space<vmem>>, %arg7: memref<16x8xf32, #tpu.memory_space<vmem>>, %arg8: memref<16x16xf32, #tpu.memory_space<vmem>>, %arg9: memref<16x8xf32, #tpu.memory_space<vmem>>, %arg10: memref<16x16xf32, #tpu.memory_space<vmem>>, %arg11: memref<16x16xf32, #tpu.memory_space<vmem>>, %arg12: memref<16x96xf32, #tpu.memory_space<vmem>>, %arg13: memref<16x32xf32, #tpu.memory_space<vmem>>, %arg14: memref<12x64x32xf32, #tpu.memory_space<vmem>>, %arg15: memref<4x32x32xf32, #tpu.memory_space<vmem>>, %arg16: memref<12x32x32xf32, #tpu.memory_space<vmem>>, %arg17: memref<4x32x32xf32, #tpu.memory_space<vmem>>, %arg18: memref<6x1x32xf32, #tpu.memory_space<vmem>>, %arg19: memref<6x1x32xf32, #tpu.memory_space<vmem>>, %arg20: memref<2x32x64xf32, #tpu.memory_space<vmem>>, %arg21: memref<2x1x64xf32, #tpu.memory_space<vmem>>, %arg22: memref<2x64x32xf32, #tpu.memory_space<vmem>>, %arg23: memref<2x1x32xf32, #tpu.memory_space<vmem>>, %arg24: memref<3x32x96xf32, #tpu.memory_space<vmem>>, %arg25: memref<3x32x96xf32, #tpu.memory_space<vmem>>, %arg26: memref<96x32xf32, #tpu.memory_space<vmem>>, %arg27: memref<32x128xf32, #tpu.memory_space<vmem>>, %arg28: memref<16x128xf32, #tpu.memory_space<vmem>>) attributes {dimension_semantics = [], scalar_prefetch = 0 : i64, scratch_operands = 0 : i64, tpu.core_type = #tpu.core_type<tc>} {
    %c0 = arith.constant 0 : index
    %c0_0 = arith.constant 0 : index
    %0 = vector.load %arg0[%c0, %c0_0] : memref<16x64xf32, #tpu.memory_space<vmem>>, vector<16x64xf32>
    %c0_1 = arith.constant 0 : index
    %c0_2 = arith.constant 0 : index
    %1 = vector.load %arg1[%c0_1, %c0_2] : memref<16x32xf32, #tpu.memory_space<vmem>>, vector<16x32xf32>
    %c0_3 = arith.constant 0 : index
    %c0_4 = arith.constant 0 : index
    %2 = vector.load %arg2[%c0_3, %c0_4] : memref<8x32xf32, #tpu.memory_space<vmem>>, vector<8x32xf32>
    %c0_5 = arith.constant 0 : index
    %c0_6 = arith.constant 0 : index
    %3 = vector.load %arg6[%c0_5, %c0_6] : memref<16x16xf32, #tpu.memory_space<vmem>>, vector<16x16xf32>
    %c0_7 = arith.constant 0 : index
    %c0_8 = arith.constant 0 : index
    %4 = vector.load %arg7[%c0_7, %c0_8] : memref<16x8xf32, #tpu.memory_space<vmem>>, vector<16x8xf32>
    %c0_9 = arith.constant 0 : index
    %c0_10 = arith.constant 0 : index
    %c0_11 = arith.constant 0 : index
    %5 = vector.load %arg14[%c0_9, %c0_10, %c0_11] : memref<12x64x32xf32, #tpu.memory_space<vmem>>, vector<1x64x32xf32>
    %6 = vector.shape_cast %5 : vector<1x64x32xf32> to vector<64x32xf32>
    %cst = arith.constant dense<0.000000e+00> : vector<16x32xf32>
    %7 = tpu.matmul %0, %6, %cst {dimension_numbers = #tpu.dot_dimension_numbers<[1], [0], [0], [1], [0, 0, 1, 1], [], []>} : vector<16x64xf32>, vector<64x32xf32>, vector<16x32xf32> -> vector<16x32xf32>
    %c2 = arith.constant 2 : index
    %c0_12 = arith.constant 0 : index
    %c0_13 = arith.constant 0 : index
    %8 = vector.load %arg14[%c2, %c0_12, %c0_13] : memref<12x64x32xf32, #tpu.memory_space<vmem>>, vector<1x64x32xf32>
    %9 = vector.shape_cast %8 : vector<1x64x32xf32> to vector<64x32xf32>
    %cst_14 = arith.constant dense<0.000000e+00> : vector<16x32xf32>
    %10 = tpu.matmul %0, %9, %cst_14 {dimension_numbers = #tpu.dot_dimension_numbers<[1], [0], [0], [1], [0, 0, 1, 1], [], []>} : vector<16x64xf32>, vector<64x32xf32>, vector<16x32xf32> -> vector<16x32xf32>
    %c4 = arith.constant 4 : index
    %c0_15 = arith.constant 0 : index
    %c0_16 = arith.constant 0 : index
    %11 = vector.load %arg14[%c4, %c0_15, %c0_16] : memref<12x64x32xf32, #tpu.memory_space<vmem>>, vector<1x64x32xf32>
    %12 = vector.shape_cast %11 : vector<1x64x32xf32> to vector<64x32xf32>
    %cst_17 = arith.constant dense<0.000000e+00> : vector<16x32xf32>
    %13 = tpu.matmul %0, %12, %cst_17 {dimension_numbers = #tpu.dot_dimension_numbers<[1], [0], [0], [1], [0, 0, 1, 1], [], []>} : vector<16x64xf32>, vector<64x32xf32>, vector<16x32xf32> -> vector<16x32xf32>
    %cst_18 = arith.constant dense<0.000000e+00> : vector<16x16xf32>
    %14 = tpu.matmul %7, %10, %cst_18 {dimension_numbers = #tpu.dot_dimension_numbers<[1], [1], [0], [0], [0, 0, 1, 0], [], []>} : vector<16x32xf32>, vector<16x32xf32>, vector<16x16xf32> -> vector<16x16xf32>
    %15 = arith.addf %14, %3 : vector<16x16xf32>
    %cst_19 = arith.constant dense<0xFF800000> : vector<16xf32>
    %16 = vector.multi_reduction <maximumf>, %15, %cst_19 [1] : vector<16x16xf32> to vector<16xf32>
    %17 = vector.shape_cast %16 : vector<16xf32> to vector<16x1xf32>
    %18 = vector.broadcast %17 : vector<16x1xf32> to vector<16x16xf32>
    %19 = arith.subf %15, %18 : vector<16x16xf32>
    %20 = math.exp %19 : vector<16x16xf32>
    %cst_20 = arith.constant dense<0.000000e+00> : vector<16xf32>
    %21 = vector.multi_reduction <add>, %20, %cst_20 [1] : vector<16x16xf32> to vector<16xf32>
    %22 = vector.shape_cast %21 : vector<16xf32> to vector<16x1xf32>
    %23 = tpu.reciprocal %22 {approx = true} : vector<16x1xf32> -> vector<16x1xf32>
    %24 = vector.broadcast %23 : vector<16x1xf32> to vector<16x16xf32>
    %25 = arith.mulf %20, %24 : vector<16x16xf32>
    %cst_21 = arith.constant dense<0.000000e+00> : vector<16x32xf32>
    %26 = tpu.matmul %25, %13, %cst_21 {dimension_numbers = #tpu.dot_dimension_numbers<[1], [0], [0], [1], [0, 0, 1, 1], [], []>} : vector<16x16xf32>, vector<16x32xf32>, vector<16x32xf32> -> vector<16x32xf32>
    %c0_22 = arith.constant 0 : index
    %c0_23 = arith.constant 0 : index
    %c0_24 = arith.constant 0 : index
    %27 = vector.load %arg15[%c0_22, %c0_23, %c0_24] : memref<4x32x32xf32, #tpu.memory_space<vmem>>, vector<1x32x32xf32>
    %28 = vector.shape_cast %27 : vector<1x32x32xf32> to vector<32x32xf32>
    %cst_25 = arith.constant dense<0.000000e+00> : vector<16x32xf32>
    %29 = tpu.matmul %26, %28, %cst_25 {dimension_numbers = #tpu.dot_dimension_numbers<[1], [0], [0], [1], [0, 0, 1, 1], [], []>} : vector<16x32xf32>, vector<32x32xf32>, vector<16x32xf32> -> vector<16x32xf32>
    %c1 = arith.constant 1 : index
    %c0_26 = arith.constant 0 : index
    %c0_27 = arith.constant 0 : index
    %30 = vector.load %arg14[%c1, %c0_26, %c0_27] : memref<12x64x32xf32, #tpu.memory_space<vmem>>, vector<1x64x32xf32>
    %31 = vector.shape_cast %30 : vector<1x64x32xf32> to vector<64x32xf32>
    %cst_28 = arith.constant dense<0.000000e+00> : vector<16x32xf32>
    %32 = tpu.matmul %0, %31, %cst_28 {dimension_numbers = #tpu.dot_dimension_numbers<[1], [0], [0], [1], [0, 0, 1, 1], [], []>} : vector<16x64xf32>, vector<64x32xf32>, vector<16x32xf32> -> vector<16x32xf32>
    %c3 = arith.constant 3 : index
    %c0_29 = arith.constant 0 : index
    %c0_30 = arith.constant 0 : index
    %33 = vector.load %arg14[%c3, %c0_29, %c0_30] : memref<12x64x32xf32, #tpu.memory_space<vmem>>, vector<1x64x32xf32>
    %34 = vector.shape_cast %33 : vector<1x64x32xf32> to vector<64x32xf32>
    %cst_31 = arith.constant dense<0.000000e+00> : vector<16x32xf32>
    %35 = tpu.matmul %0, %34, %cst_31 {dimension_numbers = #tpu.dot_dimension_numbers<[1], [0], [0], [1], [0, 0, 1, 1], [], []>} : vector<16x64xf32>, vector<64x32xf32>, vector<16x32xf32> -> vector<16x32xf32>
    %c5 = arith.constant 5 : index
    %c0_32 = arith.constant 0 : index
    %c0_33 = arith.constant 0 : index
    %36 = vector.load %arg14[%c5, %c0_32, %c0_33] : memref<12x64x32xf32, #tpu.memory_space<vmem>>, vector<1x64x32xf32>
    %37 = vector.shape_cast %36 : vector<1x64x32xf32> to vector<64x32xf32>
    %cst_34 = arith.constant dense<0.000000e+00> : vector<16x32xf32>
    %38 = tpu.matmul %0, %37, %cst_34 {dimension_numbers = #tpu.dot_dimension_numbers<[1], [0], [0], [1], [0, 0, 1, 1], [], []>} : vector<16x64xf32>, vector<64x32xf32>, vector<16x32xf32> -> vector<16x32xf32>
    %cst_35 = arith.constant dense<0.000000e+00> : vector<16x16xf32>
    %39 = tpu.matmul %32, %35, %cst_35 {dimension_numbers = #tpu.dot_dimension_numbers<[1], [1], [0], [0], [0, 0, 1, 0], [], []>} : vector<16x32xf32>, vector<16x32xf32>, vector<16x16xf32> -> vector<16x16xf32>
    %40 = arith.addf %39, %3 : vector<16x16xf32>
    %cst_36 = arith.constant dense<0xFF800000> : vector<16xf32>
    %41 = vector.multi_reduction <maximumf>, %40, %cst_36 [1] : vector<16x16xf32> to vector<16xf32>
    %42 = vector.shape_cast %41 : vector<16xf32> to vector<16x1xf32>
    %43 = vector.broadcast %42 : vector<16x1xf32> to vector<16x16xf32>
    %44 = arith.subf %40, %43 : vector<16x16xf32>
    %45 = math.exp %44 : vector<16x16xf32>
    %cst_37 = arith.constant dense<0.000000e+00> : vector<16xf32>
    %46 = vector.multi_reduction <add>, %45, %cst_37 [1] : vector<16x16xf32> to vector<16xf32>
    %47 = vector.shape_cast %46 : vector<16xf32> to vector<16x1xf32>
    %48 = tpu.reciprocal %47 {approx = true} : vector<16x1xf32> -> vector<16x1xf32>
    %49 = vector.broadcast %48 : vector<16x1xf32> to vector<16x16xf32>
    %50 = arith.mulf %45, %49 : vector<16x16xf32>
    %cst_38 = arith.constant dense<0.000000e+00> : vector<16x32xf32>
    %51 = tpu.matmul %50, %38, %cst_38 {dimension_numbers = #tpu.dot_dimension_numbers<[1], [0], [0], [1], [0, 0, 1, 1], [], []>} : vector<16x16xf32>, vector<16x32xf32>, vector<16x32xf32> -> vector<16x32xf32>
    %c1_39 = arith.constant 1 : index
    %c0_40 = arith.constant 0 : index
    %c0_41 = arith.constant 0 : index
    %52 = vector.load %arg15[%c1_39, %c0_40, %c0_41] : memref<4x32x32xf32, #tpu.memory_space<vmem>>, vector<1x32x32xf32>
    %53 = vector.shape_cast %52 : vector<1x32x32xf32> to vector<32x32xf32>
    %cst_42 = arith.constant dense<0.000000e+00> : vector<16x32xf32>
    %54 = tpu.matmul %51, %53, %cst_42 {dimension_numbers = #tpu.dot_dimension_numbers<[1], [0], [0], [1], [0, 0, 1, 1], [], []>} : vector<16x32xf32>, vector<32x32xf32>, vector<16x32xf32> -> vector<16x32xf32>
    %55 = arith.addf %29, %54 : vector<16x32xf32>
    %56 = arith.addf %55, %1 : vector<16x32xf32>
    %c0_43 = arith.constant 0 : index
    %c0_44 = arith.constant 0 : index
    %c0_45 = arith.constant 0 : index
    %57 = vector.load %arg18[%c0_43, %c0_44, %c0_45] : memref<6x1x32xf32, #tpu.memory_space<vmem>>, vector<1x1x32xf32>
    %58 = vector.shape_cast %57 : vector<1x1x32xf32> to vector<1x32xf32>
    %c0_46 = arith.constant 0 : index
    %c0_47 = arith.constant 0 : index
    %c0_48 = arith.constant 0 : index
    %59 = vector.load %arg19[%c0_46, %c0_47, %c0_48] : memref<6x1x32xf32, #tpu.memory_space<vmem>>, vector<1x1x32xf32>
    %60 = vector.shape_cast %59 : vector<1x1x32xf32> to vector<1x32xf32>
    %cst_49 = arith.constant dense<0.000000e+00> : vector<16xf32>
    %61 = vector.multi_reduction <add>, %56, %cst_49 [1] : vector<16x32xf32> to vector<16xf32>
    %62 = vector.shape_cast %61 : vector<16xf32> to vector<16x1xf32>
    %cst_50 = arith.constant 3.200000e+01 : f32
    %63 = vector.broadcast %cst_50 : f32 to vector<16x1xf32>
    %64 = arith.divf %62, %63 : vector<16x1xf32>
    %65 = vector.broadcast %64 : vector<16x1xf32> to vector<16x32xf32>
    %66 = arith.subf %56, %65 : vector<16x32xf32>
    %67 = arith.mulf %66, %66 : vector<16x32xf32>
    %cst_51 = arith.constant dense<0.000000e+00> : vector<16xf32>
    %68 = vector.multi_reduction <add>, %67, %cst_51 [1] : vector<16x32xf32> to vector<16xf32>
    %69 = vector.shape_cast %68 : vector<16xf32> to vector<16x1xf32>
    %cst_52 = arith.constant 3.200000e+01 : f32
    %70 = vector.broadcast %cst_52 : f32 to vector<16x1xf32>
    %71 = arith.divf %69, %70 : vector<16x1xf32>
    %72 = vector.broadcast %64 : vector<16x1xf32> to vector<16x32xf32>
    %73 = arith.subf %56, %72 : vector<16x32xf32>
    %cst_53 = arith.constant 9.99999997E-7 : f32
    %74 = vector.broadcast %cst_53 : f32 to vector<16x1xf32>
    %75 = arith.addf %71, %74 : vector<16x1xf32>
    %76 = math.rsqrt %75 : vector<16x1xf32>
    %77 = vector.broadcast %76 : vector<16x1xf32> to vector<16x32xf32>
    %78 = arith.mulf %73, %77 : vector<16x32xf32>
    %79 = vector.broadcast %58 : vector<1x32xf32> to vector<16x32xf32>
    %80 = arith.mulf %78, %79 : vector<16x32xf32>
    %81 = vector.broadcast %60 : vector<1x32xf32> to vector<16x32xf32>
    %82 = arith.addf %80, %81 : vector<16x32xf32>
    %c0_54 = arith.constant 0 : index
    %c0_55 = arith.constant 0 : index
    %c0_56 = arith.constant 0 : index
    %83 = vector.load %arg16[%c0_54, %c0_55, %c0_56] : memref<12x32x32xf32, #tpu.memory_space<vmem>>, vector<1x32x32xf32>
    %84 = vector.shape_cast %83 : vector<1x32x32xf32> to vector<32x32xf32>
    %cst_57 = arith.constant dense<0.000000e+00> : vector<16x32xf32>
    %85 = tpu.matmul %82, %84, %cst_57 {dimension_numbers = #tpu.dot_dimension_numbers<[1], [0], [0], [1], [0, 0, 1, 1], [], []>} : vector<16x32xf32>, vector<32x32xf32>, vector<16x32xf32> -> vector<16x32xf32>
    %c2_58 = arith.constant 2 : index
    %c0_59 = arith.constant 0 : index
    %c0_60 = arith.constant 0 : index
    %86 = vector.load %arg16[%c2_58, %c0_59, %c0_60] : memref<12x32x32xf32, #tpu.memory_space<vmem>>, vector<1x32x32xf32>
    %87 = vector.shape_cast %86 : vector<1x32x32xf32> to vector<32x32xf32>
    %cst_61 = arith.constant dense<0.000000e+00> : vector<8x32xf32>
    %88 = tpu.matmul %2, %87, %cst_61 {dimension_numbers = #tpu.dot_dimension_numbers<[1], [0], [0], [1], [0, 0, 1, 1], [], []>} : vector<8x32xf32>, vector<32x32xf32>, vector<8x32xf32> -> vector<8x32xf32>
    %c4_62 = arith.constant 4 : index
    %c0_63 = arith.constant 0 : index
    %c0_64 = arith.constant 0 : index
    %89 = vector.load %arg16[%c4_62, %c0_63, %c0_64] : memref<12x32x32xf32, #tpu.memory_space<vmem>>, vector<1x32x32xf32>
    %90 = vector.shape_cast %89 : vector<1x32x32xf32> to vector<32x32xf32>
    %cst_65 = arith.constant dense<0.000000e+00> : vector<8x32xf32>
    %91 = tpu.matmul %2, %90, %cst_65 {dimension_numbers = #tpu.dot_dimension_numbers<[1], [0], [0], [1], [0, 0, 1, 1], [], []>} : vector<8x32xf32>, vector<32x32xf32>, vector<8x32xf32> -> vector<8x32xf32>
    %cst_66 = arith.constant dense<0.000000e+00> : vector<16x8xf32>
    %92 = tpu.matmul %85, %88, %cst_66 {dimension_numbers = #tpu.dot_dimension_numbers<[1], [1], [0], [0], [0, 0, 1, 0], [], []>} : vector<16x32xf32>, vector<8x32xf32>, vector<16x8xf32> -> vector<16x8xf32>
    %93 = arith.addf %92, %4 : vector<16x8xf32>
    %cst_67 = arith.constant dense<0xFF800000> : vector<16xf32>
    %94 = vector.multi_reduction <maximumf>, %93, %cst_67 [1] : vector<16x8xf32> to vector<16xf32>
    %95 = vector.shape_cast %94 : vector<16xf32> to vector<16x1xf32>
    %96 = vector.broadcast %95 : vector<16x1xf32> to vector<16x8xf32>
    %97 = arith.subf %93, %96 : vector<16x8xf32>
    %98 = math.exp %97 : vector<16x8xf32>
    %cst_68 = arith.constant dense<0.000000e+00> : vector<16xf32>
    %99 = vector.multi_reduction <add>, %98, %cst_68 [1] : vector<16x8xf32> to vector<16xf32>
    %100 = vector.shape_cast %99 : vector<16xf32> to vector<16x1xf32>
    %101 = tpu.reciprocal %100 {approx = true} : vector<16x1xf32> -> vector<16x1xf32>
    %102 = vector.broadcast %101 : vector<16x1xf32> to vector<16x8xf32>
    %103 = arith.mulf %98, %102 : vector<16x8xf32>
    %cst_69 = arith.constant dense<0.000000e+00> : vector<16x32xf32>
    %104 = tpu.matmul %103, %91, %cst_69 {dimension_numbers = #tpu.dot_dimension_numbers<[1], [0], [0], [1], [0, 0, 1, 1], [], []>} : vector<16x8xf32>, vector<8x32xf32>, vector<16x32xf32> -> vector<16x32xf32>
    %c0_70 = arith.constant 0 : index
    %c0_71 = arith.constant 0 : index
    %c0_72 = arith.constant 0 : index
    %105 = vector.load %arg17[%c0_70, %c0_71, %c0_72] : memref<4x32x32xf32, #tpu.memory_space<vmem>>, vector<1x32x32xf32>
    %106 = vector.shape_cast %105 : vector<1x32x32xf32> to vector<32x32xf32>
    %cst_73 = arith.constant dense<0.000000e+00> : vector<16x32xf32>
    %107 = tpu.matmul %104, %106, %cst_73 {dimension_numbers = #tpu.dot_dimension_numbers<[1], [0], [0], [1], [0, 0, 1, 1], [], []>} : vector<16x32xf32>, vector<32x32xf32>, vector<16x32xf32> -> vector<16x32xf32>
    %c1_74 = arith.constant 1 : index
    %c0_75 = arith.constant 0 : index
    %c0_76 = arith.constant 0 : index
    %108 = vector.load %arg16[%c1_74, %c0_75, %c0_76] : memref<12x32x32xf32, #tpu.memory_space<vmem>>, vector<1x32x32xf32>
    %109 = vector.shape_cast %108 : vector<1x32x32xf32> to vector<32x32xf32>
    %cst_77 = arith.constant dense<0.000000e+00> : vector<16x32xf32>
    %110 = tpu.matmul %82, %109, %cst_77 {dimension_numbers = #tpu.dot_dimension_numbers<[1], [0], [0], [1], [0, 0, 1, 1], [], []>} : vector<16x32xf32>, vector<32x32xf32>, vector<16x32xf32> -> vector<16x32xf32>
    %c3_78 = arith.constant 3 : index
    %c0_79 = arith.constant 0 : index
    %c0_80 = arith.constant 0 : index
    %111 = vector.load %arg16[%c3_78, %c0_79, %c0_80] : memref<12x32x32xf32, #tpu.memory_space<vmem>>, vector<1x32x32xf32>
    %112 = vector.shape_cast %111 : vector<1x32x32xf32> to vector<32x32xf32>
    %cst_81 = arith.constant dense<0.000000e+00> : vector<8x32xf32>
    %113 = tpu.matmul %2, %112, %cst_81 {dimension_numbers = #tpu.dot_dimension_numbers<[1], [0], [0], [1], [0, 0, 1, 1], [], []>} : vector<8x32xf32>, vector<32x32xf32>, vector<8x32xf32> -> vector<8x32xf32>
    %c5_82 = arith.constant 5 : index
    %c0_83 = arith.constant 0 : index
    %c0_84 = arith.constant 0 : index
    %114 = vector.load %arg16[%c5_82, %c0_83, %c0_84] : memref<12x32x32xf32, #tpu.memory_space<vmem>>, vector<1x32x32xf32>
    %115 = vector.shape_cast %114 : vector<1x32x32xf32> to vector<32x32xf32>
    %cst_85 = arith.constant dense<0.000000e+00> : vector<8x32xf32>
    %116 = tpu.matmul %2, %115, %cst_85 {dimension_numbers = #tpu.dot_dimension_numbers<[1], [0], [0], [1], [0, 0, 1, 1], [], []>} : vector<8x32xf32>, vector<32x32xf32>, vector<8x32xf32> -> vector<8x32xf32>
    %cst_86 = arith.constant dense<0.000000e+00> : vector<16x8xf32>
    %117 = tpu.matmul %110, %113, %cst_86 {dimension_numbers = #tpu.dot_dimension_numbers<[1], [1], [0], [0], [0, 0, 1, 0], [], []>} : vector<16x32xf32>, vector<8x32xf32>, vector<16x8xf32> -> vector<16x8xf32>
    %118 = arith.addf %117, %4 : vector<16x8xf32>
    %cst_87 = arith.constant dense<0xFF800000> : vector<16xf32>
    %119 = vector.multi_reduction <maximumf>, %118, %cst_87 [1] : vector<16x8xf32> to vector<16xf32>
    %120 = vector.shape_cast %119 : vector<16xf32> to vector<16x1xf32>
    %121 = vector.broadcast %120 : vector<16x1xf32> to vector<16x8xf32>
    %122 = arith.subf %118, %121 : vector<16x8xf32>
    %123 = math.exp %122 : vector<16x8xf32>
    %cst_88 = arith.constant dense<0.000000e+00> : vector<16xf32>
    %124 = vector.multi_reduction <add>, %123, %cst_88 [1] : vector<16x8xf32> to vector<16xf32>
    %125 = vector.shape_cast %124 : vector<16xf32> to vector<16x1xf32>
    %126 = tpu.reciprocal %125 {approx = true} : vector<16x1xf32> -> vector<16x1xf32>
    %127 = vector.broadcast %126 : vector<16x1xf32> to vector<16x8xf32>
    %128 = arith.mulf %123, %127 : vector<16x8xf32>
    %cst_89 = arith.constant dense<0.000000e+00> : vector<16x32xf32>
    %129 = tpu.matmul %128, %116, %cst_89 {dimension_numbers = #tpu.dot_dimension_numbers<[1], [0], [0], [1], [0, 0, 1, 1], [], []>} : vector<16x8xf32>, vector<8x32xf32>, vector<16x32xf32> -> vector<16x32xf32>
    %c1_90 = arith.constant 1 : index
    %c0_91 = arith.constant 0 : index
    %c0_92 = arith.constant 0 : index
    %130 = vector.load %arg17[%c1_90, %c0_91, %c0_92] : memref<4x32x32xf32, #tpu.memory_space<vmem>>, vector<1x32x32xf32>
    %131 = vector.shape_cast %130 : vector<1x32x32xf32> to vector<32x32xf32>
    %cst_93 = arith.constant dense<0.000000e+00> : vector<16x32xf32>
    %132 = tpu.matmul %129, %131, %cst_93 {dimension_numbers = #tpu.dot_dimension_numbers<[1], [0], [0], [1], [0, 0, 1, 1], [], []>} : vector<16x32xf32>, vector<32x32xf32>, vector<16x32xf32> -> vector<16x32xf32>
    %133 = arith.addf %107, %132 : vector<16x32xf32>
    %134 = arith.addf %133, %82 : vector<16x32xf32>
    %c1_94 = arith.constant 1 : index
    %c0_95 = arith.constant 0 : index
    %c0_96 = arith.constant 0 : index
    %135 = vector.load %arg18[%c1_94, %c0_95, %c0_96] : memref<6x1x32xf32, #tpu.memory_space<vmem>>, vector<1x1x32xf32>
    %136 = vector.shape_cast %135 : vector<1x1x32xf32> to vector<1x32xf32>
    %c1_97 = arith.constant 1 : index
    %c0_98 = arith.constant 0 : index
    %c0_99 = arith.constant 0 : index
    %137 = vector.load %arg19[%c1_97, %c0_98, %c0_99] : memref<6x1x32xf32, #tpu.memory_space<vmem>>, vector<1x1x32xf32>
    %138 = vector.shape_cast %137 : vector<1x1x32xf32> to vector<1x32xf32>
    %cst_100 = arith.constant dense<0.000000e+00> : vector<16xf32>
    %139 = vector.multi_reduction <add>, %134, %cst_100 [1] : vector<16x32xf32> to vector<16xf32>
    %140 = vector.shape_cast %139 : vector<16xf32> to vector<16x1xf32>
    %cst_101 = arith.constant 3.200000e+01 : f32
    %141 = vector.broadcast %cst_101 : f32 to vector<16x1xf32>
    %142 = arith.divf %140, %141 : vector<16x1xf32>
    %143 = vector.broadcast %142 : vector<16x1xf32> to vector<16x32xf32>
    %144 = arith.subf %134, %143 : vector<16x32xf32>
    %145 = arith.mulf %144, %144 : vector<16x32xf32>
    %cst_102 = arith.constant dense<0.000000e+00> : vector<16xf32>
    %146 = vector.multi_reduction <add>, %145, %cst_102 [1] : vector<16x32xf32> to vector<16xf32>
    %147 = vector.shape_cast %146 : vector<16xf32> to vector<16x1xf32>
    %cst_103 = arith.constant 3.200000e+01 : f32
    %148 = vector.broadcast %cst_103 : f32 to vector<16x1xf32>
    %149 = arith.divf %147, %148 : vector<16x1xf32>
    %150 = vector.broadcast %142 : vector<16x1xf32> to vector<16x32xf32>
    %151 = arith.subf %134, %150 : vector<16x32xf32>
    %cst_104 = arith.constant 9.99999997E-7 : f32
    %152 = vector.broadcast %cst_104 : f32 to vector<16x1xf32>
    %153 = arith.addf %149, %152 : vector<16x1xf32>
    %154 = math.rsqrt %153 : vector<16x1xf32>
    %155 = vector.broadcast %154 : vector<16x1xf32> to vector<16x32xf32>
    %156 = arith.mulf %151, %155 : vector<16x32xf32>
    %157 = vector.broadcast %136 : vector<1x32xf32> to vector<16x32xf32>
    %158 = arith.mulf %156, %157 : vector<16x32xf32>
    %159 = vector.broadcast %138 : vector<1x32xf32> to vector<16x32xf32>
    %160 = arith.addf %158, %159 : vector<16x32xf32>
    %c0_105 = arith.constant 0 : index
    %c0_106 = arith.constant 0 : index
    %c0_107 = arith.constant 0 : index
    %161 = vector.load %arg20[%c0_105, %c0_106, %c0_107] : memref<2x32x64xf32, #tpu.memory_space<vmem>>, vector<1x32x64xf32>
    %162 = vector.shape_cast %161 : vector<1x32x64xf32> to vector<32x64xf32>
    %cst_108 = arith.constant dense<0.000000e+00> : vector<16x64xf32>
    %163 = tpu.matmul %160, %162, %cst_108 {dimension_numbers = #tpu.dot_dimension_numbers<[1], [0], [0], [1], [0, 0, 1, 1], [], []>} : vector<16x32xf32>, vector<32x64xf32>, vector<16x64xf32> -> vector<16x64xf32>
    %c0_109 = arith.constant 0 : index
    %c0_110 = arith.constant 0 : index
    %c0_111 = arith.constant 0 : index
    %164 = vector.load %arg21[%c0_109, %c0_110, %c0_111] : memref<2x1x64xf32, #tpu.memory_space<vmem>>, vector<1x1x64xf32>
    %165 = vector.shape_cast %164 : vector<1x1x64xf32> to vector<1x64xf32>
    %166 = vector.broadcast %165 : vector<1x64xf32> to vector<16x64xf32>
    %167 = arith.addf %163, %166 : vector<16x64xf32>
    %cst_112 = arith.constant 0.000000e+00 : f32
    %168 = vector.broadcast %cst_112 : f32 to vector<16x64xf32>
    %169 = arith.maximumf %167, %168 : vector<16x64xf32>
    %c0_113 = arith.constant 0 : index
    %c0_114 = arith.constant 0 : index
    %c0_115 = arith.constant 0 : index
    %170 = vector.load %arg22[%c0_113, %c0_114, %c0_115] : memref<2x64x32xf32, #tpu.memory_space<vmem>>, vector<1x64x32xf32>
    %171 = vector.shape_cast %170 : vector<1x64x32xf32> to vector<64x32xf32>
    %cst_116 = arith.constant dense<0.000000e+00> : vector<16x32xf32>
    %172 = tpu.matmul %169, %171, %cst_116 {dimension_numbers = #tpu.dot_dimension_numbers<[1], [0], [0], [1], [0, 0, 1, 1], [], []>} : vector<16x64xf32>, vector<64x32xf32>, vector<16x32xf32> -> vector<16x32xf32>
    %c0_117 = arith.constant 0 : index
    %c0_118 = arith.constant 0 : index
    %c0_119 = arith.constant 0 : index
    %173 = vector.load %arg23[%c0_117, %c0_118, %c0_119] : memref<2x1x32xf32, #tpu.memory_space<vmem>>, vector<1x1x32xf32>
    %174 = vector.shape_cast %173 : vector<1x1x32xf32> to vector<1x32xf32>
    %175 = vector.broadcast %174 : vector<1x32xf32> to vector<16x32xf32>
    %176 = arith.addf %172, %175 : vector<16x32xf32>
    %177 = arith.addf %176, %160 : vector<16x32xf32>
    %c2_120 = arith.constant 2 : index
    %c0_121 = arith.constant 0 : index
    %c0_122 = arith.constant 0 : index
    %178 = vector.load %arg18[%c2_120, %c0_121, %c0_122] : memref<6x1x32xf32, #tpu.memory_space<vmem>>, vector<1x1x32xf32>
    %179 = vector.shape_cast %178 : vector<1x1x32xf32> to vector<1x32xf32>
    %c2_123 = arith.constant 2 : index
    %c0_124 = arith.constant 0 : index
    %c0_125 = arith.constant 0 : index
    %180 = vector.load %arg19[%c2_123, %c0_124, %c0_125] : memref<6x1x32xf32, #tpu.memory_space<vmem>>, vector<1x1x32xf32>
    %181 = vector.shape_cast %180 : vector<1x1x32xf32> to vector<1x32xf32>
    %cst_126 = arith.constant dense<0.000000e+00> : vector<16xf32>
    %182 = vector.multi_reduction <add>, %177, %cst_126 [1] : vector<16x32xf32> to vector<16xf32>
    %183 = vector.shape_cast %182 : vector<16xf32> to vector<16x1xf32>
    %cst_127 = arith.constant 3.200000e+01 : f32
    %184 = vector.broadcast %cst_127 : f32 to vector<16x1xf32>
    %185 = arith.divf %183, %184 : vector<16x1xf32>
    %186 = vector.broadcast %185 : vector<16x1xf32> to vector<16x32xf32>
    %187 = arith.subf %177, %186 : vector<16x32xf32>
    %188 = arith.mulf %187, %187 : vector<16x32xf32>
    %cst_128 = arith.constant dense<0.000000e+00> : vector<16xf32>
    %189 = vector.multi_reduction <add>, %188, %cst_128 [1] : vector<16x32xf32> to vector<16xf32>
    %190 = vector.shape_cast %189 : vector<16xf32> to vector<16x1xf32>
    %cst_129 = arith.constant 3.200000e+01 : f32
    %191 = vector.broadcast %cst_129 : f32 to vector<16x1xf32>
    %192 = arith.divf %190, %191 : vector<16x1xf32>
    %193 = vector.broadcast %185 : vector<16x1xf32> to vector<16x32xf32>
    %194 = arith.subf %177, %193 : vector<16x32xf32>
    %cst_130 = arith.constant 9.99999997E-7 : f32
    %195 = vector.broadcast %cst_130 : f32 to vector<16x1xf32>
    %196 = arith.addf %192, %195 : vector<16x1xf32>
    %197 = math.rsqrt %196 : vector<16x1xf32>
    %198 = vector.broadcast %197 : vector<16x1xf32> to vector<16x32xf32>
    %199 = arith.mulf %194, %198 : vector<16x32xf32>
    %200 = vector.broadcast %179 : vector<1x32xf32> to vector<16x32xf32>
    %201 = arith.mulf %199, %200 : vector<16x32xf32>
    %202 = vector.broadcast %181 : vector<1x32xf32> to vector<16x32xf32>
    %203 = arith.addf %201, %202 : vector<16x32xf32>
    %c0_131 = arith.constant 0 : index
    %c0_132 = arith.constant 0 : index
    %204 = vector.load %arg3[%c0_131, %c0_132] : memref<16x64xf32, #tpu.memory_space<vmem>>, vector<16x64xf32>
    %c0_133 = arith.constant 0 : index
    %c0_134 = arith.constant 0 : index
    %205 = vector.load %arg4[%c0_133, %c0_134] : memref<16x32xf32, #tpu.memory_space<vmem>>, vector<16x32xf32>
    %c0_135 = arith.constant 0 : index
    %c0_136 = arith.constant 0 : index
    %206 = vector.load %arg5[%c0_135, %c0_136] : memref<8x32xf32, #tpu.memory_space<vmem>>, vector<8x32xf32>
    %c0_137 = arith.constant 0 : index
    %c0_138 = arith.constant 0 : index
    %207 = vector.load %arg8[%c0_137, %c0_138] : memref<16x16xf32, #tpu.memory_space<vmem>>, vector<16x16xf32>
    %c0_139 = arith.constant 0 : index
    %c0_140 = arith.constant 0 : index
    %208 = vector.load %arg9[%c0_139, %c0_140] : memref<16x8xf32, #tpu.memory_space<vmem>>, vector<16x8xf32>
    %c6 = arith.constant 6 : index
    %c0_141 = arith.constant 0 : index
    %c0_142 = arith.constant 0 : index
    %209 = vector.load %arg14[%c6, %c0_141, %c0_142] : memref<12x64x32xf32, #tpu.memory_space<vmem>>, vector<1x64x32xf32>
    %210 = vector.shape_cast %209 : vector<1x64x32xf32> to vector<64x32xf32>
    %cst_143 = arith.constant dense<0.000000e+00> : vector<16x32xf32>
    %211 = tpu.matmul %204, %210, %cst_143 {dimension_numbers = #tpu.dot_dimension_numbers<[1], [0], [0], [1], [0, 0, 1, 1], [], []>} : vector<16x64xf32>, vector<64x32xf32>, vector<16x32xf32> -> vector<16x32xf32>
    %c8 = arith.constant 8 : index
    %c0_144 = arith.constant 0 : index
    %c0_145 = arith.constant 0 : index
    %212 = vector.load %arg14[%c8, %c0_144, %c0_145] : memref<12x64x32xf32, #tpu.memory_space<vmem>>, vector<1x64x32xf32>
    %213 = vector.shape_cast %212 : vector<1x64x32xf32> to vector<64x32xf32>
    %cst_146 = arith.constant dense<0.000000e+00> : vector<16x32xf32>
    %214 = tpu.matmul %204, %213, %cst_146 {dimension_numbers = #tpu.dot_dimension_numbers<[1], [0], [0], [1], [0, 0, 1, 1], [], []>} : vector<16x64xf32>, vector<64x32xf32>, vector<16x32xf32> -> vector<16x32xf32>
    %c10 = arith.constant 10 : index
    %c0_147 = arith.constant 0 : index
    %c0_148 = arith.constant 0 : index
    %215 = vector.load %arg14[%c10, %c0_147, %c0_148] : memref<12x64x32xf32, #tpu.memory_space<vmem>>, vector<1x64x32xf32>
    %216 = vector.shape_cast %215 : vector<1x64x32xf32> to vector<64x32xf32>
    %cst_149 = arith.constant dense<0.000000e+00> : vector<16x32xf32>
    %217 = tpu.matmul %204, %216, %cst_149 {dimension_numbers = #tpu.dot_dimension_numbers<[1], [0], [0], [1], [0, 0, 1, 1], [], []>} : vector<16x64xf32>, vector<64x32xf32>, vector<16x32xf32> -> vector<16x32xf32>
    %cst_150 = arith.constant dense<0.000000e+00> : vector<16x16xf32>
    %218 = tpu.matmul %211, %214, %cst_150 {dimension_numbers = #tpu.dot_dimension_numbers<[1], [1], [0], [0], [0, 0, 1, 0], [], []>} : vector<16x32xf32>, vector<16x32xf32>, vector<16x16xf32> -> vector<16x16xf32>
    %219 = arith.addf %218, %207 : vector<16x16xf32>
    %cst_151 = arith.constant dense<0xFF800000> : vector<16xf32>
    %220 = vector.multi_reduction <maximumf>, %219, %cst_151 [1] : vector<16x16xf32> to vector<16xf32>
    %221 = vector.shape_cast %220 : vector<16xf32> to vector<16x1xf32>
    %222 = vector.broadcast %221 : vector<16x1xf32> to vector<16x16xf32>
    %223 = arith.subf %219, %222 : vector<16x16xf32>
    %224 = math.exp %223 : vector<16x16xf32>
    %cst_152 = arith.constant dense<0.000000e+00> : vector<16xf32>
    %225 = vector.multi_reduction <add>, %224, %cst_152 [1] : vector<16x16xf32> to vector<16xf32>
    %226 = vector.shape_cast %225 : vector<16xf32> to vector<16x1xf32>
    %227 = tpu.reciprocal %226 {approx = true} : vector<16x1xf32> -> vector<16x1xf32>
    %228 = vector.broadcast %227 : vector<16x1xf32> to vector<16x16xf32>
    %229 = arith.mulf %224, %228 : vector<16x16xf32>
    %cst_153 = arith.constant dense<0.000000e+00> : vector<16x32xf32>
    %230 = tpu.matmul %229, %217, %cst_153 {dimension_numbers = #tpu.dot_dimension_numbers<[1], [0], [0], [1], [0, 0, 1, 1], [], []>} : vector<16x16xf32>, vector<16x32xf32>, vector<16x32xf32> -> vector<16x32xf32>
    %c2_154 = arith.constant 2 : index
    %c0_155 = arith.constant 0 : index
    %c0_156 = arith.constant 0 : index
    %231 = vector.load %arg15[%c2_154, %c0_155, %c0_156] : memref<4x32x32xf32, #tpu.memory_space<vmem>>, vector<1x32x32xf32>
    %232 = vector.shape_cast %231 : vector<1x32x32xf32> to vector<32x32xf32>
    %cst_157 = arith.constant dense<0.000000e+00> : vector<16x32xf32>
    %233 = tpu.matmul %230, %232, %cst_157 {dimension_numbers = #tpu.dot_dimension_numbers<[1], [0], [0], [1], [0, 0, 1, 1], [], []>} : vector<16x32xf32>, vector<32x32xf32>, vector<16x32xf32> -> vector<16x32xf32>
    %c7 = arith.constant 7 : index
    %c0_158 = arith.constant 0 : index
    %c0_159 = arith.constant 0 : index
    %234 = vector.load %arg14[%c7, %c0_158, %c0_159] : memref<12x64x32xf32, #tpu.memory_space<vmem>>, vector<1x64x32xf32>
    %235 = vector.shape_cast %234 : vector<1x64x32xf32> to vector<64x32xf32>
    %cst_160 = arith.constant dense<0.000000e+00> : vector<16x32xf32>
    %236 = tpu.matmul %204, %235, %cst_160 {dimension_numbers = #tpu.dot_dimension_numbers<[1], [0], [0], [1], [0, 0, 1, 1], [], []>} : vector<16x64xf32>, vector<64x32xf32>, vector<16x32xf32> -> vector<16x32xf32>
    %c9 = arith.constant 9 : index
    %c0_161 = arith.constant 0 : index
    %c0_162 = arith.constant 0 : index
    %237 = vector.load %arg14[%c9, %c0_161, %c0_162] : memref<12x64x32xf32, #tpu.memory_space<vmem>>, vector<1x64x32xf32>
    %238 = vector.shape_cast %237 : vector<1x64x32xf32> to vector<64x32xf32>
    %cst_163 = arith.constant dense<0.000000e+00> : vector<16x32xf32>
    %239 = tpu.matmul %204, %238, %cst_163 {dimension_numbers = #tpu.dot_dimension_numbers<[1], [0], [0], [1], [0, 0, 1, 1], [], []>} : vector<16x64xf32>, vector<64x32xf32>, vector<16x32xf32> -> vector<16x32xf32>
    %c11 = arith.constant 11 : index
    %c0_164 = arith.constant 0 : index
    %c0_165 = arith.constant 0 : index
    %240 = vector.load %arg14[%c11, %c0_164, %c0_165] : memref<12x64x32xf32, #tpu.memory_space<vmem>>, vector<1x64x32xf32>
    %241 = vector.shape_cast %240 : vector<1x64x32xf32> to vector<64x32xf32>
    %cst_166 = arith.constant dense<0.000000e+00> : vector<16x32xf32>
    %242 = tpu.matmul %204, %241, %cst_166 {dimension_numbers = #tpu.dot_dimension_numbers<[1], [0], [0], [1], [0, 0, 1, 1], [], []>} : vector<16x64xf32>, vector<64x32xf32>, vector<16x32xf32> -> vector<16x32xf32>
    %cst_167 = arith.constant dense<0.000000e+00> : vector<16x16xf32>
    %243 = tpu.matmul %236, %239, %cst_167 {dimension_numbers = #tpu.dot_dimension_numbers<[1], [1], [0], [0], [0, 0, 1, 0], [], []>} : vector<16x32xf32>, vector<16x32xf32>, vector<16x16xf32> -> vector<16x16xf32>
    %244 = arith.addf %243, %207 : vector<16x16xf32>
    %cst_168 = arith.constant dense<0xFF800000> : vector<16xf32>
    %245 = vector.multi_reduction <maximumf>, %244, %cst_168 [1] : vector<16x16xf32> to vector<16xf32>
    %246 = vector.shape_cast %245 : vector<16xf32> to vector<16x1xf32>
    %247 = vector.broadcast %246 : vector<16x1xf32> to vector<16x16xf32>
    %248 = arith.subf %244, %247 : vector<16x16xf32>
    %249 = math.exp %248 : vector<16x16xf32>
    %cst_169 = arith.constant dense<0.000000e+00> : vector<16xf32>
    %250 = vector.multi_reduction <add>, %249, %cst_169 [1] : vector<16x16xf32> to vector<16xf32>
    %251 = vector.shape_cast %250 : vector<16xf32> to vector<16x1xf32>
    %252 = tpu.reciprocal %251 {approx = true} : vector<16x1xf32> -> vector<16x1xf32>
    %253 = vector.broadcast %252 : vector<16x1xf32> to vector<16x16xf32>
    %254 = arith.mulf %249, %253 : vector<16x16xf32>
    %cst_170 = arith.constant dense<0.000000e+00> : vector<16x32xf32>
    %255 = tpu.matmul %254, %242, %cst_170 {dimension_numbers = #tpu.dot_dimension_numbers<[1], [0], [0], [1], [0, 0, 1, 1], [], []>} : vector<16x16xf32>, vector<16x32xf32>, vector<16x32xf32> -> vector<16x32xf32>
    %c3_171 = arith.constant 3 : index
    %c0_172 = arith.constant 0 : index
    %c0_173 = arith.constant 0 : index
    %256 = vector.load %arg15[%c3_171, %c0_172, %c0_173] : memref<4x32x32xf32, #tpu.memory_space<vmem>>, vector<1x32x32xf32>
    %257 = vector.shape_cast %256 : vector<1x32x32xf32> to vector<32x32xf32>
    %cst_174 = arith.constant dense<0.000000e+00> : vector<16x32xf32>
    %258 = tpu.matmul %255, %257, %cst_174 {dimension_numbers = #tpu.dot_dimension_numbers<[1], [0], [0], [1], [0, 0, 1, 1], [], []>} : vector<16x32xf32>, vector<32x32xf32>, vector<16x32xf32> -> vector<16x32xf32>
    %259 = arith.addf %233, %258 : vector<16x32xf32>
    %260 = arith.addf %259, %205 : vector<16x32xf32>
    %c3_175 = arith.constant 3 : index
    %c0_176 = arith.constant 0 : index
    %c0_177 = arith.constant 0 : index
    %261 = vector.load %arg18[%c3_175, %c0_176, %c0_177] : memref<6x1x32xf32, #tpu.memory_space<vmem>>, vector<1x1x32xf32>
    %262 = vector.shape_cast %261 : vector<1x1x32xf32> to vector<1x32xf32>
    %c3_178 = arith.constant 3 : index
    %c0_179 = arith.constant 0 : index
    %c0_180 = arith.constant 0 : index
    %263 = vector.load %arg19[%c3_178, %c0_179, %c0_180] : memref<6x1x32xf32, #tpu.memory_space<vmem>>, vector<1x1x32xf32>
    %264 = vector.shape_cast %263 : vector<1x1x32xf32> to vector<1x32xf32>
    %cst_181 = arith.constant dense<0.000000e+00> : vector<16xf32>
    %265 = vector.multi_reduction <add>, %260, %cst_181 [1] : vector<16x32xf32> to vector<16xf32>
    %266 = vector.shape_cast %265 : vector<16xf32> to vector<16x1xf32>
    %cst_182 = arith.constant 3.200000e+01 : f32
    %267 = vector.broadcast %cst_182 : f32 to vector<16x1xf32>
    %268 = arith.divf %266, %267 : vector<16x1xf32>
    %269 = vector.broadcast %268 : vector<16x1xf32> to vector<16x32xf32>
    %270 = arith.subf %260, %269 : vector<16x32xf32>
    %271 = arith.mulf %270, %270 : vector<16x32xf32>
    %cst_183 = arith.constant dense<0.000000e+00> : vector<16xf32>
    %272 = vector.multi_reduction <add>, %271, %cst_183 [1] : vector<16x32xf32> to vector<16xf32>
    %273 = vector.shape_cast %272 : vector<16xf32> to vector<16x1xf32>
    %cst_184 = arith.constant 3.200000e+01 : f32
    %274 = vector.broadcast %cst_184 : f32 to vector<16x1xf32>
    %275 = arith.divf %273, %274 : vector<16x1xf32>
    %276 = vector.broadcast %268 : vector<16x1xf32> to vector<16x32xf32>
    %277 = arith.subf %260, %276 : vector<16x32xf32>
    %cst_185 = arith.constant 9.99999997E-7 : f32
    %278 = vector.broadcast %cst_185 : f32 to vector<16x1xf32>
    %279 = arith.addf %275, %278 : vector<16x1xf32>
    %280 = math.rsqrt %279 : vector<16x1xf32>
    %281 = vector.broadcast %280 : vector<16x1xf32> to vector<16x32xf32>
    %282 = arith.mulf %277, %281 : vector<16x32xf32>
    %283 = vector.broadcast %262 : vector<1x32xf32> to vector<16x32xf32>
    %284 = arith.mulf %282, %283 : vector<16x32xf32>
    %285 = vector.broadcast %264 : vector<1x32xf32> to vector<16x32xf32>
    %286 = arith.addf %284, %285 : vector<16x32xf32>
    %c6_186 = arith.constant 6 : index
    %c0_187 = arith.constant 0 : index
    %c0_188 = arith.constant 0 : index
    %287 = vector.load %arg16[%c6_186, %c0_187, %c0_188] : memref<12x32x32xf32, #tpu.memory_space<vmem>>, vector<1x32x32xf32>
    %288 = vector.shape_cast %287 : vector<1x32x32xf32> to vector<32x32xf32>
    %cst_189 = arith.constant dense<0.000000e+00> : vector<16x32xf32>
    %289 = tpu.matmul %286, %288, %cst_189 {dimension_numbers = #tpu.dot_dimension_numbers<[1], [0], [0], [1], [0, 0, 1, 1], [], []>} : vector<16x32xf32>, vector<32x32xf32>, vector<16x32xf32> -> vector<16x32xf32>
    %c8_190 = arith.constant 8 : index
    %c0_191 = arith.constant 0 : index
    %c0_192 = arith.constant 0 : index
    %290 = vector.load %arg16[%c8_190, %c0_191, %c0_192] : memref<12x32x32xf32, #tpu.memory_space<vmem>>, vector<1x32x32xf32>
    %291 = vector.shape_cast %290 : vector<1x32x32xf32> to vector<32x32xf32>
    %cst_193 = arith.constant dense<0.000000e+00> : vector<8x32xf32>
    %292 = tpu.matmul %206, %291, %cst_193 {dimension_numbers = #tpu.dot_dimension_numbers<[1], [0], [0], [1], [0, 0, 1, 1], [], []>} : vector<8x32xf32>, vector<32x32xf32>, vector<8x32xf32> -> vector<8x32xf32>
    %c10_194 = arith.constant 10 : index
    %c0_195 = arith.constant 0 : index
    %c0_196 = arith.constant 0 : index
    %293 = vector.load %arg16[%c10_194, %c0_195, %c0_196] : memref<12x32x32xf32, #tpu.memory_space<vmem>>, vector<1x32x32xf32>
    %294 = vector.shape_cast %293 : vector<1x32x32xf32> to vector<32x32xf32>
    %cst_197 = arith.constant dense<0.000000e+00> : vector<8x32xf32>
    %295 = tpu.matmul %206, %294, %cst_197 {dimension_numbers = #tpu.dot_dimension_numbers<[1], [0], [0], [1], [0, 0, 1, 1], [], []>} : vector<8x32xf32>, vector<32x32xf32>, vector<8x32xf32> -> vector<8x32xf32>
    %cst_198 = arith.constant dense<0.000000e+00> : vector<16x8xf32>
    %296 = tpu.matmul %289, %292, %cst_198 {dimension_numbers = #tpu.dot_dimension_numbers<[1], [1], [0], [0], [0, 0, 1, 0], [], []>} : vector<16x32xf32>, vector<8x32xf32>, vector<16x8xf32> -> vector<16x8xf32>
    %297 = arith.addf %296, %208 : vector<16x8xf32>
    %cst_199 = arith.constant dense<0xFF800000> : vector<16xf32>
    %298 = vector.multi_reduction <maximumf>, %297, %cst_199 [1] : vector<16x8xf32> to vector<16xf32>
    %299 = vector.shape_cast %298 : vector<16xf32> to vector<16x1xf32>
    %300 = vector.broadcast %299 : vector<16x1xf32> to vector<16x8xf32>
    %301 = arith.subf %297, %300 : vector<16x8xf32>
    %302 = math.exp %301 : vector<16x8xf32>
    %cst_200 = arith.constant dense<0.000000e+00> : vector<16xf32>
    %303 = vector.multi_reduction <add>, %302, %cst_200 [1] : vector<16x8xf32> to vector<16xf32>
    %304 = vector.shape_cast %303 : vector<16xf32> to vector<16x1xf32>
    %305 = tpu.reciprocal %304 {approx = true} : vector<16x1xf32> -> vector<16x1xf32>
    %306 = vector.broadcast %305 : vector<16x1xf32> to vector<16x8xf32>
    %307 = arith.mulf %302, %306 : vector<16x8xf32>
    %cst_201 = arith.constant dense<0.000000e+00> : vector<16x32xf32>
    %308 = tpu.matmul %307, %295, %cst_201 {dimension_numbers = #tpu.dot_dimension_numbers<[1], [0], [0], [1], [0, 0, 1, 1], [], []>} : vector<16x8xf32>, vector<8x32xf32>, vector<16x32xf32> -> vector<16x32xf32>
    %c2_202 = arith.constant 2 : index
    %c0_203 = arith.constant 0 : index
    %c0_204 = arith.constant 0 : index
    %309 = vector.load %arg17[%c2_202, %c0_203, %c0_204] : memref<4x32x32xf32, #tpu.memory_space<vmem>>, vector<1x32x32xf32>
    %310 = vector.shape_cast %309 : vector<1x32x32xf32> to vector<32x32xf32>
    %cst_205 = arith.constant dense<0.000000e+00> : vector<16x32xf32>
    %311 = tpu.matmul %308, %310, %cst_205 {dimension_numbers = #tpu.dot_dimension_numbers<[1], [0], [0], [1], [0, 0, 1, 1], [], []>} : vector<16x32xf32>, vector<32x32xf32>, vector<16x32xf32> -> vector<16x32xf32>
    %c7_206 = arith.constant 7 : index
    %c0_207 = arith.constant 0 : index
    %c0_208 = arith.constant 0 : index
    %312 = vector.load %arg16[%c7_206, %c0_207, %c0_208] : memref<12x32x32xf32, #tpu.memory_space<vmem>>, vector<1x32x32xf32>
    %313 = vector.shape_cast %312 : vector<1x32x32xf32> to vector<32x32xf32>
    %cst_209 = arith.constant dense<0.000000e+00> : vector<16x32xf32>
    %314 = tpu.matmul %286, %313, %cst_209 {dimension_numbers = #tpu.dot_dimension_numbers<[1], [0], [0], [1], [0, 0, 1, 1], [], []>} : vector<16x32xf32>, vector<32x32xf32>, vector<16x32xf32> -> vector<16x32xf32>
    %c9_210 = arith.constant 9 : index
    %c0_211 = arith.constant 0 : index
    %c0_212 = arith.constant 0 : index
    %315 = vector.load %arg16[%c9_210, %c0_211, %c0_212] : memref<12x32x32xf32, #tpu.memory_space<vmem>>, vector<1x32x32xf32>
    %316 = vector.shape_cast %315 : vector<1x32x32xf32> to vector<32x32xf32>
    %cst_213 = arith.constant dense<0.000000e+00> : vector<8x32xf32>
    %317 = tpu.matmul %206, %316, %cst_213 {dimension_numbers = #tpu.dot_dimension_numbers<[1], [0], [0], [1], [0, 0, 1, 1], [], []>} : vector<8x32xf32>, vector<32x32xf32>, vector<8x32xf32> -> vector<8x32xf32>
    %c11_214 = arith.constant 11 : index
    %c0_215 = arith.constant 0 : index
    %c0_216 = arith.constant 0 : index
    %318 = vector.load %arg16[%c11_214, %c0_215, %c0_216] : memref<12x32x32xf32, #tpu.memory_space<vmem>>, vector<1x32x32xf32>
    %319 = vector.shape_cast %318 : vector<1x32x32xf32> to vector<32x32xf32>
    %cst_217 = arith.constant dense<0.000000e+00> : vector<8x32xf32>
    %320 = tpu.matmul %206, %319, %cst_217 {dimension_numbers = #tpu.dot_dimension_numbers<[1], [0], [0], [1], [0, 0, 1, 1], [], []>} : vector<8x32xf32>, vector<32x32xf32>, vector<8x32xf32> -> vector<8x32xf32>
    %cst_218 = arith.constant dense<0.000000e+00> : vector<16x8xf32>
    %321 = tpu.matmul %314, %317, %cst_218 {dimension_numbers = #tpu.dot_dimension_numbers<[1], [1], [0], [0], [0, 0, 1, 0], [], []>} : vector<16x32xf32>, vector<8x32xf32>, vector<16x8xf32> -> vector<16x8xf32>
    %322 = arith.addf %321, %208 : vector<16x8xf32>
    %cst_219 = arith.constant dense<0xFF800000> : vector<16xf32>
    %323 = vector.multi_reduction <maximumf>, %322, %cst_219 [1] : vector<16x8xf32> to vector<16xf32>
    %324 = vector.shape_cast %323 : vector<16xf32> to vector<16x1xf32>
    %325 = vector.broadcast %324 : vector<16x1xf32> to vector<16x8xf32>
    %326 = arith.subf %322, %325 : vector<16x8xf32>
    %327 = math.exp %326 : vector<16x8xf32>
    %cst_220 = arith.constant dense<0.000000e+00> : vector<16xf32>
    %328 = vector.multi_reduction <add>, %327, %cst_220 [1] : vector<16x8xf32> to vector<16xf32>
    %329 = vector.shape_cast %328 : vector<16xf32> to vector<16x1xf32>
    %330 = tpu.reciprocal %329 {approx = true} : vector<16x1xf32> -> vector<16x1xf32>
    %331 = vector.broadcast %330 : vector<16x1xf32> to vector<16x8xf32>
    %332 = arith.mulf %327, %331 : vector<16x8xf32>
    %cst_221 = arith.constant dense<0.000000e+00> : vector<16x32xf32>
    %333 = tpu.matmul %332, %320, %cst_221 {dimension_numbers = #tpu.dot_dimension_numbers<[1], [0], [0], [1], [0, 0, 1, 1], [], []>} : vector<16x8xf32>, vector<8x32xf32>, vector<16x32xf32> -> vector<16x32xf32>
    %c3_222 = arith.constant 3 : index
    %c0_223 = arith.constant 0 : index
    %c0_224 = arith.constant 0 : index
    %334 = vector.load %arg17[%c3_222, %c0_223, %c0_224] : memref<4x32x32xf32, #tpu.memory_space<vmem>>, vector<1x32x32xf32>
    %335 = vector.shape_cast %334 : vector<1x32x32xf32> to vector<32x32xf32>
    %cst_225 = arith.constant dense<0.000000e+00> : vector<16x32xf32>
    %336 = tpu.matmul %333, %335, %cst_225 {dimension_numbers = #tpu.dot_dimension_numbers<[1], [0], [0], [1], [0, 0, 1, 1], [], []>} : vector<16x32xf32>, vector<32x32xf32>, vector<16x32xf32> -> vector<16x32xf32>
    %337 = arith.addf %311, %336 : vector<16x32xf32>
    %338 = arith.addf %337, %286 : vector<16x32xf32>
    %c4_226 = arith.constant 4 : index
    %c0_227 = arith.constant 0 : index
    %c0_228 = arith.constant 0 : index
    %339 = vector.load %arg18[%c4_226, %c0_227, %c0_228] : memref<6x1x32xf32, #tpu.memory_space<vmem>>, vector<1x1x32xf32>
    %340 = vector.shape_cast %339 : vector<1x1x32xf32> to vector<1x32xf32>
    %c4_229 = arith.constant 4 : index
    %c0_230 = arith.constant 0 : index
    %c0_231 = arith.constant 0 : index
    %341 = vector.load %arg19[%c4_229, %c0_230, %c0_231] : memref<6x1x32xf32, #tpu.memory_space<vmem>>, vector<1x1x32xf32>
    %342 = vector.shape_cast %341 : vector<1x1x32xf32> to vector<1x32xf32>
    %cst_232 = arith.constant dense<0.000000e+00> : vector<16xf32>
    %343 = vector.multi_reduction <add>, %338, %cst_232 [1] : vector<16x32xf32> to vector<16xf32>
    %344 = vector.shape_cast %343 : vector<16xf32> to vector<16x1xf32>
    %cst_233 = arith.constant 3.200000e+01 : f32
    %345 = vector.broadcast %cst_233 : f32 to vector<16x1xf32>
    %346 = arith.divf %344, %345 : vector<16x1xf32>
    %347 = vector.broadcast %346 : vector<16x1xf32> to vector<16x32xf32>
    %348 = arith.subf %338, %347 : vector<16x32xf32>
    %349 = arith.mulf %348, %348 : vector<16x32xf32>
    %cst_234 = arith.constant dense<0.000000e+00> : vector<16xf32>
    %350 = vector.multi_reduction <add>, %349, %cst_234 [1] : vector<16x32xf32> to vector<16xf32>
    %351 = vector.shape_cast %350 : vector<16xf32> to vector<16x1xf32>
    %cst_235 = arith.constant 3.200000e+01 : f32
    %352 = vector.broadcast %cst_235 : f32 to vector<16x1xf32>
    %353 = arith.divf %351, %352 : vector<16x1xf32>
    %354 = vector.broadcast %346 : vector<16x1xf32> to vector<16x32xf32>
    %355 = arith.subf %338, %354 : vector<16x32xf32>
    %cst_236 = arith.constant 9.99999997E-7 : f32
    %356 = vector.broadcast %cst_236 : f32 to vector<16x1xf32>
    %357 = arith.addf %353, %356 : vector<16x1xf32>
    %358 = math.rsqrt %357 : vector<16x1xf32>
    %359 = vector.broadcast %358 : vector<16x1xf32> to vector<16x32xf32>
    %360 = arith.mulf %355, %359 : vector<16x32xf32>
    %361 = vector.broadcast %340 : vector<1x32xf32> to vector<16x32xf32>
    %362 = arith.mulf %360, %361 : vector<16x32xf32>
    %363 = vector.broadcast %342 : vector<1x32xf32> to vector<16x32xf32>
    %364 = arith.addf %362, %363 : vector<16x32xf32>
    %c1_237 = arith.constant 1 : index
    %c0_238 = arith.constant 0 : index
    %c0_239 = arith.constant 0 : index
    %365 = vector.load %arg20[%c1_237, %c0_238, %c0_239] : memref<2x32x64xf32, #tpu.memory_space<vmem>>, vector<1x32x64xf32>
    %366 = vector.shape_cast %365 : vector<1x32x64xf32> to vector<32x64xf32>
    %cst_240 = arith.constant dense<0.000000e+00> : vector<16x64xf32>
    %367 = tpu.matmul %364, %366, %cst_240 {dimension_numbers = #tpu.dot_dimension_numbers<[1], [0], [0], [1], [0, 0, 1, 1], [], []>} : vector<16x32xf32>, vector<32x64xf32>, vector<16x64xf32> -> vector<16x64xf32>
    %c1_241 = arith.constant 1 : index
    %c0_242 = arith.constant 0 : index
    %c0_243 = arith.constant 0 : index
    %368 = vector.load %arg21[%c1_241, %c0_242, %c0_243] : memref<2x1x64xf32, #tpu.memory_space<vmem>>, vector<1x1x64xf32>
    %369 = vector.shape_cast %368 : vector<1x1x64xf32> to vector<1x64xf32>
    %370 = vector.broadcast %369 : vector<1x64xf32> to vector<16x64xf32>
    %371 = arith.addf %367, %370 : vector<16x64xf32>
    %cst_244 = arith.constant 0.000000e+00 : f32
    %372 = vector.broadcast %cst_244 : f32 to vector<16x64xf32>
    %373 = arith.maximumf %371, %372 : vector<16x64xf32>
    %c1_245 = arith.constant 1 : index
    %c0_246 = arith.constant 0 : index
    %c0_247 = arith.constant 0 : index
    %374 = vector.load %arg22[%c1_245, %c0_246, %c0_247] : memref<2x64x32xf32, #tpu.memory_space<vmem>>, vector<1x64x32xf32>
    %375 = vector.shape_cast %374 : vector<1x64x32xf32> to vector<64x32xf32>
    %cst_248 = arith.constant dense<0.000000e+00> : vector<16x32xf32>
    %376 = tpu.matmul %373, %375, %cst_248 {dimension_numbers = #tpu.dot_dimension_numbers<[1], [0], [0], [1], [0, 0, 1, 1], [], []>} : vector<16x64xf32>, vector<64x32xf32>, vector<16x32xf32> -> vector<16x32xf32>
    %c1_249 = arith.constant 1 : index
    %c0_250 = arith.constant 0 : index
    %c0_251 = arith.constant 0 : index
    %377 = vector.load %arg23[%c1_249, %c0_250, %c0_251] : memref<2x1x32xf32, #tpu.memory_space<vmem>>, vector<1x1x32xf32>
    %378 = vector.shape_cast %377 : vector<1x1x32xf32> to vector<1x32xf32>
    %379 = vector.broadcast %378 : vector<1x32xf32> to vector<16x32xf32>
    %380 = arith.addf %376, %379 : vector<16x32xf32>
    %381 = arith.addf %380, %364 : vector<16x32xf32>
    %c5_252 = arith.constant 5 : index
    %c0_253 = arith.constant 0 : index
    %c0_254 = arith.constant 0 : index
    %382 = vector.load %arg18[%c5_252, %c0_253, %c0_254] : memref<6x1x32xf32, #tpu.memory_space<vmem>>, vector<1x1x32xf32>
    %383 = vector.shape_cast %382 : vector<1x1x32xf32> to vector<1x32xf32>
    %c5_255 = arith.constant 5 : index
    %c0_256 = arith.constant 0 : index
    %c0_257 = arith.constant 0 : index
    %384 = vector.load %arg19[%c5_255, %c0_256, %c0_257] : memref<6x1x32xf32, #tpu.memory_space<vmem>>, vector<1x1x32xf32>
    %385 = vector.shape_cast %384 : vector<1x1x32xf32> to vector<1x32xf32>
    %cst_258 = arith.constant dense<0.000000e+00> : vector<16xf32>
    %386 = vector.multi_reduction <add>, %381, %cst_258 [1] : vector<16x32xf32> to vector<16xf32>
    %387 = vector.shape_cast %386 : vector<16xf32> to vector<16x1xf32>
    %cst_259 = arith.constant 3.200000e+01 : f32
    %388 = vector.broadcast %cst_259 : f32 to vector<16x1xf32>
    %389 = arith.divf %387, %388 : vector<16x1xf32>
    %390 = vector.broadcast %389 : vector<16x1xf32> to vector<16x32xf32>
    %391 = arith.subf %381, %390 : vector<16x32xf32>
    %392 = arith.mulf %391, %391 : vector<16x32xf32>
    %cst_260 = arith.constant dense<0.000000e+00> : vector<16xf32>
    %393 = vector.multi_reduction <add>, %392, %cst_260 [1] : vector<16x32xf32> to vector<16xf32>
    %394 = vector.shape_cast %393 : vector<16xf32> to vector<16x1xf32>
    %cst_261 = arith.constant 3.200000e+01 : f32
    %395 = vector.broadcast %cst_261 : f32 to vector<16x1xf32>
    %396 = arith.divf %394, %395 : vector<16x1xf32>
    %397 = vector.broadcast %389 : vector<16x1xf32> to vector<16x32xf32>
    %398 = arith.subf %381, %397 : vector<16x32xf32>
    %cst_262 = arith.constant 9.99999997E-7 : f32
    %399 = vector.broadcast %cst_262 : f32 to vector<16x1xf32>
    %400 = arith.addf %396, %399 : vector<16x1xf32>
    %401 = math.rsqrt %400 : vector<16x1xf32>
    %402 = vector.broadcast %401 : vector<16x1xf32> to vector<16x32xf32>
    %403 = arith.mulf %398, %402 : vector<16x32xf32>
    %404 = vector.broadcast %383 : vector<1x32xf32> to vector<16x32xf32>
    %405 = arith.mulf %403, %404 : vector<16x32xf32>
    %406 = vector.broadcast %385 : vector<1x32xf32> to vector<16x32xf32>
    %407 = arith.addf %405, %406 : vector<16x32xf32>
    %c0_263 = arith.constant 0 : index
    %c0_264 = arith.constant 0 : index
    %408 = vector.load %arg10[%c0_263, %c0_264] : memref<16x16xf32, #tpu.memory_space<vmem>>, vector<16x16xf32>
    %cst_265 = arith.constant dense<0.000000e+00> : vector<16x32xf32>
    %409 = tpu.matmul %408, %203, %cst_265 {dimension_numbers = #tpu.dot_dimension_numbers<[1], [0], [0], [1], [0, 0, 1, 1], [], []>} : vector<16x16xf32>, vector<16x32xf32>, vector<16x32xf32> -> vector<16x32xf32>
    %c0_266 = arith.constant 0 : index
    %c0_267 = arith.constant 0 : index
    %410 = vector.load %arg11[%c0_266, %c0_267] : memref<16x16xf32, #tpu.memory_space<vmem>>, vector<16x16xf32>
    %cst_268 = arith.constant dense<0.000000e+00> : vector<16x32xf32>
    %411 = tpu.matmul %410, %203, %cst_268 {dimension_numbers = #tpu.dot_dimension_numbers<[1], [0], [0], [1], [0, 0, 1, 1], [], []>} : vector<16x16xf32>, vector<16x32xf32>, vector<16x32xf32> -> vector<16x32xf32>
    %c0_269 = arith.constant 0 : index
    %c0_270 = arith.constant 0 : index
    %c0_271 = arith.constant 0 : index
    %412 = vector.load %arg24[%c0_269, %c0_270, %c0_271] : memref<3x32x96xf32, #tpu.memory_space<vmem>>, vector<1x32x96xf32>
    %413 = vector.shape_cast %412 : vector<1x32x96xf32> to vector<32x96xf32>
    %cst_272 = arith.constant dense<0.000000e+00> : vector<16x96xf32>
    %414 = tpu.matmul %409, %413, %cst_272 {dimension_numbers = #tpu.dot_dimension_numbers<[1], [0], [0], [1], [0, 0, 1, 1], [], []>} : vector<16x32xf32>, vector<32x96xf32>, vector<16x96xf32> -> vector<16x96xf32>
    %c1_273 = arith.constant 1 : index
    %c0_274 = arith.constant 0 : index
    %c0_275 = arith.constant 0 : index
    %415 = vector.load %arg24[%c1_273, %c0_274, %c0_275] : memref<3x32x96xf32, #tpu.memory_space<vmem>>, vector<1x32x96xf32>
    %416 = vector.shape_cast %415 : vector<1x32x96xf32> to vector<32x96xf32>
    %cst_276 = arith.constant dense<0.000000e+00> : vector<16x96xf32>
    %417 = tpu.matmul %411, %416, %cst_276 {dimension_numbers = #tpu.dot_dimension_numbers<[1], [0], [0], [1], [0, 0, 1, 1], [], []>} : vector<16x32xf32>, vector<32x96xf32>, vector<16x96xf32> -> vector<16x96xf32>
    %418 = arith.addf %414, %417 : vector<16x96xf32>
    %c2_277 = arith.constant 2 : index
    %c0_278 = arith.constant 0 : index
    %c0_279 = arith.constant 0 : index
    %419 = vector.load %arg24[%c2_277, %c0_278, %c0_279] : memref<3x32x96xf32, #tpu.memory_space<vmem>>, vector<1x32x96xf32>
    %420 = vector.shape_cast %419 : vector<1x32x96xf32> to vector<32x96xf32>
    %cst_280 = arith.constant dense<0.000000e+00> : vector<16x96xf32>
    %421 = tpu.matmul %407, %420, %cst_280 {dimension_numbers = #tpu.dot_dimension_numbers<[1], [0], [0], [1], [0, 0, 1, 1], [], []>} : vector<16x32xf32>, vector<32x96xf32>, vector<16x96xf32> -> vector<16x96xf32>
    %422 = arith.addf %418, %421 : vector<16x96xf32>
    %423 = math.tanh %422 : vector<16x96xf32>
    %c0_281 = arith.constant 0 : index
    %c0_282 = arith.constant 0 : index
    %c0_283 = arith.constant 0 : index
    %424 = vector.load %arg25[%c0_281, %c0_282, %c0_283] : memref<3x32x96xf32, #tpu.memory_space<vmem>>, vector<1x32x96xf32>
    %425 = vector.shape_cast %424 : vector<1x32x96xf32> to vector<32x96xf32>
    %cst_284 = arith.constant dense<0.000000e+00> : vector<16x96xf32>
    %426 = tpu.matmul %409, %425, %cst_284 {dimension_numbers = #tpu.dot_dimension_numbers<[1], [0], [0], [1], [0, 0, 1, 1], [], []>} : vector<16x32xf32>, vector<32x96xf32>, vector<16x96xf32> -> vector<16x96xf32>
    %c1_285 = arith.constant 1 : index
    %c0_286 = arith.constant 0 : index
    %c0_287 = arith.constant 0 : index
    %427 = vector.load %arg25[%c1_285, %c0_286, %c0_287] : memref<3x32x96xf32, #tpu.memory_space<vmem>>, vector<1x32x96xf32>
    %428 = vector.shape_cast %427 : vector<1x32x96xf32> to vector<32x96xf32>
    %cst_288 = arith.constant dense<0.000000e+00> : vector<16x96xf32>
    %429 = tpu.matmul %411, %428, %cst_288 {dimension_numbers = #tpu.dot_dimension_numbers<[1], [0], [0], [1], [0, 0, 1, 1], [], []>} : vector<16x32xf32>, vector<32x96xf32>, vector<16x96xf32> -> vector<16x96xf32>
    %430 = arith.addf %426, %429 : vector<16x96xf32>
    %c2_289 = arith.constant 2 : index
    %c0_290 = arith.constant 0 : index
    %c0_291 = arith.constant 0 : index
    %431 = vector.load %arg25[%c2_289, %c0_290, %c0_291] : memref<3x32x96xf32, #tpu.memory_space<vmem>>, vector<1x32x96xf32>
    %432 = vector.shape_cast %431 : vector<1x32x96xf32> to vector<32x96xf32>
    %cst_292 = arith.constant dense<0.000000e+00> : vector<16x96xf32>
    %433 = tpu.matmul %407, %432, %cst_292 {dimension_numbers = #tpu.dot_dimension_numbers<[1], [0], [0], [1], [0, 0, 1, 1], [], []>} : vector<16x32xf32>, vector<32x96xf32>, vector<16x96xf32> -> vector<16x96xf32>
    %434 = arith.addf %430, %433 : vector<16x96xf32>
    %435 = arith.negf %434 : vector<16x96xf32>
    %436 = math.exp %435 : vector<16x96xf32>
    %cst_293 = arith.constant 1.000000e+00 : f32
    %437 = vector.broadcast %cst_293 : f32 to vector<16x96xf32>
    %438 = arith.addf %437, %436 : vector<16x96xf32>
    %439 = arith.divf %437, %438 : vector<16x96xf32>
    %c0_294 = arith.constant 0 : index
    %c0_295 = arith.constant 0 : index
    %440 = vector.load %arg12[%c0_294, %c0_295] : memref<16x96xf32, #tpu.memory_space<vmem>>, vector<16x96xf32>
    %441 = arith.mulf %440, %439 : vector<16x96xf32>
    %442 = arith.mulf %441, %423 : vector<16x96xf32>
    %c0_296 = arith.constant 0 : index
    %c0_297 = arith.constant 0 : index
    %443 = vector.load %arg26[%c0_296, %c0_297] : memref<96x32xf32, #tpu.memory_space<vmem>>, vector<96x32xf32>
    %cst_298 = arith.constant dense<0.000000e+00> : vector<16x32xf32>
    %444 = tpu.matmul %442, %443, %cst_298 {dimension_numbers = #tpu.dot_dimension_numbers<[1], [0], [0], [1], [0, 0, 1, 1], [], []>} : vector<16x96xf32>, vector<96x32xf32>, vector<16x32xf32> -> vector<16x32xf32>
    %445 = arith.negf %444 : vector<16x32xf32>
    %446 = math.exp %445 : vector<16x32xf32>
    %cst_299 = arith.constant 1.000000e+00 : f32
    %447 = vector.broadcast %cst_299 : f32 to vector<16x32xf32>
    %448 = arith.addf %447, %446 : vector<16x32xf32>
    %449 = arith.divf %447, %448 : vector<16x32xf32>
    %c0_300 = arith.constant 0 : index
    %c0_301 = arith.constant 0 : index
    %450 = vector.load %arg13[%c0_300, %c0_301] : memref<16x32xf32, #tpu.memory_space<vmem>>, vector<16x32xf32>
    %451 = arith.addf %449, %450 : vector<16x32xf32>
    %c0_302 = arith.constant 0 : index
    %c0_303 = arith.constant 0 : index
    %452 = vector.load %arg27[%c0_302, %c0_303] : memref<32x128xf32, #tpu.memory_space<vmem>>, vector<32x128xf32>
    %cst_304 = arith.constant dense<0.000000e+00> : vector<16x128xf32>
    %453 = tpu.matmul %451, %452, %cst_304 {dimension_numbers = #tpu.dot_dimension_numbers<[1], [0], [0], [1], [0, 0, 1, 1], [], []>} : vector<16x32xf32>, vector<32x128xf32>, vector<16x128xf32> -> vector<16x128xf32>
    %c0_305 = arith.constant 0 : index
    %c0_306 = arith.constant 0 : index
    %454 = vector.load %arg28[%c0_305, %c0_306] : memref<16x128xf32, #tpu.memory_space<vmem>>, vector<16x128xf32>
    tpu.vector_store %arg28[%c0_305, %c0_306], %453 {strides = array<i32>} : memref<16x128xf32, #tpu.memory_space<vmem>>, vector<16x128xf32>,
    return
  }
}

</mosaic_0001>

<bundles_post_ra>
// kernel: shot_gen_predictor.1
= control target key start
LH: loop header
LB: loop body
LE: loop exit
PB: predicated region body
PF: predicated region fallthrough
CT: control target
= control target key end

     0   :  { %vm106_vm0 = vcmask 523264   ;;  %vm356_vm1 = vcmask 261120   ;;  %vm444_vm2 = vcmask 130048   ;;  %vm7380_vm3 = vmmov 0   ;;  %s8780_s14 = inlined_call_operand.vmem [shape: f32[12,64,32], index: 14, kind: input, shape index: {}]   ;;  %s8781_s0 = inlined_call_operand.vmem [shape: f32[16,64], index: 0, kind: input, shape index: {}]   ;;  %s8782_s6 = inlined_call_operand.vmem [shape: f32[16,16], index: 6, kind: input, shape index: {}]   ;;  %s8783_s15 = inlined_call_operand.vmem [shape: f32[4,32,32], index: 15, kind: input, shape index: {}]   ;;  %s8784_s1 = inlined_call_operand.vmem [shape: f32[16,32], index: 1, kind: input, shape index: {}]   ;;  %s8785_s16 = inlined_call_operand.vmem [shape: f32[12,32,32], index: 16, kind: input, shape index: {}]   ;;  %s8786_s2 = inlined_call_operand.vmem [shape: f32[8,32], index: 2, kind: input, shape index: {}]   ;;  %s8787_s18 = inlined_call_operand.vmem [shape: f32[6,1,32], index: 18, kind: input, shape index: {}]   ;;  %s8788_s19 = inlined_call_operand.vmem [shape: f32[6,1,32], index: 19, kind: input, shape index: {}]   ;;  %s8789_s7 = inlined_call_operand.vmem [shape: f32[16,8], index: 7, kind: input, shape index: {}]   ;;  %s8790_s17 = inlined_call_operand.vmem [shape: f32[4,32,32], index: 17, kind: input, shape index: {}]   ;;  %s8791_s20 = inlined_call_operand.vmem [shape: f32[2,32,64], index: 20, kind: input, shape index: {}]   ;;  %s8792_s22 = inlined_call_operand.vmem [shape: f32[2,64,32], index: 22, kind: input, shape index: {}]   ;;  %s8793_s3 = inlined_call_operand.vmem [shape: f32[16,64], index: 3, kind: input, shape index: {}]   ;;  %s8794_s21 = inlined_call_operand.vmem [shape: f32[2,1,64], index: 21, kind: input, shape index: {}]   ;;  %s8795_s8 = inlined_call_operand.vmem [shape: f32[16,16], index: 8, kind: input, shape index: {}]   ;;  %s8796_s4 = inlined_call_operand.vmem [shape: f32[16,32], index: 4, kind: input, shape index: {}]   ;;  %s8797_s5 = inlined_call_operand.vmem [shape: f32[8,32], index: 5, kind: input, shape index: {}]   ;;  %s8798_s9 = inlined_call_operand.vmem [shape: f32[16,8], index: 9, kind: input, shape index: {}]   ;;  %s8799_s23 = inlined_call_operand.vmem [shape: f32[2,1,32], index: 23, kind: input, shape index: {}]   ;;  %s8800_s10 = inlined_call_operand.vmem [shape: f32[16,16], index: 10, kind: input, shape index: {}]   ;;  %s8801_s11 = inlined_call_operand.vmem [shape: f32[16,16], index: 11, kind: input, shape index: {}]   ;;  %s8802_s24 = inlined_call_operand.vmem [shape: f32[3,32,96], index: 24, kind: input, shape index: {}]   ;;  %s8803_s25 = inlined_call_operand.vmem [shape: f32[3,32,96], index: 25, kind: input, shape index: {}]   ;;  %s8804_s26 = inlined_call_operand.vmem [shape: f32[96,32], index: 26, kind: input, shape index: {}]   ;;  %s8805_s12 = inlined_call_operand.vmem [shape: f32[16,96], index: 12, kind: input, shape index: {}]   ;;  %s8806_s27 = inlined_call_operand.vmem [shape: f32[32,128], index: 27, kind: input, shape index: {}]   ;;  %s8807_s13 = inlined_call_operand.vmem [shape: f32[16,32], index: 13, kind: input, shape index: {}]   ;;  %s8808_s28 = inlined_call_operand.vmem [shape: f32[16,128], index: 28, kind: output, shape index: {}]  }
   0x1   :  { %8822 = sst [smem:[#allocation2_spill]] %s8780_s14  ;;  %vm1530_vm4 = vcmask 64512   ;;  %vm5630_vm5 = vcmask 785408  }
   0x2   :  { %8823 = sst [smem:[#allocation3_spill]] %s8781_s0 }
   0x3   :  { %8824 = sst [smem:[#allocation4_spill]] %s8782_s6 }
   0x4   :  { %8825 = sst [smem:[#allocation5_spill]] %s8783_s15 }
   0x5   :  { %8826 = sst [smem:[#allocation6_spill]] %s8784_s1 }
   0x6   :  { %8827 = sst [smem:[#allocation7_spill]] %s8785_s16 }
   0x7   :  { %8828 = sst [smem:[#allocation8_spill]] %s8786_s2 }
   0x8   :  { %8829 = sst [smem:[#allocation9_spill]] %s8787_s18 }
   0x9   :  { %8830 = sst [smem:[#allocation10_spill]] %s8788_s19 }
   0xa   :  { %8831 = sst [smem:[#allocation11_spill]] %s8789_s7 }
   0xb   :  { %8832 = sst [smem:[#allocation12_spill]] %s8790_s17 }
   0xc   :  { %8833 = sst [smem:[#allocation13_spill]] %s8791_s20 }
   0xd   :  { %8834 = sst [smem:[#allocation14_spill]] %s8792_s22 }
   0xe   :  { %8835 = sst [smem:[#allocation15_spill]] %s8808_s28 }
   0xf   :  { %s8836_s16 = sld [smem:[#allocation2_spill]] }
  0x10   :  { %s8837_s30 = sld [smem:[#allocation3_spill]] }
  0x11   :  { %s8838_s14 = sld [smem:[#allocation4_spill]] }
  0x12   :  { %s8839_s18 = sld [smem:[#allocation5_spill]] }
  0x13   :  { %s8840_s7 = sld [smem:[#allocation6_spill]] }
  0x14   :  { %s8841_s17 = sld [smem:[#allocation7_spill]] }
  0x15   :  { %v5828_v0 = vld [vmem:[%s8836_s16 + $0xb8] sm:$0xff]  ;;  %v5827_v1 = vld [vmem:[%s8836_s16 + $0xb0] sm:$0xff]  ;;  %v5826_v4 = vld [vmem:[%s8836_s16 + $0xa8] sm:$0xff]  ;;  %s8842_s22 = sld [smem:[#allocation8_spill]] }
  0x16   :  { %v105_v2 = vld [vmem:[%s8836_s16 + $0x38] sm:$0xff]  ;;  %6566 = vmatprep.subr.mxu1 %v5828_v0  ;;  %v104_v3 = vld [vmem:[%s8836_s16 + $0x30] sm:$0xff]  ;;  %v103_v5 = vld [vmem:[%s8836_s16 + $0x28] sm:$0xff]  ;;  %s8844_s2 = sld [smem:[#allocation10_spill]] }
  0x17   :  { %6547 = vmatprep.subr.mxu0 %v105_v2  ;;  %6567 = vmatpush3.msra.mxu1 %v5828_v0  ;;  %v5825_v6 = vld [vmem:[%s8836_s16 + $0xa0] sm:$0xff]  ;;  %v5824_v8 = vld [vmem:[%s8836_s16 + $0x98] sm:$0xff]  ;;  %v5823_v10 = vld [vmem:[%s8836_s16 + $0x90] sm:$0xff]  ;;  %s8845_s19 = sld [smem:[#allocation11_spill]] }
  0x18   :  { %6548 = vmatpush3.msra.mxu0 %v105_v2  ;;  %6568 = vmatprep.subr.mxu1 %v5827_v1  ;;  %v102_v7 = vld [vmem:[%s8836_s16 + $0x20] sm:$0xff]  ;;  %v101_v9 = vld [vmem:[%s8836_s16 + $0x18] sm:$0xff]  ;;  %v100_v11 = vld [vmem:[%s8836_s16 + $0x10] sm:$0xff] }
  0x19   :  { %6549 = vmatprep.subr.mxu0 %v104_v3  ;;  %6569 = vmatpush3.msra.mxu1 %v5827_v1  ;;  %v5822_v12 = vld [vmem:[%s8836_s16 + $0x88] sm:$0xff]  ;;  %v7571_v14 = vld [vmem:[%s8837_s30] sm:$0xff]  ;;  %v5838_v22 = vld [vmem:[%s8836_s16 + $0x138] sm:$0xff] }
  0x1a   :  { %6550 = vmatpush3.msra.mxu0 %v104_v3  ;;  %6570 = vmatprep.subr.mxu1 %v5826_v4  ;;  %v99_v13 = vld [vmem:[%s8836_s16 + $0x8] sm:$0xff]  ;;  %v5821_v15 = vld [vmem:[%s8836_s16 + $0x80] sm:$0xff]  ;;  %v5837_v23 = vld [vmem:[%s8836_s16 + $0x130] sm:$0xff] }
  0x1b   :  { %6551 = vmatprep.subr.mxu0 %v103_v5  ;;  %6571 = vmatpush3.msra.mxu1 %v5826_v4  ;;  %v98_v16 = vld [vmem:[%s8836_s16] sm:$0xff]  ;;  %v7584_v17 = vld [vmem:[%s8837_s30 + $0x8] sm:$0xff]  ;;  %v5834_v26 = vld [vmem:[%s8836_s16 + $0x118] sm:$0xff]  ;;  %s8846_s30 = sld [smem:[#allocation12_spill]] }
  0x1c   :  { %6552 = vmatpush3.msra.mxu0 %v103_v5  ;;  %6572 = vmatprep.subr.mxu1 %v5825_v6  ;;  %v5836_v24 = vld [vmem:[%s8836_s16 + $0x128] sm:$0xff]  ;;  %v5835_v25 = vld [vmem:[%s8836_s16 + $0x120] sm:$0xff]  ;;  %v5833_v27 = vld [vmem:[%s8836_s16 + $0x110] sm:$0xff] }
  0x1d   :  { %6553 = vmatprep.subr.mxu0 %v102_v7  ;;  %6573 = vmatpush3.msra.mxu1 %v5825_v6  ;;  %v5832_v28 = vld [vmem:[%s8836_s16 + $0x108] sm:$0xff]  ;;  %v5831_v29 = vld [vmem:[%s8836_s16 + $0x100] sm:$0xff]  ;;  %v5864_v48 = vld [vmem:[%s8836_s16 + $0xf8] sm:$0xff] }
  0x1e   :  { %6554 = vmatpush3.msra.mxu0 %v102_v7  ;;  %6574 = vmatprep.subr.mxu1 %v5824_v8  ;;  %v7631_v31 = vld [vmem:[%s8838_s14] sm:$0xff]  ;;  %v7636_v32 = vld [vmem:[%s8838_s14 + $0x8] sm:$0xff]  ;;  %v5863_v50 = vld [vmem:[%s8836_s16 + $0xf0] sm:$0xff]  ;;  %s8847_s14 = sld [smem:[#allocation13_spill]] }
  0x1f   :  { %6555 = vmatprep.subr.mxu0 %v101_v9  ;;  %6575 = vmatpush3.msra.mxu1 %v5824_v8  ;;  %v5862_v52 = vld [vmem:[%s8836_s16 + $0xe8] sm:$0xff]  ;;  %v5861_v53 = vld [vmem:[%s8836_s16 + $0xe0] sm:$0xff]  ;;  %v5860_v54 = vld [vmem:[%s8836_s16 + $0xd8] sm:$0xff] }
  0x20   :  { %6556 = vmatpush3.msra.mxu0 %v101_v9  ;;  %6576 = vmatprep.subr.mxu1 %v5823_v10  ;;  %v5854_v55 = vld [vmem:[%s8836_s16 + $0x78] sm:$0xff]  ;;  %v5859_v56 = vld [vmem:[%s8836_s16 + $0xd0] sm:$0xff]  ;;  %v5858_v57 = vld [vmem:[%s8836_s16 + $0xc8] sm:$0xff] }
  0x21   :  { %6557 = vmatprep.subr.mxu0 %v100_v11  ;;  %6577 = vmatpush3.msra.mxu1 %v5823_v10  ;;  %v5857_v58 = vld [vmem:[%s8836_s16 + $0xc0] sm:$0xff]  ;;  %v5853_v1 = vld [vmem:[%s8836_s16 + $0x70] sm:$0xff]  ;;  %v5852_v2 = vld [vmem:[%s8836_s16 + $0x68] sm:$0xff] }
  0x22   :  { %6558 = vmatpush3.msra.mxu0 %v100_v11  ;;  %6578 = vmatprep.subr.mxu1 %v5822_v12  ;;  %v5851_v3 = vld [vmem:[%s8836_s16 + $0x60] sm:$0xff]  ;;  %v5850_v4 = vld [vmem:[%s8836_s16 + $0x58] sm:$0xff]  ;;  %v5849_v5 = vld [vmem:[%s8836_s16 + $0x50] sm:$0xff] }
  0x23   :  { %6559 = vmatprep.subr.mxu0 %v99_v13  ;;  %6579 = vmatpush3.msra.mxu1 %v5822_v12  ;;  %v5848_v6 = vld [vmem:[%s8836_s16 + $0x48] sm:$0xff]  ;;  %v5847_v7 = vld [vmem:[%s8836_s16 + $0x40] sm:$0xff]  ;;  %v5874_v8 = vld [vmem:[%s8836_s16 + $0x178] sm:$0xff] }
  0x24   :  { %6582 = vmatprep.mubr.msk.f32.mxu1 %vm106_vm0, %v7571_v14  ;;  %6580 = vmatprep.subr.mxu1 %v5821_v15  ;;  %v5873_v9 = vld [vmem:[%s8836_s16 + $0x170] sm:$0xff]  ;;  %v5872_v10 = vld [vmem:[%s8836_s16 + $0x168] sm:$0xff]  ;;  %v5871_v11 = vld [vmem:[%s8836_s16 + $0x160] sm:$0xff] }
  0x25   :  { %6560 = vmatpush3.msra.mxu0 %v99_v13  ;;  %6581 = vmatpush3.msra.mxu1 %v5821_v15  ;;  %v5870_v12 = vld [vmem:[%s8836_s16 + $0x158] sm:$0xff]  ;;  %v5869_v13 = vld [vmem:[%s8836_s16 + $0x150] sm:$0xff]  ;;  %v5867_v15 = vld [vmem:[%s8836_s16 + $0x140] sm:$0xff] }
  0x26   :  { %6561 = vmatprep.subr.mxu0 %v98_v16  ;;  %6583 = vmatmul.mubr.msk.f32.vlgmr.msra.gmra.mxu1 %vm106_vm0, %v7584_v17 }
  0x27   :  { %6562 = vmatpush3.msra.mxu0 %v98_v16  ;;  %6563 = vmatprep.mubr.msk.f32.mxu0 %vm106_vm0, %v7571_v14 }
  0x28   :  { %6564 = vmatmul.mubr.msk.f32.vlgmr.msra.gmra.mxu0 %vm106_vm0, %v7584_v17  ;;  %6585 = vmatprep.subr.mxu0 %v5838_v22 }
  0x29   :  { %6601 = vmatprep.mubr.msk.f32.mxu0 %vm106_vm0, %v7571_v14  ;;  %6586 = vmatpush3.msra.mxu0 %v5838_v22 }
  0x2a   :  { %6587 = vmatprep.subr.mxu0 %v5837_v23 }
  0x2b   :  { %6588 = vmatpush3.msra.mxu0 %v5837_v23 }
  0x2c   :  { %6589 = vmatprep.subr.mxu0 %v5836_v24 }
  0x2d   :  { %6590 = vmatpush3.msra.mxu0 %v5836_v24  ;;  %v549_v24 = vld [vmem:[%s8839_s18 + $0x8] sm:$0xff] }
  0x2e   :  { %6591 = vmatprep.subr.mxu0 %v5835_v25 }
  0x2f   :  { %6592 = vmatpush3.msra.mxu0 %v5835_v25  ;;  %v548_v25 = vld [vmem:[%s8839_s18] sm:$0xff] }
  0x30   :  { %6593 = vmatprep.subr.mxu0 %v5834_v26 }
  0x31   :  { %6594 = vmatpush3.msra.mxu0 %v5834_v26 }
  0x32   :  { %6595 = vmatprep.subr.mxu0 %v5833_v27 }
  0x33   :  { %6596 = vmatpush3.msra.mxu0 %v5833_v27 }
  0x34   :  { %6597 = vmatprep.subr.mxu0 %v5832_v28 }
  0x35   :  { %6598 = vmatpush3.msra.mxu0 %v5832_v28 }
  0x36   :  { %6599 = vmatprep.subr.mxu0 %v5831_v29 }
  0x37   :  { %6600 = vmatpush3.msra.mxu0 %v5831_v29 }
  0x38   :  { %6602 = vmatmul.mubr.msk.f32.vlgmr.msra.gmra.mxu0 %vm106_vm0, %v7584_v17  ;;  %6637 = vmatprep.subr.mxu0 %v5864_v48 }
  0x39   :  { %6653 = vmatprep.mubr.msk.f32.mxu0 %vm106_vm0, %v7571_v14  ;;  %6638 = vmatpush3.msra.mxu0 %v5864_v48 }
  0x3a   :  { %6639 = vmatprep.subr.mxu0 %v5863_v50 }
  0x3b   :  { %6640 = vmatpush3.msra.mxu0 %v5863_v50 }
  0x3c   :  { %6641 = vmatprep.subr.mxu0 %v5862_v52 }
  0x3d   :  { %6642 = vmatpush3.msra.mxu0 %v5862_v52  ;;  %v5884_v52 = vld [vmem:[%s8839_s18 + $0x28] sm:$0xff] }
  0x3e   :  { %6643 = vmatprep.subr.mxu0 %v5861_v53 }
  0x3f   :  { %6644 = vmatpush3.msra.mxu0 %v5861_v53  ;;  %v5883_v53 = vld [vmem:[%s8839_s18 + $0x20] sm:$0xff] }
  0x40   :  { %6645 = vmatprep.subr.mxu0 %v5860_v54 }
  0x41   :  { %6646 = vmatpush3.msra.mxu0 %v5860_v54 }
  0x42   :  { %6647 = vmatprep.subr.mxu0 %v5859_v56 }
  0x43   :  { %6648 = vmatpush3.msra.mxu0 %v5859_v56 }
  0x44   :  { %6649 = vmatprep.subr.mxu0 %v5858_v57 }
  0x45   :  { %6650 = vmatpush3.msra.mxu0 %v5858_v57 }
  0x46   :  { %6651 = vmatprep.subr.mxu0 %v5857_v58 }
  0x47   :  { %6652 = vmatpush3.msra.mxu0 %v5857_v58  ;;  %v92_v58 = vld [vmem:[%s8840_s7 + $0x8] sm:$0xff] }
  0x48   :  { %6654 = vmatmul.mubr.msk.f32.vlgmr.msra.gmra.mxu0 %vm106_vm0, %v7584_v17 }
  0xe6   :  { %v6584_v18 = vpop.f32.mrf.mxu1 }
  0xe7   :  { %6604 = vmatprep.subr.msk.mxu1 %vm356_vm1, %v6584_v18 }
  0xe8   :  { %v263_v19 = vpop.f32.mrf.mxu1  ;;  %6605 = vmatpush3.xpose.msk.msra.mxu1 %vm356_vm1, %v6584_v18  ;;  %v6565_v20 = vpop.f32.mrf.mxu0 }
  0xe9   :  { %6606 = vmatprep.subr.msk.mxu1 %vm356_vm1, %v263_v19 }
  0xea   :  { %v179_v21 = vpop.f32.mrf.mxu0 }
  0xeb   :  { %6608 = vmatprep.mubr.msk.f32.mxu1 %vm356_vm1, %v179_v21 }
  0xec   :  { %6607 = vmatpush3.xpose.msk.msra.mxu1 %vm356_vm1, %v263_v19  ;;  %v551_v19 = vld [vmem:[%s8839_s18 + $0x18] sm:$0xff] }
  0xef   :  { %6609 = vmatmul.mubr.msk.f32.vlgmr.msra.gmra.mxu1 %vm356_vm1, %v6565_v20 }
  0xf8   :  { %v6603_v49 = vpop.f32.mrf.mxu0 }
  0xf9   :  { %6611 = vmatprep.subr.mxu1 %v6603_v49 }
  0xfa   :  { %v347_v51 = vpop.f32.mrf.mxu0  ;;  %6612 = vmatpush3.msra.mxu1 %v6603_v49 }
  0xfb   :  { %6613 = vmatprep.subr.mxu1 %v347_v51 }
  0xfc   :  { %6614 = vmatpush3.msra.mxu1 %v347_v51  ;;  %v5885_v51 = vld [vmem:[%s8839_s18 + $0x30] sm:$0xff] }
  0xfd   :  { %6618 = vmatprep.subr.mxu1 %v5854_v55 }
 0x108   :  { %v6655_v16 = vpop.f32.mrf.mxu0 }
 0x10a   :  { %v711_v18 = vpop.f32.mrf.mxu0 }
 0x1af   :  { %v6610_v30 = vpop.f32.mrf.mxu1 }
 0x1b0   :  { %v441_v35 = vadd.f32 %v6610_v30, %v7636_v32 }
 0x1b1   :  { %v435_v33 = vpop.f32.mrf.mxu1 }
 0x1b2   :  { %v436_v34 = vadd.f32 %v435_v33, %v7631_v31  ;;  %v448_v37 = vsel %vm444_vm2, %v441_v35, -inf }
 0x1b4   :  { %v445_v36 = vsel %vm444_vm2, %v436_v34, -inf }
 0x1b5   :  { %446 = vmax.xlane.f32.xlu0 %v445_v36 }
 0x1b9   :  { %449 = vmax.xlane.f32.xlu0 %v448_v37 }
 0x23e   :  { %v447_v38 = vpop.xlane.xlu0 %446 }
 0x23f   :  { %v451_v39 = vsub.f32 %v436_v34, %v447_v38 }
 0x241   :  { %v453_v40 = vmul.f32 1.442695, %v451_v39 }
 0x242   :  { %v450_v41 = vpop.xlane.xlu0 %449 }
 0x243   :  { %7271 = vpow2.f32 %v453_v40  ;;  %v452_v42 = vsub.f32 %v441_v35, %v450_v41 }
 0x245   :  { %v455_v43 = vmul.f32 1.442695, %v452_v42 }
 0x247   :  { %7273 = vpow2.f32 %v455_v43 }
 0x250   :  { %v7272_v44 = vpop.eup %7271 }
 0x251   :  { %v457_v45 = vsel %vm444_vm2, %v7272_v44, 0.0 }
 0x252   :  { %458 = vadd.xlane.f32.xlu1 %v457_v45 }
 0x254   :  { %v7274_v46 = vpop.eup %7273 }
 0x255   :  { %v460_v47 = vsel %vm444_vm2, %v7274_v46, 0.0 }
 0x256   :  { %461 = vadd.xlane.f32.xlu1 %v460_v47 }
 0x2db   :  { %v459_v59 = vpop.xlane.xlu1 %458 }
 0x2dc   :  { %7275 = vrcp.f32 %v459_v59 }
 0x2df   :  { %v462_v60 = vpop.xlane.xlu1 %461 }
 0x2e0   :  { %7277 = vrcp.f32 %v462_v60 }
 0x2e9   :  { %v7276_v61 = vpop.eup %7275 }
 0x2ea   :  { %v465_v62 = vmul.f32 %v7276_v61, %v7272_v44  ;;  %v5886_v44 = vld [vmem:[%s8839_s18 + $0x38] sm:$0xff] }
 0x2ec   :  { %6615 = vmatprep.mubr.msk.f32.mxu1 %vm444_vm2, %v465_v62  ;;  %v91_v62 = vld [vmem:[%s8840_s7] sm:$0xff]  ;;  %s8843_s7 = sld [smem:[#allocation9_spill]] }
 0x2ed   :  { %v7278_v63 = vpop.eup %7277 }
 0x2ee   :  { %v466_v0 = vmul.f32 %v7278_v63, %v7274_v46 }
 0x2f0   :  { %6616 = vmatmul.mubr.msk.f32.vlgmr.msra.gmra.mxu1 %vm444_vm2, %v466_v0 }
 0x2f1   :  { %6619 = vmatpush3.msra.mxu1 %v5854_v55  ;;  %6634 = vmatprep.mubr.msk.f32.mxu1 %vm106_vm0, %v7571_v14 }
 0x2f2   :  { %6620 = vmatprep.subr.mxu1 %v5853_v1 }
 0x2f3   :  { %6621 = vmatpush3.msra.mxu1 %v5853_v1 }
 0x2f4   :  { %6622 = vmatprep.subr.mxu1 %v5852_v2 }
 0x2f5   :  { %6623 = vmatpush3.msra.mxu1 %v5852_v2 }
 0x2f6   :  { %6624 = vmatprep.subr.mxu1 %v5851_v3 }
 0x2f7   :  { %6625 = vmatpush3.msra.mxu1 %v5851_v3 }
 0x2f8   :  { %6626 = vmatprep.subr.mxu1 %v5850_v4 }
 0x2f9   :  { %6627 = vmatpush3.msra.mxu1 %v5850_v4 }
 0x2fa   :  { %6628 = vmatprep.subr.mxu1 %v5849_v5 }
 0x2fb   :  { %6629 = vmatpush3.msra.mxu1 %v5849_v5 }
 0x2fc   :  { %6630 = vmatprep.subr.mxu1 %v5848_v6 }
 0x2fd   :  { %6631 = vmatpush3.msra.mxu1 %v5848_v6 }
 0x2fe   :  { %6632 = vmatprep.subr.mxu1 %v5847_v7 }
 0x2ff   :  { %6633 = vmatpush3.msra.mxu1 %v5847_v7 }
 0x300   :  { %6635 = vmatmul.mubr.msk.f32.vlgmr.msra.gmra.mxu1 %vm106_vm0, %v7584_v17  ;;  %6656 = vmatprep.subr.mxu1 %v5874_v8 }
 0x301   :  { %6657 = vmatpush3.msra.mxu1 %v5874_v8  ;;  %6672 = vmatprep.mubr.msk.f32.mxu1 %vm106_vm0, %v7571_v14  ;;  %v5868_v14 = vld [vmem:[%s8836_s16 + $0x148] sm:$0xff] }
 0x302   :  { %6658 = vmatprep.subr.mxu1 %v5873_v9 }
 0x303   :  { %6659 = vmatpush3.msra.mxu1 %v5873_v9 }
 0x304   :  { %6660 = vmatprep.subr.mxu1 %v5872_v10 }
 0x305   :  { %6661 = vmatpush3.msra.mxu1 %v5872_v10 }
 0x306   :  { %6662 = vmatprep.subr.mxu1 %v5871_v11 }
 0x307   :  { %6663 = vmatpush3.msra.mxu1 %v5871_v11 }
 0x308   :  { %6664 = vmatprep.subr.mxu1 %v5870_v12 }
 0x309   :  { %6665 = vmatpush3.msra.mxu1 %v5870_v12 }
 0x30a   :  { %6666 = vmatprep.subr.mxu1 %v5869_v13 }
 0x30b   :  { %6667 = vmatpush3.msra.mxu1 %v5869_v13 }
 0x30c   :  { %6668 = vmatprep.subr.mxu1 %v5868_v14 }
 0x30d   :  { %6669 = vmatpush3.msra.mxu1 %v5868_v14  ;;  %v7379_v14 = vmov 0.0  }
 0x30e   :  { %6670 = vmatprep.subr.mxu1 %v5867_v15 }
 0x30f   :  { %6671 = vmatpush3.msra.mxu1 %v5867_v15  ;;  %v5898_v15 = vld [vmem:[%s8841_s17 + $0x58] sm:$0xff] }
 0x310   :  { %6675 = vmatprep.subr.msk.mxu1 %vm356_vm1, %v6655_v16  ;;  %6673 = vmatmul.mubr.msk.f32.vlgmr.msra.gmra.mxu1 %vm106_vm0, %v7584_v17  ;;  %v550_v17 = vld [vmem:[%s8839_s18 + $0x10] sm:$0xff] }
 0x311   :  { %6676 = vmatpush3.xpose.msk.msra.mxu1 %vm356_vm1, %v6655_v16  ;;  %v1211_v16 = vld [vmem:[%s8841_s17 + $0x18] sm:$0xff] }
 0x312   :  { %6677 = vmatprep.subr.msk.mxu1 %vm356_vm1, %v711_v18 }
 0x315   :  { %6678 = vmatpush3.xpose.msk.msra.mxu1 %vm356_vm1, %v711_v18  ;;  %v5897_v18 = vld [vmem:[%s8841_s17 + $0x50] sm:$0xff] }
 0x316   :  { %6700 = vmatprep.subr.mxu1 %v551_v19 }
 0x3b0   :  { %v6617_v20 = vpop.f32.mrf.mxu1 }
 0x3b2   :  { %v539_v21 = vpop.f32.mrf.mxu1 }
 0x3c0   :  { %v6636_v22 = vpop.f32.mrf.mxu1 }
 0x3c2   :  { %v627_v23 = vpop.f32.mrf.mxu1 }
 0x3c3   :  { %6679 = vmatprep.mubr.msk.f32.mxu1 %vm356_vm1, %v627_v23  ;;  %v1208_v23 = vld [vmem:[%s8841_s17] sm:$0xff] }
 0x3c4   :  { %6680 = vmatmul.mubr.msk.f32.vlgmr.msra.gmra.mxu1 %vm356_vm1, %v6636_v22  ;;  %v5895_v22 = vld [vmem:[%s8841_s17 + $0x40] sm:$0xff] }
 0x3c5   :  { %6701 = vmatpush3.msra.mxu1 %v551_v19  ;;  %6708 = vmatprep.mubr.msk.f32.mxu1 %vm356_vm1, %v539_v21  ;;  %v1210_v19 = vld [vmem:[%s8841_s17 + $0x10] sm:$0xff]  ;;  %v1209_v21 = vld [vmem:[%s8841_s17 + $0x8] sm:$0xff] }
 0x3c6   :  { %6702 = vmatprep.subr.mxu1 %v550_v17 }
 0x3c7   :  { %6703 = vmatpush3.msra.mxu1 %v550_v17  ;;  %v7812_v17 = vld [vmem:[%s8842_s22] sm:$0xff] }
 0x3c8   :  { %6704 = vmatprep.subr.mxu1 %v549_v24 }
 0x3c9   :  { %6705 = vmatpush3.msra.mxu1 %v549_v24 }
 0x3ca   :  { %6706 = vmatprep.subr.mxu1 %v548_v25 }
 0x3cb   :  { %6707 = vmatpush3.msra.mxu1 %v548_v25 }
 0x3cc   :  { %6709 = vmatmul.mubr.msk.f32.vlgmr.msra.gmra.mxu1 %vm356_vm1, %v6617_v20  ;;  %6722 = vmatprep.subr.mxu1 %v7379_v14  ;;  %v5896_v20 = vld [vmem:[%s8841_s17 + $0x48] sm:$0xff] }
 0x3cd   :  { %6730 = vmatprep.mubr.msk.f32.mxu1 %vm7380_vm3, %v7379_v14  ;;  %6723 = vmatpush3.msra.mxu1 %v5898_v15  ;;  %v5919_v15 = vld [vmem:[%s8841_s17 + $0x78] sm:$0xff] }
 0x3ce   :  { %6724 = vmatprep.subr.mxu1 %v7379_v14 }
 0x3cf   :  { %6725 = vmatpush3.msra.mxu1 %v5897_v18  ;;  %v5917_v18 = vld [vmem:[%s8841_s17 + $0x68] sm:$0xff] }
 0x3d0   :  { %v6674_v26 = vpop.f32.mrf.mxu1  ;;  %6726 = vmatprep.subr.mxu1 %v7379_v14 }
 0x3d1   :  { %6682 = vmatprep.subr.mxu0 %v6674_v26  ;;  %6727 = vmatpush3.msra.mxu1 %v5896_v20  ;;  %v5916_v20 = vld [vmem:[%s8841_s17 + $0x60] sm:$0xff] }
 0x3d2   :  { %v795_v27 = vpop.f32.mrf.mxu1  ;;  %6683 = vmatpush3.msra.mxu0 %v6674_v26  ;;  %6728 = vmatprep.subr.mxu1 %v7379_v14 }
 0x3d3   :  { %6684 = vmatprep.subr.mxu0 %v795_v27  ;;  %6729 = vmatpush3.msra.mxu1 %v5895_v22 }
 0x3d4   :  { %6685 = vmatpush3.msra.mxu0 %v795_v27  ;;  %6731 = vmatmul.mubr.msk.f32.vlgmr.msra.gmra.mxu1 %vm356_vm1, %v7812_v17 }
 0x3d5   :  { %6689 = vmatprep.subr.mxu0 %v5886_v44 }
 0x484   :  { %v6681_v28 = vpop.f32.mrf.mxu1 }
 0x485   :  { %v888_v29 = vadd.f32 %v6681_v28, %v7636_v32 }
 0x486   :  { %v882_v30 = vpop.f32.mrf.mxu1 }
 0x487   :  { %v883_v33 = vadd.f32 %v882_v30, %v7631_v31  ;;  %v894_v34 = vsel %vm444_vm2, %v888_v29, -inf }
 0x488   :  { %895 = vmax.xlane.f32.xlu1 %v894_v34 }
 0x489   :  { %v891_v35 = vsel %vm444_vm2, %v883_v33, -inf }
 0x48a   :  { %892 = vmax.xlane.f32.xlu0 %v891_v35 }
 0x48c   :  { %v6710_v56 = vpop.f32.mrf.mxu1 }
 0x48e   :  { %v1152_v60 = vpop.f32.mrf.mxu1 }
 0x511   :  { %v896_v36 = vpop.xlane.xlu1 %895 }
 0x512   :  { %v898_v37 = vsub.f32 %v888_v29, %v896_v36 }
 0x513   :  { %v893_v38 = vpop.xlane.xlu0 %892 }
 0x514   :  { %v901_v39 = vmul.f32 1.442695, %v898_v37  ;;  %v897_v40 = vsub.f32 %v883_v33, %v893_v38  ;;  %v5891_v33 = vld [vmem:[%s8843_s7] ss:$0 sm:$0xff] }
 0x515   :  { %v5892_v38 = vld [vmem:[%s8844_s2] ss:$0 sm:$0xff] }
 0x516   :  { %7279 = vpow2.f32 %v901_v39  ;;  %v899_v41 = vmul.f32 1.442695, %v897_v40 }
 0x518   :  { %7281 = vpow2.f32 %v899_v41 }
 0x523   :  { %v7280_v42 = vpop.eup %7279 }
 0x524   :  { %v906_v32 = vsel %vm444_vm2, %v7280_v42, 0.0 }
 0x525   :  { %v7282_v43 = vpop.eup %7281  ;;  %907 = vadd.xlane.f32.xlu1 %v906_v32  ;;  %v5902_v32 = vld [vmem:[%s8841_s17 + $0x90] sm:$0xff] }
 0x526   :  { %v903_v31 = vsel %vm444_vm2, %v7282_v43, 0.0 }
 0x527   :  { %904 = vadd.xlane.f32.xlu0 %v903_v31  ;;  %v5900_v31 = vld [vmem:[%s8841_s17 + $0x80] sm:$0xff] }
 0x5ae   :  { %v908_v45 = vpop.xlane.xlu1 %907 }
 0x5af   :  { %7283 = vrcp.f32 %v908_v45  ;;  %v5912_v45 = vld [vmem:[%s8841_s17 + $0x30] sm:$0xff] }
 0x5b0   :  { %v905_v46 = vpop.xlane.xlu0 %904 }
 0x5b1   :  { %7285 = vrcp.f32 %v905_v46  ;;  %v5911_v46 = vld [vmem:[%s8841_s17 + $0x28] sm:$0xff] }
 0x5bc   :  { %v7284_v47 = vpop.eup %7283 }
 0x5bd   :  { %v912_v50 = vmul.f32 %v7284_v47, %v7280_v42  ;;  %v5903_v42 = vld [vmem:[%s8841_s17 + $0x98] sm:$0xff]  ;;  %v5910_v47 = vld [vmem:[%s8841_s17 + $0x20] sm:$0xff] }
 0x5be   :  { %v7286_v48 = vpop.eup %7285 }
 0x5bf   :  { %v911_v49 = vmul.f32 %v7286_v48, %v7282_v43  ;;  %v5901_v43 = vld [vmem:[%s8841_s17 + $0x88] sm:$0xff]  ;;  %v1367_v48 = vpop.f32.mrf.mxu1 }
 0x5c0   :  { %6744 = vmatprep.subr.msk.mxu1 %vm356_vm1, %v1367_v48 }
 0x5c1   :  { %6686 = vmatprep.mubr.msk.f32.mxu0 %vm444_vm2, %v911_v49  ;;  %v6732_v49 = vpop.f32.mrf.mxu1  ;;  %6745 = vmatpush3.xpose.msk.msra.mxu1 %vm356_vm1, %v1367_v48 }
 0x5c2   :  { %6687 = vmatmul.mubr.msk.f32.vlgmr.msra.gmra.mxu0 %vm444_vm2, %v912_v50  ;;  %v1637_v49 = vld [vmem:[%s8846_s30 + $0x18] sm:$0xff] }
 0x5c3   :  { %6690 = vmatpush3.msra.mxu0 %v5886_v44  ;;  %v5913_v44 = vld [vmem:[%s8841_s17 + $0x38] sm:$0xff] }
 0x5c4   :  { %6691 = vmatprep.subr.mxu0 %v5885_v51 }
 0x5c5   :  { %6692 = vmatpush3.msra.mxu0 %v5885_v51 }
 0x5c6   :  { %6693 = vmatprep.subr.mxu0 %v5884_v52 }
 0x5c7   :  { %6694 = vmatpush3.msra.mxu0 %v5884_v52 }
 0x5c8   :  { %6695 = vmatprep.subr.mxu0 %v5883_v53 }
 0x5c9   :  { %6696 = vmatpush3.msra.mxu0 %v5883_v53 }
 0x5ca   :  { %6711 = vmatprep.subr.mxu0 %v1211_v16 }
 0x682   :  { %v6688_v54 = vpop.f32.mrf.mxu0 }
 0x684   :  { %v985_v55 = vpop.f32.mrf.mxu0 }
 0x685   :  { %6697 = vmatprep.mubr.msk.f32.mxu0 %vm356_vm1, %v985_v55 }
 0x686   :  { %6698 = vmatmul.mubr.msk.f32.vlgmr.msra.gmra.mxu0 %vm356_vm1, %v6688_v54  ;;  %v7878_v54 = vld [vmem:[%s8845_s19 + $0x8] sm:$0xff] }
 0x687   :  { %6712 = vmatpush3.msra.mxu0 %v1211_v16  ;;  %v5918_v16 = vld [vmem:[%s8841_s17 + $0x70] sm:$0xff] }
 0x688   :  { %6713 = vmatprep.subr.mxu0 %v1210_v19 }
 0x689   :  { %6714 = vmatpush3.msra.mxu0 %v1210_v19 }
 0x68a   :  { %6715 = vmatprep.subr.mxu0 %v1209_v21 }
 0x68b   :  { %6716 = vmatpush3.msra.mxu0 %v1209_v21 }
 0x68c   :  { %6717 = vmatprep.subr.mxu0 %v1208_v23 }
 0x68d   :  { %6718 = vmatpush3.msra.mxu0 %v1208_v23 }
 0x68e   :  { %6733 = vmatprep.subr.mxu0 %v7379_v14 }
 0x746   :  { %v6699_v57 = vpop.f32.mrf.mxu0 }
 0x747   :  { %v1158_v59 = vadd.f32 %v6710_v56, %v6699_v57  ;;  %v7883_v56 = vld [vmem:[%s8845_s19] sm:$0xff]  ;;  %s8848_s19 = sld [smem:[#allocation14_spill]] }
 0x748   :  { %v1071_v61 = vpop.f32.mrf.mxu0 }
 0x749   :  { %v1153_v63 = vadd.f32 %v1152_v60, %v1071_v61  ;;  %v1162_v0 = vadd.f32 %v1158_v59, %v92_v58 }
 0x74b   :  { %v1168_v1 = vsel %vm356_vm1, %v1162_v0, 0.0  ;;  %v1161_v2 = vadd.f32 %v1153_v63, %v91_v62 }
 0x74c   :  { %1169 = vadd.xlane.f32.xlu1 %v1168_v1 }
 0x74d   :  { %v1165_v3 = vsel %vm356_vm1, %v1161_v2, 0.0 }
 0x74e   :  { %1166 = vadd.xlane.f32.xlu0 %v1165_v3 }
 0x7d5   :  { %v1170_v4 = vpop.xlane.xlu1 %1169 }
 0x7d6   :  { %v1173_v5 = vmul.f32 0.03125, %v1170_v4 }
 0x7d7   :  { %v1167_v6 = vpop.xlane.xlu0 %1166 }
 0x7d8   :  { %v1175_v7 = vsub.f32 %v1162_v0, %v1173_v5  ;;  %v1172_v8 = vmul.f32 0.03125, %v1167_v6 }
 0x7da   :  { %v1174_v9 = vsub.f32 %v1161_v2, %v1172_v8  ;;  %v1177_v10 = vmul.f32 %v1175_v7, %v1175_v7 }
 0x7dc   :  { %v1181_v11 = vsel %vm356_vm1, %v1177_v10, 0.0  ;;  %v1176_v12 = vmul.f32 %v1174_v9, %v1174_v9 }
 0x7dd   :  { %1182 = vadd.xlane.f32.xlu1 %v1181_v11 }
 0x7de   :  { %v1178_v13 = vsel %vm356_vm1, %v1176_v12, 0.0 }
 0x7df   :  { %1179 = vadd.xlane.f32.xlu0 %v1178_v13 }
 0x866   :  { %v1183_v24 = vpop.xlane.xlu1 %1182 }
 0x867   :  { %v1185_v25 = vmul.f32 0.03125, %v1183_v24 }
 0x868   :  { %v1180_v26 = vpop.xlane.xlu0 %1179 }
 0x869   :  { %v1187_v27 = vadd.f32 1e-06, %v1185_v25  ;;  %v1184_v28 = vmul.f32 0.03125, %v1180_v26  ;;  %v5924_v26 = vld [vmem:[%s8841_s17 + $0xb8] sm:$0xff] }
 0x86b   :  { %7287 = vrsqrt.f32 %v1187_v27  ;;  %v1186_v29 = vadd.f32 1e-06, %v1184_v28  ;;  %v5923_v27 = vld [vmem:[%s8841_s17 + $0xb0] sm:$0xff]  ;;  %v5922_v28 = vld [vmem:[%s8841_s17 + $0xa8] sm:$0xff] }
 0x86d   :  { %7289 = vrsqrt.f32 %v1186_v29  ;;  %v5921_v29 = vld [vmem:[%s8841_s17 + $0xa0] sm:$0xff] }
 0x878   :  { %v7288_v30 = vpop.eup %7287 }
 0x879   :  { %v1191_v34 = vmul.f32 %v7288_v30, %v1175_v7 }
 0x87a   :  { %v7290_v35 = vpop.eup %7289 }
 0x87b   :  { %v1190_v36 = vmul.f32 %v7290_v35, %v1174_v9  ;;  %v1199_v37 = vmul.f32 %v5891_v33, %v1191_v34 }
 0x87d   :  { %v1198_v39 = vmul.f32 %v5891_v33, %v1190_v36  ;;  %v7826_v41 = vadd.f32 %v5892_v38, %v1199_v37 }
 0x87f   :  { %v7824_v40 = vadd.f32 %v5892_v38, %v1198_v39 }
 0x881   :  { %6719 = vmatprep.mubr.msk.f32.mxu0 %vm356_vm1, %v7824_v40 }
 0x882   :  { %6720 = vmatmul.mubr.msk.f32.vlgmr.msra.gmra.mxu0 %vm356_vm1, %v7826_v41 }
 0x883   :  { %6734 = vmatpush3.msra.mxu0 %v5903_v42  ;;  %6741 = vmatprep.mubr.msk.f32.mxu0 %vm7380_vm3, %v7379_v14 }
 0x884   :  { %6735 = vmatprep.subr.mxu0 %v7379_v14 }
 0x885   :  { %6736 = vmatpush3.msra.mxu0 %v5902_v32 }
 0x886   :  { %6737 = vmatprep.subr.mxu0 %v7379_v14 }
 0x887   :  { %6738 = vmatpush3.msra.mxu0 %v5901_v43 }
 0x888   :  { %6739 = vmatprep.subr.mxu0 %v7379_v14 }
 0x889   :  { %6740 = vmatpush3.msra.mxu0 %v5900_v31 }
 0x88a   :  { %6742 = vmatmul.mubr.msk.f32.vlgmr.msra.gmra.mxu0 %vm356_vm1, %v7812_v17  ;;  %6754 = vmatprep.subr.mxu0 %v5913_v44 }
 0x88b   :  { %6755 = vmatpush3.msra.mxu0 %v5913_v44  ;;  %6762 = vmatprep.mubr.msk.f32.mxu0 %vm356_vm1, %v7824_v40 }
 0x88c   :  { %6756 = vmatprep.subr.mxu0 %v5912_v45 }
 0x88d   :  { %6757 = vmatpush3.msra.mxu0 %v5912_v45 }
 0x88e   :  { %6758 = vmatprep.subr.mxu0 %v5911_v46 }
 0x88f   :  { %6759 = vmatpush3.msra.mxu0 %v5911_v46 }
 0x890   :  { %6760 = vmatprep.subr.mxu0 %v5910_v47 }
 0x891   :  { %6761 = vmatpush3.msra.mxu0 %v5910_v47 }
 0x892   :  { %6763 = vmatmul.mubr.msk.f32.vlgmr.msra.gmra.mxu0 %vm356_vm1, %v7826_v41  ;;  %6776 = vmatprep.subr.mxu0 %v7379_v14 }
 0x893   :  { %6784 = vmatprep.mubr.msk.f32.mxu0 %vm7380_vm3, %v7379_v14  ;;  %6777 = vmatpush3.msra.mxu0 %v5924_v26  ;;  %v2370_v26 = vld [vmem:[%s8848_s19 + $0x30] sm:$0xff] }
 0x894   :  { %6778 = vmatprep.subr.mxu0 %v7379_v14 }
 0x895   :  { %6779 = vmatpush3.msra.mxu0 %v5923_v27  ;;  %v2369_v27 = vld [vmem:[%s8848_s19 + $0x28] sm:$0xff] }
 0x896   :  { %6780 = vmatprep.subr.mxu0 %v7379_v14 }
 0x897   :  { %6781 = vmatpush3.msra.mxu0 %v5922_v28  ;;  %v2368_v28 = vld [vmem:[%s8848_s19 + $0x20] sm:$0xff] }
 0x898   :  { %6782 = vmatprep.subr.mxu0 %v7379_v14 }
 0x899   :  { %6783 = vmatpush3.msra.mxu0 %v5921_v29  ;;  %v2367_v29 = vld [vmem:[%s8848_s19 + $0x18] sm:$0xff] }
 0x89a   :  { %6785 = vmatmul.mubr.msk.f32.vlgmr.msra.gmra.mxu0 %vm356_vm1, %v7812_v17 }
 0x942   :  { %v6721_v50 = vpop.f32.mrf.mxu0 }
 0x944   :  { %v1284_v51 = vpop.f32.mrf.mxu0 }
 0x945   :  { %6746 = vmatprep.mubr.msk.f32.mxu1 %vm356_vm1, %v1284_v51  ;;  %v5933_v51 = vld [vmem:[%s8846_s30 + $0x30] sm:$0xff] }
 0x946   :  { %6747 = vmatmul.mubr.msk.f32.vlgmr.msra.gmra.mxu1 %vm356_vm1, %v6721_v50  ;;  %v5934_v50 = vld [vmem:[%s8846_s30 + $0x38] sm:$0xff] }
 0x947   :  { %6797 = vmatprep.subr.mxu0 %v5934_v50 }
 0x948   :  { %6798 = vmatpush3.msra.mxu0 %v5934_v50  ;;  %v5970_v50 = vld [vmem:[%s8836_s16 + $0x238] sm:$0xff] }
 0x949   :  { %6799 = vmatprep.subr.mxu0 %v5933_v51 }
 0x94a   :  { %v1442_v52 = vpop.f32.mrf.mxu0  ;;  %6800 = vmatpush3.msra.mxu0 %v5933_v51  ;;  %v5960_v51 = vld [vmem:[%s8836_s16 + $0x1b8] sm:$0xff] }
 0x94b   :  { %6749 = vmatprep.subr.mxu1 %v1442_v52 }
 0x94c   :  { %v6743_v53 = vpop.f32.mrf.mxu0  ;;  %6750 = vmatpush3.msra.mxu1 %v1442_v52 }
 0x94d   :  { %6765 = vmatprep.subr.mxu1 %v7379_v14 }
 0x952   :  { %v6764_v19 = vpop.f32.mrf.mxu0 }
 0x954   :  { %v1709_v21 = vpop.f32.mrf.mxu0 }
 0x95a   :  { %v1864_v47 = vpop.f32.mrf.mxu0 }
 0x95c   :  { %v6786_v48 = vpop.f32.mrf.mxu0 }
 0x95d   :  { %v2365_v48 = vld [vmem:[%s8848_s19 + $0x8] sm:$0xff] }
 0xa06   :  { %v6748_v55 = vpop.f32.mrf.mxu1 }
 0xa07   :  { %v1527_v57 = vadd.f32 %v6748_v55, %v7878_v54 }
 0xa08   :  { %v1521_v58 = vpop.f32.mrf.mxu1 }
 0xa09   :  { %v1522_v59 = vadd.f32 %v1521_v58, %v7883_v56  ;;  %v1534_v60 = vsel %vm1530_vm4, %v1527_v57, -inf  ;;  %v1636_v58 = vld [vmem:[%s8846_s30 + $0x10] sm:$0xff] }
 0xa0a   :  { %1535 = vmax.xlane.f32.xlu1 %v1534_v60  ;;  %v1634_v60 = vld [vmem:[%s8846_s30] sm:$0xff] }
 0xa0b   :  { %v1531_v61 = vsel %vm1530_vm4, %v1522_v59, -inf }
 0xa0c   :  { %1532 = vmax.xlane.f32.xlu0 %v1531_v61  ;;  %v5932_v61 = vld [vmem:[%s8846_s30 + $0x28] sm:$0xff] }
 0xa0d   :  { %6801 = vmatprep.subr.mxu0 %v5932_v61 }
 0xa0e   :  { %6802 = vmatpush3.msra.mxu0 %v5932_v61  ;;  %v5943_v61 = vld [vmem:[%s8794_s21] ss:$0 sm:$0xff] }
 0xa93   :  { %v1536_v62 = vpop.xlane.xlu1 %1535 }
 0xa94   :  { %v1538_v63 = vsub.f32 %v1527_v57, %v1536_v62  ;;  %v5931_v62 = vld [vmem:[%s8846_s30 + $0x20] sm:$0xff] }
 0xa95   :  { %v1533_v0 = vpop.xlane.xlu0 %1532  ;;  %6803 = vmatprep.subr.mxu0 %v5931_v62 }
 0xa96   :  { %v1541_v1 = vmul.f32 1.442695, %v1538_v63  ;;  %v1537_v2 = vsub.f32 %v1522_v59, %v1533_v0  ;;  %v1635_v59 = vld [vmem:[%s8846_s30 + $0x8] sm:$0xff]  ;;  %6804 = vmatpush3.msra.mxu0 %v5931_v62 }
 0xa98   :  { %7291 = vpow2.f32 %v1541_v1  ;;  %v1539_v3 = vmul.f32 1.442695, %v1537_v2 }
 0xa9a   :  { %7293 = vpow2.f32 %v1539_v3 }
 0xaa5   :  { %v7292_v4 = vpop.eup %7291 }
 0xaa6   :  { %v1546_v5 = vsel %vm1530_vm4, %v7292_v4, 0.0 }
 0xaa7   :  { %v7294_v6 = vpop.eup %7293  ;;  %1547 = vadd.xlane.f32.xlu1 %v1546_v5 }
 0xaa8   :  { %v1543_v7 = vsel %vm1530_vm4, %v7294_v6, 0.0 }
 0xaa9   :  { %1544 = vadd.xlane.f32.xlu0 %v1543_v7 }
 0xb30   :  { %v1548_v8 = vpop.xlane.xlu1 %1547 }
 0xb31   :  { %7295 = vrcp.f32 %v1548_v8 }
 0xb32   :  { %v1545_v9 = vpop.xlane.xlu0 %1544 }
 0xb33   :  { %7297 = vrcp.f32 %v1545_v9 }
 0xb3e   :  { %v7296_v10 = vpop.eup %7295 }
 0xb3f   :  { %v1552_v13 = vmul.f32 %v7296_v10, %v7292_v4 }
 0xb40   :  { %v7298_v11 = vpop.eup %7297 }
 0xb41   :  { %v1551_v12 = vmul.f32 %v7298_v11, %v7294_v6 }
 0xb43   :  { %6751 = vmatprep.mubr.msk.f32.mxu1 %vm1530_vm4, %v1551_v12 }
 0xb44   :  { %6752 = vmatmul.mubr.msk.f32.vlgmr.msra.gmra.mxu1 %vm1530_vm4, %v1552_v13 }
 0xb45   :  { %6766 = vmatpush3.msra.mxu1 %v5919_v15  ;;  %6773 = vmatprep.mubr.msk.f32.mxu1 %vm7380_vm3, %v7379_v14 }
 0xb46   :  { %6767 = vmatprep.subr.mxu1 %v7379_v14 }
 0xb47   :  { %6768 = vmatpush3.msra.mxu1 %v5918_v16 }
 0xb48   :  { %6769 = vmatprep.subr.mxu1 %v7379_v14 }
 0xb49   :  { %6770 = vmatpush3.msra.mxu1 %v5917_v18 }
 0xb4a   :  { %6771 = vmatprep.subr.mxu1 %v7379_v14 }
 0xb4b   :  { %6772 = vmatpush3.msra.mxu1 %v5916_v20 }
 0xb4c   :  { %6774 = vmatmul.mubr.msk.f32.vlgmr.msra.gmra.mxu1 %vm356_vm1, %v7812_v17 }
 0xb4d   :  { %6789 = vmatprep.mubr.msk.f32.mxu1 %vm356_vm1, %v1709_v21 }
 0xc04   :  { %v7913_v22 = vpop.f32.mrf.mxu1 }
 0xc06   :  { %v7915_v23 = vpop.f32.mrf.mxu1 }
 0xc0c   :  { %v1789_v24 = vpop.f32.mrf.mxu1 }
 0xc0d   :  { %6787 = vmatprep.subr.msk.mxu1 %vm356_vm1, %v1789_v24 }
 0xc0e   :  { %v6775_v25 = vpop.f32.mrf.mxu1  ;;  %6788 = vmatpush3.xpose.msk.msra.mxu1 %vm356_vm1, %v1789_v24  ;;  %v2270_v24 = vld [vmem:[%s8847_s14] sm:$0xff] }
 0xc0f   :  { %6792 = vmatprep.subr.mxu1 %v1864_v47  ;;  %v2371_v25 = vld [vmem:[%s8848_s19 + $0x38] sm:$0xff] }
 0xc11   :  { %6790 = vmatmul.mubr.msk.f32.vlgmr.msra.gmra.mxu1 %vm356_vm1, %v6764_v19 }
 0xc12   :  { %6793 = vmatpush3.msra.mxu1 %v1864_v47  ;;  %v2366_v47 = vld [vmem:[%s8848_s19 + $0x10] sm:$0xff] }
 0xc13   :  { %6808 = vmatprep.subr.mxu1 %v1637_v49 }
 0xcd1   :  { %v6791_v30 = vpop.f32.mrf.mxu1 }
 0xcd2   :  { %v1949_v33 = vadd.f32 %v6791_v30, %v7878_v54 }
 0xcd3   :  { %v1943_v34 = vpop.f32.mrf.mxu1 }
 0xcd4   :  { %v1944_v35 = vadd.f32 %v1943_v34, %v7883_v56  ;;  %v1955_v36 = vsel %vm1530_vm4, %v1949_v33, -inf }
 0xcd5   :  { %1956 = vmax.xlane.f32.xlu1 %v1955_v36 }
 0xcd6   :  { %v1952_v37 = vsel %vm1530_vm4, %v1944_v35, -inf }
 0xcd7   :  { %1953 = vmax.xlane.f32.xlu0 %v1952_v37 }
 0xd5e   :  { %v1957_v38 = vpop.xlane.xlu1 %1956 }
 0xd5f   :  { %v1959_v39 = vsub.f32 %v1949_v33, %v1957_v38 }
 0xd60   :  { %v1954_v42 = vpop.xlane.xlu0 %1953 }
 0xd61   :  { %v1962_v32 = vmul.f32 1.442695, %v1959_v39  ;;  %v1958_v43 = vsub.f32 %v1944_v35, %v1954_v42  ;;  %v5941_v39 = vld [vmem:[%s8843_s7 + $0x1] ss:$0 sm:$0xff] }
 0xd63   :  { %7299 = vpow2.f32 %v1962_v32  ;;  %v1960_v31 = vmul.f32 1.442695, %v1958_v43 }
 0xd65   :  { %7301 = vpow2.f32 %v1960_v31 }
 0xd70   :  { %v7300_v17 = vpop.eup %7299 }
 0xd71   :  { %v1967_v44 = vsel %vm1530_vm4, %v7300_v17, 0.0 }
 0xd72   :  { %v7302_v45 = vpop.eup %7301  ;;  %1968 = vadd.xlane.f32.xlu1 %v1967_v44 }
 0xd73   :  { %v1964_v46 = vsel %vm1530_vm4, %v7302_v45, 0.0 }
 0xd74   :  { %1965 = vadd.xlane.f32.xlu0 %v1964_v46 }
 0xdfb   :  { %v1969_v52 = vpop.xlane.xlu1 %1968 }
 0xdfc   :  { %7303 = vrcp.f32 %v1969_v52  ;;  %v5959_v52 = vld [vmem:[%s8836_s16 + $0x1b0] sm:$0xff] }
 0xdfd   :  { %v1966_v53 = vpop.xlane.xlu0 %1965 }
 0xdfe   :  { %7305 = vrcp.f32 %v1966_v53  ;;  %v5958_v53 = vld [vmem:[%s8836_s16 + $0x1a8] sm:$0xff] }
 0xe09   :  { %v7304_v54 = vpop.eup %7303 }
 0xe0a   :  { %v1973_v57 = vmul.f32 %v7304_v54, %v7300_v17  ;;  %v5942_v17 = vld [vmem:[%s8844_s2 + $0x1] ss:$0 sm:$0xff] }
 0xe0b   :  { %v7306_v55 = vpop.eup %7305  ;;  %v5957_v54 = vld [vmem:[%s8836_s16 + $0x1a0] sm:$0xff] }
 0xe0c   :  { %v1972_v56 = vmul.f32 %v7306_v55, %v7302_v45  ;;  %v5956_v55 = vld [vmem:[%s8836_s16 + $0x198] sm:$0xff] }
 0xe0e   :  { %6794 = vmatprep.mubr.msk.f32.mxu1 %vm1530_vm4, %v1972_v56  ;;  %v5955_v56 = vld [vmem:[%s8836_s16 + $0x190] sm:$0xff] }
 0xe0f   :  { %6795 = vmatmul.mubr.msk.f32.vlgmr.msra.gmra.mxu1 %vm1530_vm4, %v1973_v57  ;;  %v5954_v57 = vld [vmem:[%s8836_s16 + $0x188] sm:$0xff] }
 0xe10   :  { %6809 = vmatpush3.msra.mxu1 %v1637_v49  ;;  %6816 = vmatprep.mubr.msk.f32.mxu1 %vm356_vm1, %v7915_v23  ;;  %v2271_v23 = vld [vmem:[%s8847_s14 + $0x8] sm:$0xff]  ;;  %v2364_v49 = vld [vmem:[%s8848_s19] sm:$0xff] }
 0xe11   :  { %6810 = vmatprep.subr.mxu1 %v1636_v58 }
 0xe12   :  { %6811 = vmatpush3.msra.mxu1 %v1636_v58  ;;  %v8058_v58 = vld [vmem:[%s8793_s3] sm:$0xff] }
 0xe13   :  { %6812 = vmatprep.subr.mxu1 %v1635_v59 }
 0xe14   :  { %6813 = vmatpush3.msra.mxu1 %v1635_v59  ;;  %v5953_v59 = vld [vmem:[%s8836_s16 + $0x180] sm:$0xff] }
 0xe15   :  { %6814 = vmatprep.subr.mxu1 %v1634_v60 }
 0xe16   :  { %6815 = vmatpush3.msra.mxu1 %v1634_v60  ;;  %v8068_v60 = vld [vmem:[%s8793_s3 + $0x8] sm:$0xff] }
 0xe17   :  { %6817 = vmatmul.mubr.msk.f32.vlgmr.msra.gmra.mxu1 %vm356_vm1, %v7913_v22  ;;  %v2272_v22 = vld [vmem:[%s8847_s14 + $0x10] sm:$0xff]  ;;  %6830 = vmatprep.subr.mxu1 %v2371_v25 }
 0xe18   :  { %6831 = vmatpush3.msra.mxu1 %v2371_v25  ;;  %v8145_v25 = vld [vmem:[%s8795_s8 + $0x8] sm:$0xff] }
 0xe19   :  { %6832 = vmatprep.subr.mxu1 %v2370_v26 }
 0xe1a   :  { %6833 = vmatpush3.msra.mxu1 %v2370_v26 }
 0xe1b   :  { %6834 = vmatprep.subr.mxu1 %v2369_v27 }
 0xe1c   :  { %6835 = vmatpush3.msra.mxu1 %v2369_v27  ;;  %v8150_v27 = vld [vmem:[%s8795_s8] sm:$0xff] }
 0xe1d   :  { %6836 = vmatprep.subr.mxu1 %v2368_v28 }
 0xe1e   :  { %6837 = vmatpush3.msra.mxu1 %v2368_v28 }
 0xe1f   :  { %6838 = vmatprep.subr.mxu1 %v2367_v29 }
 0xe20   :  { %6839 = vmatpush3.msra.mxu1 %v2367_v29 }
 0xe21   :  { %6840 = vmatprep.subr.mxu1 %v2366_v47 }
 0xe22   :  { %6841 = vmatpush3.msra.mxu1 %v2366_v47 }
 0xe23   :  { %6842 = vmatprep.subr.mxu1 %v2365_v48 }
 0xe24   :  { %6843 = vmatpush3.msra.mxu1 %v2365_v48  ;;  %v8167_v48 = vld [vmem:[%s8836_s16 + $0x278] sm:$0xff] }
 0xe25   :  { %6844 = vmatprep.subr.mxu1 %v2364_v49 }
 0xe26   :  { %6845 = vmatpush3.msra.mxu1 %v2364_v49  ;;  %v6000_v49 = vld [vmem:[%s8836_s16 + $0x1f8] sm:$0xff] }
 0xe27   :  { %6868 = vmatprep.subr.mxu1 %v5970_v50 }
 0xecf   :  { %v6796_v63 = vpop.f32.mrf.mxu1 }
 0xed1   :  { %v2046_v0 = vpop.f32.mrf.mxu1 }
 0xed2   :  { %6805 = vmatprep.mubr.msk.f32.mxu0 %vm356_vm1, %v2046_v0 }
 0xed3   :  { %6806 = vmatmul.mubr.msk.f32.vlgmr.msra.gmra.mxu0 %vm356_vm1, %v6796_v63 }
 0xed7   :  { %v6818_v1 = vpop.f32.mrf.mxu1 }
 0xed9   :  { %v2213_v4 = vpop.f32.mrf.mxu1 }
 0xf93   :  { %v6807_v2 = vpop.f32.mrf.mxu0 }
 0xf94   :  { %v2219_v3 = vadd.f32 %v6818_v1, %v6807_v2 }
 0xf95   :  { %v2132_v5 = vpop.f32.mrf.mxu0 }
 0xf96   :  { %v2214_v6 = vadd.f32 %v2213_v4, %v2132_v5  ;;  %v2223_v7 = vadd.f32 %v2219_v3, %v7826_v41  ;;  %v5969_v4 = vld [vmem:[%s8836_s16 + $0x230] sm:$0xff]  ;;  %v5968_v5 = vld [vmem:[%s8836_s16 + $0x228] sm:$0xff] }
 0xf98   :  { %v2231_v8 = vsel %vm356_vm1, %v2223_v7, 0.0  ;;  %v2222_v9 = vadd.f32 %v2214_v6, %v7824_v40  ;;  %v2273_v40 = vld [vmem:[%s8847_s14 + $0x18] sm:$0xff]  ;;  %v5967_v6 = vld [vmem:[%s8836_s16 + $0x220] sm:$0xff] }
 0xf99   :  { %2232 = vadd.xlane.f32.xlu1 %v2231_v8  ;;  %6819 = vmatprep.subr.mxu0 %v2273_v40  ;;  %v5965_v8 = vld [vmem:[%s8836_s16 + $0x210] sm:$0xff] }
 0xf9a   :  { %v2228_v10 = vsel %vm356_vm1, %v2222_v9, 0.0  ;;  %6820 = vmatpush3.msra.mxu0 %v2273_v40  ;;  %v5976_v40 = vld [vmem:[%s8836_s16 + $0x298] sm:$0xff] }
 0xf9b   :  { %2229 = vadd.xlane.f32.xlu0 %v2228_v10  ;;  %6821 = vmatprep.subr.mxu0 %v2272_v22  ;;  %v5963_v10 = vld [vmem:[%s8836_s16 + $0x200] sm:$0xff] }
 0xf9c   :  { %6822 = vmatpush3.msra.mxu0 %v2272_v22  ;;  %v5975_v22 = vld [vmem:[%s8836_s16 + $0x290] sm:$0xff] }
 0xf9d   :  { %6823 = vmatprep.subr.mxu0 %v2271_v23 }
 0xf9e   :  { %6824 = vmatpush3.msra.mxu0 %v2271_v23  ;;  %v5974_v23 = vld [vmem:[%s8836_s16 + $0x288] sm:$0xff] }
 0xf9f   :  { %6825 = vmatprep.subr.mxu0 %v2270_v24 }
 0xfa0   :  { %6826 = vmatpush3.msra.mxu0 %v2270_v24  ;;  %v5973_v24 = vld [vmem:[%s8836_s16 + $0x280] sm:$0xff] }
 0xfa1   :  { %6849 = vmatprep.subr.mxu0 %v5960_v51 }
0x1022   :  { %v2233_v11 = vpop.xlane.xlu1 %2232 }
0x1023   :  { %v2235_v12 = vmul.f32 0.03125, %v2233_v11 }
0x1024   :  { %v2230_v13 = vpop.xlane.xlu0 %2229 }
0x1025   :  { %v2237_v15 = vsub.f32 %v2223_v7, %v2235_v12  ;;  %v2234_v16 = vmul.f32 0.03125, %v2230_v13  ;;  %v5966_v7 = vld [vmem:[%s8836_s16 + $0x218] sm:$0xff] }
0x1027   :  { %v2236_v18 = vsub.f32 %v2222_v9, %v2234_v16  ;;  %v2239_v19 = vmul.f32 %v2237_v15, %v2237_v15  ;;  %v5964_v9 = vld [vmem:[%s8836_s16 + $0x208] sm:$0xff] }
0x1029   :  { %v2243_v20 = vsel %vm356_vm1, %v2239_v19, 0.0  ;;  %v2238_v21 = vmul.f32 %v2236_v18, %v2236_v18  ;;  %v5980_v19 = vld [vmem:[%s8836_s16 + $0x2b8] sm:$0xff] }
0x102a   :  { %2244 = vadd.xlane.f32.xlu1 %v2243_v20  ;;  %v5979_v20 = vld [vmem:[%s8836_s16 + $0x2b0] sm:$0xff] }
0x102b   :  { %v2240_v41 = vsel %vm356_vm1, %v2238_v21, 0.0  ;;  %v5978_v21 = vld [vmem:[%s8836_s16 + $0x2a8] sm:$0xff] }
0x102c   :  { %2241 = vadd.xlane.f32.xlu0 %v2240_v41  ;;  %v5977_v41 = vld [vmem:[%s8836_s16 + $0x2a0] sm:$0xff] }
0x10b3   :  { %v2245_v30 = vpop.xlane.xlu1 %2244 }
0x10b4   :  { %v2247_v33 = vmul.f32 0.03125, %v2245_v30 }
0x10b5   :  { %v2242_v34 = vpop.xlane.xlu0 %2241 }
0x10b6   :  { %v2249_v35 = vadd.f32 1e-06, %v2247_v33  ;;  %v2246_v36 = vmul.f32 0.03125, %v2242_v34 }
0x10b8   :  { %7307 = vrsqrt.f32 %v2249_v35  ;;  %v2248_v37 = vadd.f32 1e-06, %v2246_v36 }
0x10ba   :  { %7309 = vrsqrt.f32 %v2248_v37 }
0x10c5   :  { %v7308_v38 = vpop.eup %7307 }
0x10c6   :  { %v2253_v42 = vmul.f32 %v7308_v38, %v2237_v15 }
0x10c7   :  { %v7310_v32 = vpop.eup %7309 }
0x10c8   :  { %v2252_v43 = vmul.f32 %v7310_v32, %v2236_v18  ;;  %v2261_v31 = vmul.f32 %v5941_v39, %v2253_v42 }
0x10ca   :  { %v2260_v44 = vmul.f32 %v5941_v39, %v2252_v43  ;;  %v8016_v46 = vadd.f32 %v5942_v17, %v2261_v31 }
0x10cc   :  { %v8014_v45 = vadd.f32 %v5942_v17, %v2260_v44 }
0x10ce   :  { %6827 = vmatprep.mubr.msk.f32.mxu0 %vm356_vm1, %v8014_v45 }
0x10cf   :  { %6828 = vmatmul.mubr.msk.f32.vlgmr.msra.gmra.mxu0 %vm356_vm1, %v8016_v46 }
0x10d0   :  { %6850 = vmatpush3.msra.mxu0 %v5960_v51  ;;  %6865 = vmatprep.mubr.msk.f32.mxu0 %vm106_vm0, %v8058_v58  ;;  %v5998_v51 = vld [vmem:[%s8836_s16 + $0x1e8] sm:$0xff] }
0x10d1   :  { %6851 = vmatprep.subr.mxu0 %v5959_v52 }
0x10d2   :  { %6852 = vmatpush3.msra.mxu0 %v5959_v52  ;;  %v5997_v52 = vld [vmem:[%s8836_s16 + $0x1e0] sm:$0xff] }
0x10d3   :  { %6853 = vmatprep.subr.mxu0 %v5958_v53 }
0x10d4   :  { %6854 = vmatpush3.msra.mxu0 %v5958_v53  ;;  %v5996_v53 = vld [vmem:[%s8836_s16 + $0x1d8] sm:$0xff] }
0x10d5   :  { %6855 = vmatprep.subr.mxu0 %v5957_v54 }
0x10d6   :  { %6856 = vmatpush3.msra.mxu0 %v5957_v54  ;;  %v5995_v54 = vld [vmem:[%s8836_s16 + $0x1d0] sm:$0xff] }
0x10d7   :  { %6857 = vmatprep.subr.mxu0 %v5956_v55 }
0x10d8   :  { %6858 = vmatpush3.msra.mxu0 %v5956_v55  ;;  %v5994_v55 = vld [vmem:[%s8836_s16 + $0x1c8] sm:$0xff] }
0x10d9   :  { %6859 = vmatprep.subr.mxu0 %v5955_v56 }
0x10da   :  { %6860 = vmatpush3.msra.mxu0 %v5955_v56  ;;  %v5993_v56 = vld [vmem:[%s8836_s16 + $0x1c0] sm:$0xff] }
0x10db   :  { %6861 = vmatprep.subr.mxu0 %v5954_v57 }
0x10dc   :  { %6862 = vmatpush3.msra.mxu0 %v5954_v57  ;;  %v6020_v57 = vld [vmem:[%s8836_s16 + $0x2f8] sm:$0xff] }
0x10dd   :  { %6863 = vmatprep.subr.mxu0 %v5953_v59 }
0x10de   :  { %6864 = vmatpush3.msra.mxu0 %v5953_v59  ;;  %v6019_v59 = vld [vmem:[%s8836_s16 + $0x2f0] sm:$0xff] }
0x10df   :  { %6866 = vmatmul.mubr.msk.f32.vlgmr.msra.gmra.mxu0 %vm106_vm0, %v8068_v60  ;;  %6887 = vmatprep.subr.mxu0 %v5980_v19 }
0x10e0   :  { %6903 = vmatprep.mubr.msk.f32.mxu0 %vm106_vm0, %v8058_v58  ;;  %6888 = vmatpush3.msra.mxu0 %v5980_v19  ;;  %v6005_v19 = vld [vmem:[%s8836_s16 + $0x250] sm:$0xff] }
0x10e1   :  { %6889 = vmatprep.subr.mxu0 %v5979_v20 }
0x10e2   :  { %6890 = vmatpush3.msra.mxu0 %v5979_v20  ;;  %v6003_v20 = vld [vmem:[%s8836_s16 + $0x240] sm:$0xff] }
0x10e3   :  { %6891 = vmatprep.subr.mxu0 %v5978_v21 }
0x10e4   :  { %6892 = vmatpush3.msra.mxu0 %v5978_v21  ;;  %v5990_v21 = vld [vmem:[%s8839_s18 + $0x48] sm:$0xff] }
0x10e5   :  { %6893 = vmatprep.subr.mxu0 %v5977_v41 }
0x10e6   :  { %6894 = vmatpush3.msra.mxu0 %v5977_v41  ;;  %v5989_v41 = vld [vmem:[%s8839_s18 + $0x40] sm:$0xff] }
0x10e7   :  { %6895 = vmatprep.subr.mxu0 %v5976_v40 }
0x10e8   :  { %6896 = vmatpush3.msra.mxu0 %v5976_v40 }
0x10e9   :  { %6897 = vmatprep.subr.mxu0 %v5975_v22 }
0x10ea   :  { %6898 = vmatpush3.msra.mxu0 %v5975_v22 }
0x10eb   :  { %6899 = vmatprep.subr.mxu0 %v5974_v23 }
0x10ec   :  { %6900 = vmatpush3.msra.mxu0 %v5974_v23 }
0x10ed   :  { %6901 = vmatprep.subr.mxu0 %v5973_v24 }
0x10ee   :  { %6902 = vmatpush3.msra.mxu0 %v5973_v24 }
0x10ef   :  { %6904 = vmatmul.mubr.msk.f32.vlgmr.msra.gmra.mxu0 %vm106_vm0, %v8068_v60 }
0x118f   :  { %v6829_v62 = vpop.f32.mrf.mxu0 }
0x1190   :  { %v2359_v63 = vadd.f32 %v6829_v62, %v5943_v61  ;;  %v6017_v62 = vld [vmem:[%s8836_s16 + $0x2e0] sm:$0xff] }
0x1191   :  { %v2353_v0 = vpop.f32.mrf.mxu0 }
0x1192   :  { %v2354_v1 = vadd.f32 %v5943_v61, %v2353_v0  ;;  %v2363_v3 = vmax.f32 %v2359_v63, 0.0  ;;  %v6018_v61 = vld [vmem:[%s8836_s16 + $0x2e8] sm:$0xff]  ;;  %v6016_v63 = vld [vmem:[%s8836_s16 + $0x2d8] sm:$0xff]  ;;  %v6015_v0 = vld [vmem:[%s8836_s16 + $0x2d0] sm:$0xff] }
0x1194   :  { %v2362_v2 = vmax.f32 %v2354_v1, 0.0  ;;  %v6014_v1 = vld [vmem:[%s8836_s16 + $0x2c8] sm:$0xff] }
0x1196   :  { %6846 = vmatprep.mubr.msk.f32.mxu1 %vm106_vm0, %v2362_v2  ;;  %v6013_v2 = vld [vmem:[%s8836_s16 + $0x2c0] sm:$0xff] }
0x1197   :  { %6847 = vmatmul.mubr.msk.f32.vlgmr.msra.gmra.mxu1 %vm106_vm0, %v2363_v3  ;;  %v5992_v3 = vld [vmem:[%s8839_s18 + $0x58] sm:$0xff] }
0x1198   :  { %6869 = vmatpush3.msra.mxu1 %v5970_v50  ;;  %6884 = vmatprep.mubr.msk.f32.mxu1 %vm106_vm0, %v8058_v58  ;;  %v5999_v50 = vld [vmem:[%s8836_s16 + $0x1f0] sm:$0xff] }
0x1199   :  { %6870 = vmatprep.subr.mxu1 %v5969_v4 }
0x119a   :  { %6871 = vmatpush3.msra.mxu1 %v5969_v4  ;;  %v5991_v4 = vld [vmem:[%s8839_s18 + $0x50] sm:$0xff] }
0x119b   :  { %6872 = vmatprep.subr.mxu1 %v5968_v5 }
0x119c   :  { %6873 = vmatpush3.msra.mxu1 %v5968_v5 }
0x119d   :  { %6874 = vmatprep.subr.mxu1 %v5967_v6 }
0x119e   :  { %6875 = vmatpush3.msra.mxu1 %v5967_v6 }
0x119f   :  { %6876 = vmatprep.subr.mxu1 %v5966_v7  ;;  %v6867_v11 = vpop.f32.mrf.mxu0 }
0x11a0   :  { %6877 = vmatpush3.msra.mxu1 %v5966_v7 }
0x11a1   :  { %6878 = vmatprep.subr.mxu1 %v5965_v8  ;;  %v2598_v12 = vpop.f32.mrf.mxu0 }
0x11a2   :  { %6879 = vmatpush3.msra.mxu1 %v5965_v8 }
0x11a3   :  { %6880 = vmatprep.subr.mxu1 %v5964_v9 }
0x11a4   :  { %6881 = vmatpush3.msra.mxu1 %v5964_v9 }
0x11a5   :  { %6882 = vmatprep.subr.mxu1 %v5963_v10 }
0x11a6   :  { %6883 = vmatpush3.msra.mxu1 %v5963_v10 }
0x11a7   :  { %6885 = vmatmul.mubr.msk.f32.vlgmr.msra.gmra.mxu1 %vm106_vm0, %v8068_v60 }
0x11a8   :  { %6910 = vmatprep.mubr.msk.f32.mxu1 %vm356_vm1, %v2598_v12  ;;  %v6008_v12 = vld [vmem:[%s8836_s16 + $0x268] sm:$0xff] }
0x11af   :  { %v6905_v44 = vpop.f32.mrf.mxu0 }
0x11b0   :  { %6913 = vmatprep.subr.mxu0 %v6905_v44 }
0x11b1   :  { %v2766_v47 = vpop.f32.mrf.mxu0  ;;  %6914 = vmatpush3.msra.mxu0 %v6905_v44 }
0x11b2   :  { %6915 = vmatprep.subr.mxu0 %v2766_v47 }
0x11b3   :  { %6916 = vmatpush3.msra.mxu0 %v2766_v47  ;;  %v6032_v47 = vld [vmem:[%s8839_s18 + $0x78] sm:$0xff] }
0x11b4   :  { %6939 = vmatprep.subr.mxu0 %v8167_v48 }
0x1257   :  { %v8105_v13 = vpop.f32.mrf.mxu1 }
0x1259   :  { %v8107_v15 = vpop.f32.mrf.mxu1 }
0x1267   :  { %v6886_v16 = vpop.f32.mrf.mxu1 }
0x1268   :  { %6906 = vmatprep.subr.msk.mxu1 %vm356_vm1, %v6886_v16 }
0x1269   :  { %v2682_v18 = vpop.f32.mrf.mxu1  ;;  %6907 = vmatpush3.xpose.msk.msra.mxu1 %vm356_vm1, %v6886_v16  ;;  %v6007_v16 = vld [vmem:[%s8836_s16 + $0x260] sm:$0xff] }
0x126a   :  { %6908 = vmatprep.subr.msk.mxu1 %vm356_vm1, %v2682_v18 }
0x126d   :  { %6909 = vmatpush3.xpose.msk.msra.mxu1 %vm356_vm1, %v2682_v18  ;;  %v6006_v18 = vld [vmem:[%s8836_s16 + $0x258] sm:$0xff] }
0x126e   :  { %6920 = vmatprep.subr.mxu1 %v6000_v49 }
0x1270   :  { %6911 = vmatmul.mubr.msk.f32.vlgmr.msra.gmra.mxu1 %vm356_vm1, %v6867_v11  ;;  %v6009_v11 = vld [vmem:[%s8836_s16 + $0x270] sm:$0xff] }
0x1271   :  { %6936 = vmatprep.mubr.msk.f32.mxu1 %vm106_vm0, %v8058_v58  ;;  %6921 = vmatpush3.msra.mxu1 %v6000_v49 }
0x1272   :  { %6922 = vmatprep.subr.mxu1 %v5999_v50 }
0x1273   :  { %6923 = vmatpush3.msra.mxu1 %v5999_v50 }
0x1274   :  { %6924 = vmatprep.subr.mxu1 %v5998_v51 }
0x1275   :  { %6925 = vmatpush3.msra.mxu1 %v5998_v51 }
0x1276   :  { %6926 = vmatprep.subr.mxu1 %v5997_v52 }
0x1277   :  { %6927 = vmatpush3.msra.mxu1 %v5997_v52 }
0x1278   :  { %6928 = vmatprep.subr.mxu1 %v5996_v53 }
0x1279   :  { %6929 = vmatpush3.msra.mxu1 %v5996_v53 }
0x127a   :  { %6930 = vmatprep.subr.mxu1 %v5995_v54 }
0x127b   :  { %6931 = vmatpush3.msra.mxu1 %v5995_v54  ;;  %v6031_v54 = vld [vmem:[%s8839_s18 + $0x70] sm:$0xff] }
0x127c   :  { %6932 = vmatprep.subr.mxu1 %v5994_v55 }
0x127d   :  { %6933 = vmatpush3.msra.mxu1 %v5994_v55  ;;  %v6030_v55 = vld [vmem:[%s8839_s18 + $0x68] sm:$0xff] }
0x127e   :  { %6934 = vmatprep.subr.mxu1 %v5993_v56 }
0x127f   :  { %6935 = vmatpush3.msra.mxu1 %v5993_v56  ;;  %v6029_v56 = vld [vmem:[%s8839_s18 + $0x60] sm:$0xff] }
0x1280   :  { %6937 = vmatmul.mubr.msk.f32.vlgmr.msra.gmra.mxu1 %vm106_vm0, %v8068_v60  ;;  %6958 = vmatprep.subr.mxu1 %v6020_v57 }
0x1281   :  { %6959 = vmatpush3.msra.mxu1 %v6020_v57  ;;  %6974 = vmatprep.mubr.msk.f32.mxu1 %vm106_vm0, %v8058_v58 }
0x1282   :  { %6960 = vmatprep.subr.mxu1 %v6019_v59 }
0x1283   :  { %6961 = vmatpush3.msra.mxu1 %v6019_v59 }
0x1284   :  { %6962 = vmatprep.subr.mxu1 %v6018_v61 }
0x1285   :  { %6963 = vmatpush3.msra.mxu1 %v6018_v61 }
0x1286   :  { %6964 = vmatprep.subr.mxu1 %v6017_v62 }
0x1287   :  { %6965 = vmatpush3.msra.mxu1 %v6017_v62 }
0x1288   :  { %6966 = vmatprep.subr.mxu1 %v6016_v63 }
0x1289   :  { %6967 = vmatpush3.msra.mxu1 %v6016_v63  ;;  %v2511_v63 = vld [vmem:[%s8796_s4 + $0x8] sm:$0xff] }
0x128a   :  { %6968 = vmatprep.subr.mxu1 %v6015_v0 }
0x128b   :  { %6969 = vmatpush3.msra.mxu1 %v6015_v0 }
0x128c   :  { %6970 = vmatprep.subr.mxu1 %v6014_v1 }
0x128d   :  { %6971 = vmatpush3.msra.mxu1 %v6014_v1 }
0x128e   :  { %6972 = vmatprep.subr.mxu1 %v6013_v2 }
0x128f   :  { %6973 = vmatpush3.msra.mxu1 %v6013_v2 }
0x1290   :  { %7002 = vmatprep.subr.mxu1 %v5992_v3  ;;  %6975 = vmatmul.mubr.msk.f32.vlgmr.msra.gmra.mxu1 %vm106_vm0, %v8068_v60 }
0x1291   :  { %7003 = vmatpush3.msra.mxu1 %v5992_v3  ;;  %v2510_v3 = vld [vmem:[%s8796_s4] sm:$0xff] }
0x1292   :  { %7004 = vmatprep.subr.mxu1 %v5991_v4 }
0x1293   :  { %7005 = vmatpush3.msra.mxu1 %v5991_v4 }
0x1294   :  { %7006 = vmatprep.subr.mxu1 %v5990_v21 }
0x1295   :  { %7007 = vmatpush3.msra.mxu1 %v5990_v21 }
0x1296   :  { %7008 = vmatprep.subr.mxu1 %v5989_v41 }
0x1297   :  { %7009 = vmatpush3.msra.mxu1 %v5989_v41  ;;  %v6050_v41 = vld [vmem:[%s8841_s17 + $0x118] sm:$0xff] }
0x1298   :  { %7024 = vmatprep.subr.mxu1 %v7379_v14 }
0x1330   :  { %v6912_v26 = vpop.f32.mrf.mxu1 }
0x1331   :  { %v2859_v28 = vadd.f32 %v6912_v26, %v8145_v25 }
0x1332   :  { %v2853_v29 = vpop.f32.mrf.mxu1 }
0x1333   :  { %v2854_v30 = vadd.f32 %v2853_v29, %v8150_v27  ;;  %v2865_v33 = vsel %vm444_vm2, %v2859_v28, -inf }
0x1334   :  { %2866 = vmax.xlane.f32.xlu1 %v2865_v33 }
0x1335   :  { %v2862_v34 = vsel %vm444_vm2, %v2854_v30, -inf }
0x1336   :  { %2863 = vmax.xlane.f32.xlu0 %v2862_v34 }
0x1340   :  { %v6938_v40 = vpop.f32.mrf.mxu1 }
0x1342   :  { %v3045_v22 = vpop.f32.mrf.mxu1 }
0x13bd   :  { %v2867_v35 = vpop.xlane.xlu1 %2866 }
0x13be   :  { %v2869_v36 = vsub.f32 %v2859_v28, %v2867_v35  ;;  %v6976_v28 = vpop.f32.mrf.mxu1 }
0x13bf   :  { %v2864_v37 = vpop.xlane.xlu0 %2863 }
0x13c0   :  { %v2872_v38 = vmul.f32 1.442695, %v2869_v36  ;;  %v2868_v39 = vsub.f32 %v2854_v30, %v2864_v37  ;;  %v3213_v29 = vpop.f32.mrf.mxu1 }
0x13c2   :  { %7311 = vpow2.f32 %v2872_v38  ;;  %v2870_v42 = vmul.f32 1.442695, %v2868_v39 }
0x13c4   :  { %7313 = vpow2.f32 %v2870_v42 }
0x13cf   :  { %v8156_v32 = vpop.eup %7311 }
0x13d0   :  { %v2877_v43 = vsel %vm444_vm2, %v8156_v32, 0.0 }
0x13d1   :  { %v8160_v31 = vpop.eup %7313  ;;  %2878 = vadd.xlane.f32.xlu1 %v2877_v43 }
0x13d2   :  { %v2874_v17 = vsel %vm444_vm2, %v8160_v31, 0.0 }
0x13d3   :  { %2875 = vadd.xlane.f32.xlu0 %v2874_v17 }
0x145a   :  { %v2879_v5 = vpop.xlane.xlu1 %2878 }
0x145b   :  { %7315 = vrcp.f32 %v2879_v5 }
0x145c   :  { %v2876_v6 = vpop.xlane.xlu0 %2875 }
0x145d   :  { %7317 = vrcp.f32 %v2876_v6 }
0x1468   :  { %v7316_v7 = vpop.eup %7315 }
0x1469   :  { %v2883_v10 = vmul.f32 %v7316_v7, %v8156_v32 }
0x146a   :  { %v7318_v8 = vpop.eup %7317 }
0x146b   :  { %v2882_v9 = vmul.f32 %v7318_v8, %v8160_v31 }
0x146d   :  { %6917 = vmatprep.mubr.msk.f32.mxu0 %vm444_vm2, %v2882_v9 }
0x146e   :  { %6918 = vmatmul.mubr.msk.f32.vlgmr.msra.gmra.mxu0 %vm444_vm2, %v2883_v10 }
0x146f   :  { %6940 = vmatpush3.msra.mxu0 %v8167_v48  ;;  %6955 = vmatprep.mubr.msk.f32.mxu0 %vm106_vm0, %v8058_v58  ;;  %v6004_v58 = vld [vmem:[%s8836_s16 + $0x248] sm:$0xff] }
0x1470   :  { %6941 = vmatprep.subr.mxu0 %v6009_v11 }
0x1471   :  { %6942 = vmatpush3.msra.mxu0 %v6009_v11 }
0x1472   :  { %6943 = vmatprep.subr.mxu0 %v6008_v12 }
0x1473   :  { %6944 = vmatpush3.msra.mxu0 %v6008_v12 }
0x1474   :  { %6945 = vmatprep.subr.mxu0 %v6007_v16 }
0x1475   :  { %6946 = vmatpush3.msra.mxu0 %v6007_v16 }
0x1476   :  { %6947 = vmatprep.subr.mxu0 %v6006_v18 }
0x1477   :  { %6948 = vmatpush3.msra.mxu0 %v6006_v18 }
0x1478   :  { %6949 = vmatprep.subr.mxu0 %v6005_v19 }
0x1479   :  { %6950 = vmatpush3.msra.mxu0 %v6005_v19 }
0x147a   :  { %6951 = vmatprep.subr.mxu0 %v6004_v58 }
0x147b   :  { %6952 = vmatpush3.msra.mxu0 %v6004_v58 }
0x147c   :  { %6953 = vmatprep.subr.mxu0 %v6003_v20 }
0x147d   :  { %6954 = vmatpush3.msra.mxu0 %v6003_v20 }
0x147e   :  { %6956 = vmatmul.mubr.msk.f32.vlgmr.msra.gmra.mxu0 %vm106_vm0, %v8068_v60 }
0x147f   :  { %6981 = vmatprep.mubr.msk.f32.mxu0 %vm356_vm1, %v3045_v22  ;;  %v6049_v22 = vld [vmem:[%s8841_s17 + $0x110] sm:$0xff] }
0x152e   :  { %v6919_v23 = vpop.f32.mrf.mxu0 }
0x1530   :  { %v2956_v60 = vpop.f32.mrf.mxu0 }
0x1531   :  { %7010 = vmatprep.mubr.msk.f32.mxu1 %vm356_vm1, %v2956_v60  ;;  %v6048_v60 = vld [vmem:[%s8841_s17 + $0x108] sm:$0xff] }
0x1532   :  { %7011 = vmatmul.mubr.msk.f32.vlgmr.msra.gmra.mxu1 %vm356_vm1, %v6919_v23  ;;  %v6043_v23 = vld [vmem:[%s8841_s17 + $0xd0] sm:$0xff] }
0x1533   :  { %7032 = vmatprep.mubr.msk.f32.mxu1 %vm7380_vm3, %v7379_v14  ;;  %7025 = vmatpush3.msra.mxu1 %v6050_v41 }
0x1534   :  { %7026 = vmatprep.subr.mxu1 %v7379_v14 }
0x1535   :  { %7027 = vmatpush3.msra.mxu1 %v6049_v22 }
0x1536   :  { %7028 = vmatprep.subr.mxu1 %v7379_v14 }
0x1537   :  { %7029 = vmatpush3.msra.mxu1 %v6048_v60  ;;  %v6075_v60 = vld [vmem:[%s8841_s17 + $0x138] sm:$0xff] }
0x1538   :  { %7030 = vmatprep.subr.mxu1 %v7379_v14 }
0x153e   :  { %v6957_v24 = vpop.f32.mrf.mxu0 }
0x153f   :  { %6977 = vmatprep.subr.msk.mxu0 %vm356_vm1, %v6957_v24 }
0x1540   :  { %v3129_v26 = vpop.f32.mrf.mxu0  ;;  %6978 = vmatpush3.xpose.msk.msra.mxu0 %vm356_vm1, %v6957_v24  ;;  %v6042_v24 = vld [vmem:[%s8841_s17 + $0xc8] sm:$0xff] }
0x1541   :  { %6979 = vmatprep.subr.msk.mxu0 %vm356_vm1, %v3129_v26 }
0x1544   :  { %6980 = vmatpush3.xpose.msk.msra.mxu0 %vm356_vm1, %v3129_v26  ;;  %v6047_v26 = vld [vmem:[%s8841_s17 + $0x100] sm:$0xff] }
0x1545   :  { %6984 = vmatprep.subr.mxu0 %v6976_v28  ;;  %7031 = vmatpush3.msra.mxu1 %v6047_v26  ;;  %v6073_v26 = vld [vmem:[%s8841_s17 + $0x128] sm:$0xff] }
0x1547   :  { %6982 = vmatmul.mubr.msk.f32.vlgmr.msra.gmra.mxu0 %vm356_vm1, %v6938_v40  ;;  %v6044_v40 = vld [vmem:[%s8841_s17 + $0xd8] sm:$0xff] }
0x1548   :  { %6985 = vmatpush3.msra.mxu0 %v6976_v28  ;;  %v6041_v28 = vld [vmem:[%s8841_s17 + $0xc0] sm:$0xff] }
0x1549   :  { %6986 = vmatprep.subr.mxu0 %v3213_v29 }
0x154a   :  { %6987 = vmatpush3.msra.mxu0 %v3213_v29  ;;  %v8338_v29 = vld [vmem:[%s8797_s5] sm:$0xff] }
0x154b   :  { %6991 = vmatprep.subr.mxu0 %v6032_v47  ;;  %7033 = vmatmul.mubr.msk.f32.vlgmr.msra.gmra.mxu1 %vm356_vm1, %v8338_v29 }
0x15f2   :  { %v7012_v61 = vpop.f32.mrf.mxu1 }
0x15f4   :  { %v3570_v1 = vpop.f32.mrf.mxu1 }
0x1607   :  { %v6983_v30 = vpop.f32.mrf.mxu0 }
0x1608   :  { %v3306_v33 = vadd.f32 %v6983_v30, %v8145_v25 }
0x1609   :  { %v3300_v34 = vpop.f32.mrf.mxu0 }
0x160a   :  { %v3301_v35 = vadd.f32 %v3300_v34, %v8150_v27  ;;  %v3312_v36 = vsel %vm444_vm2, %v3306_v33, -inf }
0x160b   :  { %3313 = vmax.xlane.f32.xlu1 %v3312_v36 }
0x160c   :  { %v3309_v37 = vsel %vm444_vm2, %v3301_v35, -inf }
0x160d   :  { %3310 = vmax.xlane.f32.xlu0 %v3309_v37 }
0x1694   :  { %v3314_v38 = vpop.xlane.xlu1 %3313 }
0x1695   :  { %v3316_v39 = vsub.f32 %v3306_v33, %v3314_v38 }
0x1696   :  { %v3311_v42 = vpop.xlane.xlu0 %3310 }
0x1697   :  { %v3319_v32 = vmul.f32 1.442695, %v3316_v39  ;;  %v3315_v43 = vsub.f32 %v3301_v35, %v3311_v42  ;;  %v6039_v39 = vld [vmem:[%s8843_s7 + $0x3] ss:$0 sm:$0xff] }
0x1699   :  { %7319 = vpow2.f32 %v3319_v32  ;;  %v3317_v31 = vmul.f32 1.442695, %v3315_v43 }
0x169b   :  { %7321 = vpow2.f32 %v3317_v31 }
0x16a6   :  { %v7320_v17 = vpop.eup %7319 }
0x16a7   :  { %v3324_v25 = vsel %vm444_vm2, %v7320_v17, 0.0 }
0x16a8   :  { %v7322_v44 = vpop.eup %7321  ;;  %3325 = vadd.xlane.f32.xlu1 %v3324_v25 }
0x16a9   :  { %v3321_v27 = vsel %vm444_vm2, %v7322_v44, 0.0 }
0x16aa   :  { %3322 = vadd.xlane.f32.xlu0 %v3321_v27 }
0x1731   :  { %v3326_v48 = vpop.xlane.xlu1 %3325 }
0x1732   :  { %7323 = vrcp.f32 %v3326_v48  ;;  %v6054_v48 = vld [vmem:[%s8841_s17 + $0x150] sm:$0xff] }
0x1733   :  { %v3323_v49 = vpop.xlane.xlu0 %3322 }
0x1734   :  { %7325 = vrcp.f32 %v3323_v49  ;;  %v6053_v49 = vld [vmem:[%s8841_s17 + $0x148] sm:$0xff] }
0x173f   :  { %v7324_v50 = vpop.eup %7323 }
0x1740   :  { %v3330_v53 = vmul.f32 %v7324_v50, %v7320_v17  ;;  %v6040_v17 = vld [vmem:[%s8844_s2 + $0x3] ss:$0 sm:$0xff] }
0x1741   :  { %v7326_v51 = vpop.eup %7325  ;;  %v6052_v50 = vld [vmem:[%s8841_s17 + $0x140] sm:$0xff] }
0x1742   :  { %v3329_v52 = vmul.f32 %v7326_v51, %v7322_v44  ;;  %v6069_v51 = vld [vmem:[%s8841_s17 + $0xf8] sm:$0xff] }
0x1744   :  { %6988 = vmatprep.mubr.msk.f32.mxu0 %vm444_vm2, %v3329_v52  ;;  %v6068_v52 = vld [vmem:[%s8841_s17 + $0xf0] sm:$0xff] }
0x1745   :  { %6989 = vmatmul.mubr.msk.f32.vlgmr.msra.gmra.mxu0 %vm444_vm2, %v3330_v53  ;;  %v6067_v53 = vld [vmem:[%s8841_s17 + $0xe8] sm:$0xff] }
0x1746   :  { %6992 = vmatpush3.msra.mxu0 %v6032_v47  ;;  %v6055_v47 = vld [vmem:[%s8841_s17 + $0x158] sm:$0xff] }
0x1747   :  { %6993 = vmatprep.subr.mxu0 %v6031_v54 }
0x1748   :  { %6994 = vmatpush3.msra.mxu0 %v6031_v54  ;;  %v6066_v54 = vld [vmem:[%s8841_s17 + $0xe0] sm:$0xff] }
0x1749   :  { %6995 = vmatprep.subr.mxu0 %v6030_v55 }
0x174a   :  { %6996 = vmatpush3.msra.mxu0 %v6030_v55  ;;  %v3787_v55 = vpop.f32.mrf.mxu1 }
0x174b   :  { %6997 = vmatprep.subr.mxu0 %v6029_v56  ;;  %7046 = vmatprep.subr.msk.mxu1 %vm356_vm1, %v3787_v55 }
0x174c   :  { %6998 = vmatpush3.msra.mxu0 %v6029_v56  ;;  %v7034_v56 = vpop.f32.mrf.mxu1  ;;  %7047 = vmatpush3.xpose.msk.msra.mxu1 %vm356_vm1, %v3787_v55 }
0x174d   :  { %7013 = vmatprep.subr.mxu0 %v6044_v40 }
0x1805   :  { %v6990_v57 = vpop.f32.mrf.mxu0 }
0x1807   :  { %v3403_v59 = vpop.f32.mrf.mxu0 }
0x1808   :  { %6999 = vmatprep.mubr.msk.f32.mxu0 %vm356_vm1, %v3403_v59 }
0x1809   :  { %7000 = vmatmul.mubr.msk.f32.vlgmr.msra.gmra.mxu0 %vm356_vm1, %v6990_v57 }
0x180a   :  { %7014 = vmatpush3.msra.mxu0 %v6044_v40 }
0x180b   :  { %7015 = vmatprep.subr.mxu0 %v6043_v23 }
0x180c   :  { %7016 = vmatpush3.msra.mxu0 %v6043_v23 }
0x180d   :  { %7017 = vmatprep.subr.mxu0 %v6042_v24 }
0x180e   :  { %7018 = vmatpush3.msra.mxu0 %v6042_v24  ;;  %v6074_v24 = vld [vmem:[%s8841_s17 + $0x130] sm:$0xff] }
0x180f   :  { %7019 = vmatprep.subr.mxu0 %v6041_v28 }
0x1810   :  { %7020 = vmatpush3.msra.mxu0 %v6041_v28 }
0x1811   :  { %7035 = vmatprep.subr.mxu0 %v7379_v14 }
0x18c9   :  { %v7001_v62 = vpop.f32.mrf.mxu0 }
0x18ca   :  { %v3576_v0 = vadd.f32 %v7012_v61, %v7001_v62 }
0x18cb   :  { %v3489_v2 = vpop.f32.mrf.mxu0 }
0x18cc   :  { %v3571_v4 = vadd.f32 %v3570_v1, %v3489_v2  ;;  %v3580_v5 = vadd.f32 %v3576_v0, %v2511_v63  ;;  %v8404_v63 = vld [vmem:[%s8798_s9 + $0x8] sm:$0xff]  ;;  %v8409_v1 = vld [vmem:[%s8798_s9] sm:$0xff] }
0x18ce   :  { %v3588_v6 = vsel %vm356_vm1, %v3580_v5, 0.0  ;;  %v3579_v7 = vadd.f32 %v3571_v4, %v2510_v3 }
0x18cf   :  { %3589 = vadd.xlane.f32.xlu1 %v3588_v6 }
0x18d0   :  { %v3585_v8 = vsel %vm356_vm1, %v3579_v7, 0.0 }
0x18d1   :  { %3586 = vadd.xlane.f32.xlu0 %v3585_v8 }
0x1958   :  { %v3590_v9 = vpop.xlane.xlu1 %3589 }
0x1959   :  { %v3592_v10 = vmul.f32 0.03125, %v3590_v9 }
0x195a   :  { %v3587_v11 = vpop.xlane.xlu0 %3586 }
0x195b   :  { %v3594_v12 = vsub.f32 %v3580_v5, %v3592_v10  ;;  %v3591_v16 = vmul.f32 0.03125, %v3587_v11 }
0x195d   :  { %v3593_v18 = vsub.f32 %v3579_v7, %v3591_v16  ;;  %v3596_v19 = vmul.f32 %v3594_v12, %v3594_v12 }
0x195f   :  { %v3600_v58 = vsel %vm356_vm1, %v3596_v19, 0.0  ;;  %v3595_v20 = vmul.f32 %v3593_v18, %v3593_v18 }
0x1960   :  { %3601 = vadd.xlane.f32.xlu1 %v3600_v58 }
0x1961   :  { %v3597_v21 = vsel %vm356_vm1, %v3595_v20, 0.0 }
0x1962   :  { %3598 = vadd.xlane.f32.xlu0 %v3597_v21 }
0x19e9   :  { %v3602_v30 = vpop.xlane.xlu1 %3601 }
0x19ea   :  { %v3604_v33 = vmul.f32 0.03125, %v3602_v30  ;;  %v6072_v30 = vld [vmem:[%s8841_s17 + $0x120] sm:$0xff] }
0x19eb   :  { %v3599_v34 = vpop.xlane.xlu0 %3598 }
0x19ec   :  { %v3606_v35 = vadd.f32 1e-06, %v3604_v33  ;;  %v3603_v36 = vmul.f32 0.03125, %v3599_v34 }
0x19ee   :  { %7327 = vrsqrt.f32 %v3606_v35  ;;  %v3605_v37 = vadd.f32 1e-06, %v3603_v36 }
0x19f0   :  { %7329 = vrsqrt.f32 %v3605_v37 }
0x19fb   :  { %v7328_v38 = vpop.eup %7327 }
0x19fc   :  { %v3610_v42 = vmul.f32 %v7328_v38, %v3594_v12  ;;  %v6080_v38 = vld [vmem:[%s8841_s17 + $0x178] sm:$0xff] }
0x19fd   :  { %v7330_v32 = vpop.eup %7329 }
0x19fe   :  { %v3609_v43 = vmul.f32 %v7330_v32, %v3593_v18  ;;  %v3618_v31 = vmul.f32 %v6039_v39, %v3610_v42  ;;  %v6078_v42 = vld [vmem:[%s8841_s17 + $0x168] sm:$0xff]  ;;  %v6077_v32 = vld [vmem:[%s8841_s17 + $0x160] sm:$0xff] }
0x1a00   :  { %v3617_v25 = vmul.f32 %v6039_v39, %v3609_v43  ;;  %v8352_v27 = vadd.f32 %v6040_v17, %v3618_v31  ;;  %v6079_v39 = vld [vmem:[%s8841_s17 + $0x170] sm:$0xff] }
0x1a02   :  { %v8350_v44 = vadd.f32 %v6040_v17, %v3617_v25 }
0x1a04   :  { %7021 = vmatprep.mubr.msk.f32.mxu0 %vm356_vm1, %v8350_v44 }
0x1a05   :  { %7022 = vmatmul.mubr.msk.f32.vlgmr.msra.gmra.mxu0 %vm356_vm1, %v8352_v27 }
0x1a06   :  { %7036 = vmatpush3.msra.mxu0 %v6055_v47  ;;  %7043 = vmatprep.mubr.msk.f32.mxu0 %vm7380_vm3, %v7379_v14 }
0x1a07   :  { %7037 = vmatprep.subr.mxu0 %v7379_v14 }
0x1a08   :  { %7038 = vmatpush3.msra.mxu0 %v6054_v48 }
0x1a09   :  { %7039 = vmatprep.subr.mxu0 %v7379_v14 }
0x1a0a   :  { %7040 = vmatpush3.msra.mxu0 %v6053_v49 }
0x1a0b   :  { %7041 = vmatprep.subr.mxu0 %v7379_v14 }
0x1a0c   :  { %7042 = vmatpush3.msra.mxu0 %v6052_v50 }
0x1a0d   :  { %7044 = vmatmul.mubr.msk.f32.vlgmr.msra.gmra.mxu0 %vm356_vm1, %v8338_v29  ;;  %7056 = vmatprep.subr.mxu0 %v6069_v51 }
0x1a0e   :  { %7057 = vmatpush3.msra.mxu0 %v6069_v51  ;;  %7064 = vmatprep.mubr.msk.f32.mxu0 %vm356_vm1, %v8350_v44 }
0x1a0f   :  { %7058 = vmatprep.subr.mxu0 %v6068_v52 }
0x1a10   :  { %7059 = vmatpush3.msra.mxu0 %v6068_v52 }
0x1a11   :  { %7060 = vmatprep.subr.mxu0 %v6067_v53 }
0x1a12   :  { %7061 = vmatpush3.msra.mxu0 %v6067_v53 }
0x1a13   :  { %7062 = vmatprep.subr.mxu0 %v6066_v54 }
0x1a14   :  { %7063 = vmatpush3.msra.mxu0 %v6066_v54 }
0x1a15   :  { %7065 = vmatmul.mubr.msk.f32.vlgmr.msra.gmra.mxu0 %vm356_vm1, %v8352_v27  ;;  %7078 = vmatprep.subr.mxu0 %v7379_v14 }
0x1a16   :  { %7086 = vmatprep.mubr.msk.f32.mxu0 %vm7380_vm3, %v7379_v14  ;;  %7079 = vmatpush3.msra.mxu0 %v6080_v38 }
0x1a17   :  { %7080 = vmatprep.subr.mxu0 %v7379_v14 }
0x1a18   :  { %7081 = vmatpush3.msra.mxu0 %v6079_v39 }
0x1a19   :  { %7082 = vmatprep.subr.mxu0 %v7379_v14 }
0x1a1a   :  { %7083 = vmatpush3.msra.mxu0 %v6078_v42 }
0x1a1b   :  { %7084 = vmatprep.subr.mxu0 %v7379_v14 }
0x1a1c   :  { %7085 = vmatpush3.msra.mxu0 %v6077_v32 }
0x1a1d   :  { %7087 = vmatmul.mubr.msk.f32.vlgmr.msra.gmra.mxu0 %vm356_vm1, %v8338_v29 }
0x1ac5   :  { %v7023_v57 = vpop.f32.mrf.mxu0 }
0x1ac7   :  { %v3704_v59 = vpop.f32.mrf.mxu0 }
0x1ac8   :  { %7048 = vmatprep.mubr.msk.f32.mxu1 %vm356_vm1, %v3704_v59 }
0x1ac9   :  { %7049 = vmatmul.mubr.msk.f32.vlgmr.msra.gmra.mxu1 %vm356_vm1, %v7023_v57 }
0x1acd   :  { %v3862_v61 = vpop.f32.mrf.mxu0 }
0x1ace   :  { %7051 = vmatprep.subr.mxu1 %v3862_v61 }
0x1acf   :  { %v7045_v62 = vpop.f32.mrf.mxu0  ;;  %7052 = vmatpush3.msra.mxu1 %v3862_v61  ;;  %v6065_v61 = vld [vmem:[%s8846_s30 + $0x58] sm:$0xff] }
0x1ad0   :  { %7067 = vmatprep.subr.mxu1 %v7379_v14  ;;  %v6090_v62 = vld [vmem:[%s8846_s30 + $0x78] sm:$0xff] }
0x1ad1   :  { %7099 = vmatprep.subr.mxu0 %v6090_v62 }
0x1ad2   :  { %7100 = vmatpush3.msra.mxu0 %v6090_v62 }
0x1ad5   :  { %v7066_v28 = vpop.f32.mrf.mxu0 }
0x1ad7   :  { %v4129_v33 = vpop.f32.mrf.mxu0 }
0x1add   :  { %v4284_v57 = vpop.f32.mrf.mxu0 }
0x1adf   :  { %v7088_v59 = vpop.f32.mrf.mxu0 }
0x1b89   :  { %v7050_v0 = vpop.f32.mrf.mxu1 }
0x1b8a   :  { %v3947_v2 = vadd.f32 %v7050_v0, %v8404_v63 }
0x1b8b   :  { %v3941_v3 = vpop.f32.mrf.mxu1 }
0x1b8c   :  { %v3942_v4 = vadd.f32 %v3941_v3, %v8409_v1  ;;  %v3953_v5 = vsel %vm1530_vm4, %v3947_v2, -inf }
0x1b8d   :  { %3954 = vmax.xlane.f32.xlu1 %v3953_v5 }
0x1b8e   :  { %v3950_v6 = vsel %vm1530_vm4, %v3942_v4, -inf }
0x1b8f   :  { %3951 = vmax.xlane.f32.xlu0 %v3950_v6  ;;  %v6064_v6 = vld [vmem:[%s8846_s30 + $0x50] sm:$0xff] }
0x1c16   :  { %v3955_v7 = vpop.xlane.xlu1 %3954 }
0x1c17   :  { %v3957_v8 = vsub.f32 %v3947_v2, %v3955_v7  ;;  %v6063_v7 = vld [vmem:[%s8846_s30 + $0x48] sm:$0xff] }
0x1c18   :  { %v3952_v9 = vpop.xlane.xlu0 %3951 }
0x1c19   :  { %v3960_v10 = vmul.f32 1.442695, %v3957_v8  ;;  %v3956_v11 = vsub.f32 %v3942_v4, %v3952_v9  ;;  %v6062_v8 = vld [vmem:[%s8846_s30 + $0x40] sm:$0xff]  ;;  %v6088_v9 = vld [vmem:[%s8846_s30 + $0x68] sm:$0xff] }
0x1c1b   :  { %7331 = vpow2.f32 %v3960_v10  ;;  %v3958_v12 = vmul.f32 1.442695, %v3956_v11  ;;  %v6087_v10 = vld [vmem:[%s8846_s30 + $0x60] sm:$0xff] }
0x1c1d   :  { %7333 = vpow2.f32 %v3958_v12 }
0x1c28   :  { %v7332_v16 = vpop.eup %7331 }
0x1c29   :  { %v3965_v18 = vsel %vm1530_vm4, %v7332_v16, 0.0 }
0x1c2a   :  { %v7334_v19 = vpop.eup %7333  ;;  %3966 = vadd.xlane.f32.xlu1 %v3965_v18 }
0x1c2b   :  { %v3962_v58 = vsel %vm1530_vm4, %v7334_v19, 0.0 }
0x1c2c   :  { %3963 = vadd.xlane.f32.xlu0 %v3962_v58 }
0x1cb3   :  { %v3967_v20 = vpop.xlane.xlu1 %3966 }
0x1cb4   :  { %7335 = vrcp.f32 %v3967_v20 }
0x1cb5   :  { %v3964_v21 = vpop.xlane.xlu0 %3963 }
0x1cb6   :  { %7337 = vrcp.f32 %v3964_v21 }
0x1cc1   :  { %v7336_v41 = vpop.eup %7335 }
0x1cc2   :  { %v3971_v23 = vmul.f32 %v7336_v41, %v7332_v16 }
0x1cc3   :  { %v7338_v40 = vpop.eup %7337 }
0x1cc4   :  { %v3970_v22 = vmul.f32 %v7338_v40, %v7334_v19 }
0x1cc6   :  { %7053 = vmatprep.mubr.msk.f32.mxu1 %vm1530_vm4, %v3970_v22 }
0x1cc7   :  { %7054 = vmatmul.mubr.msk.f32.vlgmr.msra.gmra.mxu1 %vm1530_vm4, %v3971_v23 }
0x1cc8   :  { %7068 = vmatpush3.msra.mxu1 %v6075_v60  ;;  %7075 = vmatprep.mubr.msk.f32.mxu1 %vm7380_vm3, %v7379_v14 }
0x1cc9   :  { %7069 = vmatprep.subr.mxu1 %v7379_v14 }
0x1cca   :  { %7070 = vmatpush3.msra.mxu1 %v6074_v24 }
0x1ccb   :  { %7071 = vmatprep.subr.mxu1 %v7379_v14 }
0x1ccc   :  { %7072 = vmatpush3.msra.mxu1 %v6073_v26  ;;  %v5946_v26 = vld [vmem:[%s8799_s23] ss:$0 sm:$0xff] }
0x1ccd   :  { %7073 = vmatprep.subr.mxu1 %v7379_v14 }
0x1cce   :  { %7074 = vmatpush3.msra.mxu1 %v6072_v30  ;;  %v2452_v30 = vadd.f32 %v5946_v26, %v8107_v15 }
0x1ccf   :  { %7076 = vmatmul.mubr.msk.f32.vlgmr.msra.gmra.mxu1 %vm356_vm1, %v8338_v29 }
0x1cd0   :  { %7091 = vmatprep.mubr.msk.f32.mxu1 %vm356_vm1, %v4129_v33  ;;  %v2460_v38 = vadd.f32 %v2452_v30, %v8014_v45  ;;  %v6101_v45 = vld [vmem:[%s8847_s14 + $0x30] sm:$0xff] }
0x1cd2   :  { %v2466_v32 = vsel %vm356_vm1, %v2460_v38, 0.0 }
0x1d87   :  { %v8439_v34 = vpop.f32.mrf.mxu1 }
0x1d89   :  { %v8441_v35 = vpop.f32.mrf.mxu1 }
0x1d8f   :  { %v4209_v36 = vpop.f32.mrf.mxu1 }
0x1d90   :  { %7089 = vmatprep.subr.msk.mxu1 %vm356_vm1, %v4209_v36 }
0x1d91   :  { %v7077_v37 = vpop.f32.mrf.mxu1  ;;  %7090 = vmatpush3.xpose.msk.msra.mxu1 %vm356_vm1, %v4209_v36 }
0x1d92   :  { %7094 = vmatprep.subr.mxu1 %v4284_v57 }
0x1d94   :  { %7092 = vmatmul.mubr.msk.f32.vlgmr.msra.gmra.mxu1 %vm356_vm1, %v7066_v28 }
0x1d95   :  { %7095 = vmatpush3.msra.mxu1 %v4284_v57 }
0x1d96   :  { %7110 = vmatprep.subr.mxu1 %v6065_v61 }
0x1e54   :  { %v7093_v43 = vpop.f32.mrf.mxu1 }
0x1e55   :  { %v4369_v31 = vadd.f32 %v7093_v43, %v8404_v63  ;;  %v6089_v63 = vld [vmem:[%s8846_s30 + $0x70] sm:$0xff]  ;;  %v6099_v43 = vld [vmem:[%s8847_s14 + $0x20] sm:$0xff]  ;;  %s8849_s30 = sld [smem:[#allocation15_spill]] }
0x1e56   :  { %v4363_v17 = vpop.f32.mrf.mxu1  ;;  %7101 = vmatprep.subr.mxu0 %v6089_v63 }
0x1e57   :  { %v4364_v25 = vadd.f32 %v4363_v17, %v8409_v1  ;;  %v4375_v47 = vsel %vm1530_vm4, %v4369_v31, -inf  ;;  %7102 = vmatpush3.msra.mxu0 %v6089_v63 }
0x1e58   :  { %4376 = vmax.xlane.f32.xlu1 %v4375_v47  ;;  %7103 = vmatprep.subr.mxu0 %v6088_v9 }
0x1e59   :  { %v4372_v48 = vsel %vm1530_vm4, %v4364_v25, -inf  ;;  %7104 = vmatpush3.msra.mxu0 %v6088_v9  ;;  %v6112_v9 = vld [vmem:[%s8848_s19 + $0x68] sm:$0xff] }
0x1e5a   :  { %4373 = vmax.xlane.f32.xlu0 %v4372_v48  ;;  %7105 = vmatprep.subr.mxu0 %v6087_v10 }
0x1e5b   :  { %7106 = vmatpush3.msra.mxu0 %v6087_v10  ;;  %v6111_v10 = vld [vmem:[%s8848_s19 + $0x60] sm:$0xff] }
0x1ee1   :  { %v4377_v49 = vpop.xlane.xlu1 %4376 }
0x1ee2   :  { %v4379_v50 = vsub.f32 %v4369_v31, %v4377_v49 }
0x1ee3   :  { %v4374_v51 = vpop.xlane.xlu0 %4373 }
0x1ee4   :  { %v4382_v14 = vmul.f32 1.442695, %v4379_v50  ;;  %v4378_v52 = vsub.f32 %v4364_v25, %v4374_v51 }
0x1ee6   :  { %7339 = vpow2.f32 %v4382_v14  ;;  %v4380_v53 = vmul.f32 1.442695, %v4378_v52 }
0x1ee8   :  { %7341 = vpow2.f32 %v4380_v53 }
0x1ef3   :  { %v7340_v29 = vpop.eup %7339 }
0x1ef4   :  { %v4387_v54 = vsel %vm1530_vm4, %v7340_v29, 0.0 }
0x1ef5   :  { %v7342_v55 = vpop.eup %7341  ;;  %4388 = vadd.xlane.f32.xlu1 %v4387_v54 }
0x1ef6   :  { %v4384_v56 = vsel %vm1530_vm4, %v7342_v55, 0.0 }
0x1ef7   :  { %4385 = vadd.xlane.f32.xlu0 %v4384_v56 }
0x1f7e   :  { %v4389_v0 = vpop.xlane.xlu1 %4388 }
0x1f7f   :  { %7343 = vrcp.f32 %v4389_v0 }
0x1f80   :  { %v4386_v1 = vpop.xlane.xlu0 %4385 }
0x1f81   :  { %7345 = vrcp.f32 %v4386_v1 }
0x1f8c   :  { %v7344_v2 = vpop.eup %7343 }
0x1f8d   :  { %v4393_v5 = vmul.f32 %v7344_v2, %v7340_v29  ;;  %v6098_v2 = vld [vmem:[%s8844_s2 + $0x4] ss:$0 sm:$0xff] }
0x1f8e   :  { %v7346_v3 = vpop.eup %7345 }
0x1f8f   :  { %v4392_v4 = vmul.f32 %v7346_v3, %v7342_v55 }
0x1f91   :  { %7096 = vmatprep.mubr.msk.f32.mxu1 %vm1530_vm4, %v4392_v4 }
0x1f92   :  { %7097 = vmatmul.mubr.msk.f32.vlgmr.msra.gmra.mxu1 %vm1530_vm4, %v4393_v5 }
0x1f93   :  { %7111 = vmatpush3.msra.mxu1 %v6065_v61  ;;  %7118 = vmatprep.mubr.msk.f32.mxu1 %vm356_vm1, %v8441_v35  ;;  %v6097_v61 = vld [vmem:[%s8843_s7 + $0x4] ss:$0 sm:$0xff] }
0x1f94   :  { %7112 = vmatprep.subr.mxu1 %v6064_v6 }
0x1f95   :  { %7113 = vmatpush3.msra.mxu1 %v6064_v6  ;;  %v4932_v6 = vld [vmem:[%s8800_s10] sm:$0xff] }
0x1f96   :  { %7114 = vmatprep.subr.mxu1 %v6063_v7 }
0x1f97   :  { %7115 = vmatpush3.msra.mxu1 %v6063_v7  ;;  %v6114_v7 = vld [vmem:[%s8848_s19 + $0x78] sm:$0xff] }
0x1f98   :  { %7116 = vmatprep.subr.mxu1 %v6062_v8 }
0x1f99   :  { %7117 = vmatpush3.msra.mxu1 %v6062_v8  ;;  %v6113_v8 = vld [vmem:[%s8848_s19 + $0x70] sm:$0xff] }
0x1f9a   :  { %7119 = vmatmul.mubr.msk.f32.vlgmr.msra.gmra.mxu1 %vm356_vm1, %v8439_v34  ;;  %7132 = vmatprep.subr.mxu1 %v6114_v7 }
0x1f9b   :  { %7133 = vmatpush3.msra.mxu1 %v6114_v7 }
0x1f9c   :  { %7134 = vmatprep.subr.mxu1 %v6113_v8 }
0x1f9d   :  { %7135 = vmatpush3.msra.mxu1 %v6113_v8  ;;  %v6143_v8 = vld [vmem:[%s8803_s25 + $0x30] sm:$0xff] }
0x1f9e   :  { %7136 = vmatprep.subr.mxu1 %v6112_v9 }
0x1f9f   :  { %7137 = vmatpush3.msra.mxu1 %v6112_v9 }
0x1fa0   :  { %7138 = vmatprep.subr.mxu1 %v6111_v10 }
0x1fa1   :  { %7139 = vmatpush3.msra.mxu1 %v6111_v10  ;;  %v6142_v10 = vld [vmem:[%s8803_s25 + $0x28] sm:$0xff] }
0x2052   :  { %v7098_v11 = vpop.f32.mrf.mxu1 }
0x2054   :  { %v4466_v12 = vpop.f32.mrf.mxu1 }
0x2055   :  { %7107 = vmatprep.mubr.msk.f32.mxu0 %vm356_vm1, %v4466_v12  ;;  %v6109_v12 = vld [vmem:[%s8848_s19 + $0x50] sm:$0xff] }
0x2056   :  { %7108 = vmatmul.mubr.msk.f32.vlgmr.msra.gmra.mxu0 %vm356_vm1, %v7098_v11  ;;  %v6110_v11 = vld [vmem:[%s8848_s19 + $0x58] sm:$0xff] }
0x2057   :  { %7140 = vmatprep.subr.mxu1 %v6110_v11 }
0x2058   :  { %7141 = vmatpush3.msra.mxu1 %v6110_v11  ;;  %v6138_v11 = vld [vmem:[%s8802_s24 + $0x58] sm:$0xff] }
0x2059   :  { %7142 = vmatprep.subr.mxu1 %v6109_v12 }
0x205a   :  { %v7120_v16 = vpop.f32.mrf.mxu1  ;;  %7143 = vmatpush3.msra.mxu1 %v6109_v12  ;;  %v6141_v12 = vld [vmem:[%s8803_s25 + $0x20] sm:$0xff] }
0x205c   :  { %v4633_v58 = vpop.f32.mrf.mxu1 }
0x2116   :  { %v7109_v18 = vpop.f32.mrf.mxu0 }
0x2117   :  { %v4639_v19 = vadd.f32 %v7120_v16, %v7109_v18  ;;  %v6108_v16 = vld [vmem:[%s8848_s19 + $0x48] sm:$0xff]  ;;  %v6107_v18 = vld [vmem:[%s8848_s19 + $0x40] sm:$0xff] }
0x2118   :  { %v4552_v20 = vpop.f32.mrf.mxu0  ;;  %7144 = vmatprep.subr.mxu1 %v6108_v16 }
0x2119   :  { %v4634_v21 = vadd.f32 %v4633_v58, %v4552_v20  ;;  %v4643_v41 = vadd.f32 %v4639_v19, %v8352_v27  ;;  %v2457_v27 = vadd.f32 %v8105_v13, %v5946_v26  ;;  %v6102_v13 = vld [vmem:[%s8847_s14 + $0x38] sm:$0xff]  ;;  %7145 = vmatpush3.msra.mxu1 %v6108_v16  ;;  %v6137_v16 = vld [vmem:[%s8802_s24 + $0x50] sm:$0xff] }
0x211a   :  { %7121 = vmatprep.subr.mxu0 %v6102_v13  ;;  %7146 = vmatprep.subr.mxu1 %v6107_v18 }
0x211b   :  { %v4651_v40 = vsel %vm356_vm1, %v4643_v41, 0.0  ;;  %v4642_v22 = vadd.f32 %v4634_v21, %v8350_v44  ;;  %v2461_v42 = vadd.f32 %v2457_v27, %v8016_v46  ;;  %7122 = vmatpush3.msra.mxu0 %v6102_v13  ;;  %v6100_v46 = vld [vmem:[%s8847_s14 + $0x28] sm:$0xff]  ;;  %7147 = vmatpush3.msra.mxu1 %v6107_v18  ;;  %v6152_v18 = vld [vmem:[%s8803_s25 + $0x58] sm:$0xff] }
0x211c   :  { %4652 = vadd.xlane.f32.xlu1 %v4651_v40  ;;  %7123 = vmatprep.subr.mxu0 %v6101_v45  ;;  %v5016_v13 = vld [vmem:[%s8801_s11 + $0x8] sm:$0xff] }
0x211d   :  { %v4648_v23 = vsel %vm356_vm1, %v4642_v22, 0.0  ;;  %v2469_v15 = vsel %vm356_vm1, %v2461_v42, 0.0  ;;  %7124 = vmatpush3.msra.mxu0 %v6101_v45  ;;  %v6116_v45 = vld [vmem:[%s8799_s23 + $0x1] ss:$0 sm:$0xff] }
0x211e   :  { %4649 = vadd.xlane.f32.xlu0 %v4648_v23  ;;  %7125 = vmatprep.subr.mxu0 %v6100_v46 }
0x211f   :  { %7126 = vmatpush3.msra.mxu0 %v6100_v46 }
0x2120   :  { %7127 = vmatprep.subr.mxu0 %v6099_v43 }
0x2121   :  { %7128 = vmatpush3.msra.mxu0 %v6099_v43 }
0x21a5   :  { %v4653_v60 = vpop.xlane.xlu1 %4652 }
0x21a6   :  { %v4655_v24 = vmul.f32 0.03125, %v4653_v60 }
0x21a7   :  { %v4650_v28 = vpop.xlane.xlu0 %4649 }
0x21a8   :  { %v4657_v33 = vsub.f32 %v4643_v41, %v4655_v24  ;;  %v4654_v34 = vmul.f32 0.03125, %v4650_v28  ;;  %v5951_v24 = vld [vmem:[%s8843_s7 + $0x2] ss:$0 sm:$0xff] }
0x21aa   :  { %v4656_v35 = vsub.f32 %v4642_v22, %v4654_v34  ;;  %v4659_v36 = vmul.f32 %v4657_v33, %v4657_v33 }
0x21ac   :  { %v4663_v44 = vsel %vm356_vm1, %v4659_v36, 0.0  ;;  %v4658_v37 = vmul.f32 %v4656_v35, %v4656_v35  ;;  %v6104_v36 = vld [vmem:[%s8794_s21 + $0x1] ss:$0 sm:$0xff] }
0x21ad   :  { %4664 = vadd.xlane.f32.xlu1 %v4663_v44 }
0x21ae   :  { %v4660_v39 = vsel %vm356_vm1, %v4658_v37, 0.0 }
0x21af   :  { %4661 = vadd.xlane.f32.xlu0 %v4660_v39 }
0x21b1   :  { %2467 = vadd.xlane.f32.xlu1 %v2466_v32 }
0x21b3   :  { %2470 = vadd.xlane.f32.xlu0 %v2469_v15  ;;  %v5015_v15 = vld [vmem:[%s8801_s11] sm:$0xff] }
0x2236   :  { %v4665_v31 = vpop.xlane.xlu1 %4664 }
0x2237   :  { %v4667_v17 = vmul.f32 0.03125, %v4665_v31 }
0x2238   :  { %v4662_v25 = vpop.xlane.xlu0 %4661 }
0x2239   :  { %v4669_v47 = vadd.f32 1e-06, %v4667_v17  ;;  %v4666_v48 = vmul.f32 0.03125, %v4662_v25 }
0x223a   :  { %v2468_v49 = vpop.xlane.xlu1 %2467 }
0x223b   :  { %7347 = vrsqrt.f32 %v4669_v47  ;;  %v4668_v50 = vadd.f32 1e-06, %v4666_v48  ;;  %v2472_v51 = vmul.f32 0.03125, %v2468_v49 }
0x223c   :  { %v2471_v14 = vpop.xlane.xlu0 %2470 }
0x223d   :  { %7349 = vrsqrt.f32 %v4668_v50  ;;  %v2474_v52 = vsub.f32 %v2460_v38, %v2472_v51  ;;  %v2473_v53 = vmul.f32 0.03125, %v2471_v14  ;;  %v5101_v50 = vld [vmem:[%s8802_s24 + $0x18] sm:$0xff] }
0x223e   :  { %7176 = vmatprep.subr.mxu1 %v5101_v50 }
0x223f   :  { %v2475_v29 = vsub.f32 %v2461_v42, %v2473_v53  ;;  %v2476_v54 = vmul.f32 %v2474_v52, %v2474_v52 }
0x2241   :  { %v2478_v55 = vsel %vm356_vm1, %v2476_v54, 0.0  ;;  %v2477_v56 = vmul.f32 %v2475_v29, %v2475_v29 }
0x2242   :  { %2479 = vadd.xlane.f32.xlu1 %v2478_v55 }
0x2243   :  { %v2481_v57 = vsel %vm356_vm1, %v2477_v56, 0.0 }
0x2244   :  { %2482 = vadd.xlane.f32.xlu0 %v2481_v57 }
0x2248   :  { %v7348_v59 = vpop.eup %7347 }
0x2249   :  { %v4673_v62 = vmul.f32 %v7348_v59, %v4657_v33  ;;  %v5952_v33 = vld [vmem:[%s8844_s2 + $0x2] ss:$0 sm:$0xff] }
0x224a   :  { %v7350_v63 = vpop.eup %7349 }
0x224b   :  { %v4672_v0 = vmul.f32 %v7350_v63, %v4656_v35  ;;  %v4681_v1 = vmul.f32 %v6097_v61, %v4673_v62  ;;  %v4933_v35 = vld [vmem:[%s8800_s10 + $0x8] sm:$0xff]  ;;  %v6130_v62 = vld [vmem:[%s8802_s24 + $0x38] sm:$0xff] }
0x224c   :  { %v5099_v63 = vld [vmem:[%s8802_s24 + $0x8] sm:$0xff] }
0x224d   :  { %v4680_v3 = vmul.f32 %v6097_v61, %v4672_v0  ;;  %v8538_v5 = vadd.f32 %v6098_v2, %v4681_v1  ;;  %v5100_v61 = vld [vmem:[%s8802_s24 + $0x10] sm:$0xff] }
0x224e   :  { %v6129_v1 = vld [vmem:[%s8802_s24 + $0x30] sm:$0xff] }
0x224f   :  { %v8536_v4 = vadd.f32 %v6098_v2, %v4680_v3  ;;  %v5098_v2 = vld [vmem:[%s8802_s24] sm:$0xff] }
0x2251   :  { %7129 = vmatprep.mubr.msk.f32.mxu0 %vm356_vm1, %v8536_v4 }
0x2252   :  { %7130 = vmatmul.mubr.msk.f32.vlgmr.msra.gmra.mxu0 %vm356_vm1, %v8538_v5 }
0x2253   :  { %7155 = vmatprep.mubr.msk.f32.mxu0 %vm444_vm2, %v4932_v6  ;;  %v6127_v6 = vld [vmem:[%s8802_s24 + $0x20] sm:$0xff] }
0x22cb   :  { %v2480_v19 = vpop.xlane.xlu1 %2479 }
0x22cc   :  { %v2484_v58 = vmul.f32 0.03125, %v2480_v19  ;;  %v6151_v19 = vld [vmem:[%s8803_s25 + $0x50] sm:$0xff] }
0x22cd   :  { %v2483_v20 = vpop.xlane.xlu0 %2482 }
0x22ce   :  { %v2486_v21 = vadd.f32 1e-06, %v2484_v58  ;;  %v2485_v41 = vmul.f32 0.03125, %v2483_v20  ;;  %v6136_v58 = vld [vmem:[%s8802_s24 + $0x48] sm:$0xff] }
0x22cf   :  { %v6150_v20 = vld [vmem:[%s8803_s25 + $0x48] sm:$0xff] }
0x22d0   :  { %7351 = vrsqrt.f32 %v2486_v21  ;;  %v2487_v40 = vadd.f32 1e-06, %v2485_v41  ;;  %v6135_v21 = vld [vmem:[%s8802_s24 + $0x40] sm:$0xff] }
0x22d1   :  { %v6149_v41 = vld [vmem:[%s8803_s25 + $0x40] sm:$0xff] }
0x22d2   :  { %7353 = vrsqrt.f32 %v2487_v40  ;;  %v5362_v40 = vld [vmem:[%s8803_s25 + $0x18] sm:$0xff] }
0x22dd   :  { %v7352_v22 = vpop.eup %7351 }
0x22de   :  { %v2490_v23 = vmul.f32 %v7352_v22, %v2474_v52 }
0x22df   :  { %v7354_v60 = vpop.eup %7353 }
0x22e0   :  { %v2491_v26 = vmul.f32 %v7354_v60, %v2475_v29  ;;  %v2498_v30 = vmul.f32 %v5951_v24, %v2490_v23 }
0x22e2   :  { %v2499_v28 = vmul.f32 %v5951_v24, %v2491_v26  ;;  %v2506_v27 = vadd.f32 %v5952_v33, %v2498_v30 }
0x22e4   :  { %v2507_v34 = vadd.f32 %v5952_v33, %v2499_v28  ;;  %v6121_v33 = vld [vmem:[%s8843_s7 + $0x5] ss:$0 sm:$0xff] }
0x22e6   :  { %7151 = vmatprep.subr.mxu0 %v2507_v34 }
0x22e7   :  { %7152 = vmatpush3.msra.mxu0 %v2507_v34 }
0x22e8   :  { %7153 = vmatprep.subr.mxu0 %v2506_v27 }
0x22e9   :  { %7154 = vmatpush3.msra.mxu0 %v2506_v27 }
0x22ea   :  { %7158 = vmatprep.subr.mxu0 %v2507_v34  ;;  %7156 = vmatmul.mubr.msk.f32.vlgmr.msra.gmra.mxu0 %vm444_vm2, %v4933_v35 }
0x22eb   :  { %7159 = vmatpush3.msra.mxu0 %v2507_v34  ;;  %7162 = vmatprep.mubr.msk.f32.mxu0 %vm444_vm2, %v5015_v15  ;;  %v5359_v15 = vld [vmem:[%s8803_s25] sm:$0xff] }
0x22ec   :  { %7160 = vmatprep.subr.mxu0 %v2506_v27 }
0x22ed   :  { %7161 = vmatpush3.msra.mxu0 %v2506_v27 }
0x22ee   :  { %7163 = vmatmul.mubr.msk.f32.vlgmr.msra.gmra.mxu0 %vm444_vm2, %v5016_v13  ;;  %7165 = vmatprep.subr.mxu0 %v6130_v62  ;;  %v5629_v13 = vld [vmem:[%s8804_s26 + $0x58] sm:$0xff] }
0x22ef   :  { %7166 = vmatpush3.msra.mxu0 %v6130_v62 }
0x22f0   :  { %7167 = vmatprep.subr.mxu0 %v6129_v1 }
0x22f1   :  { %7168 = vmatpush3.msra.mxu0 %v6129_v1 }
0x2312   :  { %v7131_v44 = vpop.f32.mrf.mxu0 }
0x2313   :  { %v4781_v37 = vadd.f32 %v7131_v44, %v6104_v36  ;;  %v6122_v44 = vld [vmem:[%s8844_s2 + $0x5] ss:$0 sm:$0xff] }
0x2314   :  { %v4775_v38 = vpop.f32.mrf.mxu0 }
0x2315   :  { %v4776_v39 = vadd.f32 %v6104_v36, %v4775_v38  ;;  %v4785_v32 = vmax.f32 %v4781_v37, 0.0 }
0x2317   :  { %v4784_v42 = vmax.f32 %v4776_v39, 0.0 }
0x2319   :  { %7148 = vmatprep.mubr.msk.f32.mxu1 %vm106_vm0, %v4784_v42  ;;  %v5361_v42 = vld [vmem:[%s8803_s25 + $0x10] sm:$0xff] }
0x231a   :  { %7149 = vmatmul.mubr.msk.f32.vlgmr.msra.gmra.mxu1 %vm106_vm0, %v4785_v32  ;;  %v5360_v32 = vld [vmem:[%s8803_s25 + $0x8] sm:$0xff] }
0x231b   :  { %7177 = vmatpush3.msra.mxu1 %v5101_v50  ;;  %v5619_v50 = vld [vmem:[%s8804_s26 + $0x8] sm:$0xff] }
0x231c   :  { %7178 = vmatprep.subr.mxu1 %v5100_v61 }
0x231d   :  { %7179 = vmatpush3.msra.mxu1 %v5100_v61 }
0x231e   :  { %7180 = vmatprep.subr.mxu1 %v5099_v63 }
0x231f   :  { %7181 = vmatpush3.msra.mxu1 %v5099_v63 }
0x2320   :  { %7182 = vmatprep.subr.mxu1 %v5098_v2 }
0x2321   :  { %7183 = vmatpush3.msra.mxu1 %v5098_v2 }
0x23aa   :  { %v8624_v0 = vpop.f32.mrf.mxu0 }
0x23ac   :  { %v8632_v3 = vpop.f32.mrf.mxu0 }
0x23ad   :  { %7184 = vmatprep.mubr.msk.f32.mxu1 %vm356_vm1, %v8632_v3 }
0x23ae   :  { %v7164_v7 = vpop.f32.mrf.mxu0  ;;  %7185 = vmatmul.mubr.msk.f32.vlgmr.msra.gmra.mxu1 %vm356_vm1, %v8624_v0 }
0x23b0   :  { %v5089_v9 = vpop.f32.mrf.mxu0 }
0x23b1   :  { %7173 = vmatprep.mubr.msk.f32.mxu0 %vm356_vm1, %v5089_v9  ;;  %7206 = vmatprep.mubr.msk.f32.mxu1 %vm356_vm1, %v5089_v9 }
0x23da   :  { %v7150_v46 = vpop.f32.mrf.mxu1 }
0x23db   :  { %v4881_v43 = vadd.f32 %v7150_v46, %v6116_v45  ;;  %v5627_v46 = vld [vmem:[%s8804_s26 + $0x48] sm:$0xff] }
0x23dc   :  { %v4875_v31 = vpop.f32.mrf.mxu1 }
0x23dd   :  { %v4876_v17 = vadd.f32 %v6116_v45, %v4875_v31  ;;  %v4885_v25 = vadd.f32 %v4881_v43, %v8538_v5  ;;  %v6144_v5 = vld [vmem:[%s8803_s25 + $0x38] sm:$0xff]  ;;  %v5628_v45 = vld [vmem:[%s8804_s26 + $0x50] sm:$0xff]  ;;  %v5626_v43 = vld [vmem:[%s8804_s26 + $0x40] sm:$0xff] }
0x23de   :  { %7198 = vmatprep.subr.mxu1 %v6144_v5  ;;  %v5625_v31 = vld [vmem:[%s8804_s26 + $0x38] sm:$0xff] }
0x23df   :  { %v4893_v47 = vsel %vm356_vm1, %v4885_v25, 0.0  ;;  %v4884_v48 = vadd.f32 %v4876_v17, %v8536_v4  ;;  %v6128_v4 = vld [vmem:[%s8802_s24 + $0x28] sm:$0xff]  ;;  %7199 = vmatpush3.msra.mxu1 %v6144_v5  ;;  %v5624_v17 = vld [vmem:[%s8804_s26 + $0x30] sm:$0xff] }
0x23e0   :  { %4894 = vadd.xlane.f32.xlu1 %v4893_v47  ;;  %7169 = vmatprep.subr.mxu0 %v6128_v4  ;;  %v5622_v47 = vld [vmem:[%s8804_s26 + $0x20] sm:$0xff] }
0x23e1   :  { %v4890_v49 = vsel %vm356_vm1, %v4884_v48, 0.0  ;;  %7170 = vmatpush3.msra.mxu0 %v6128_v4  ;;  %7200 = vmatprep.subr.mxu1 %v6143_v8 }
0x23e2   :  { %4891 = vadd.xlane.f32.xlu0 %v4890_v49  ;;  %7171 = vmatprep.subr.mxu0 %v6127_v6  ;;  %v5620_v49 = vld [vmem:[%s8804_s26 + $0x10] sm:$0xff] }
0x23e3   :  { %7172 = vmatpush3.msra.mxu0 %v6127_v6  ;;  %7201 = vmatpush3.msra.mxu1 %v6143_v8 }
0x23e4   :  { %7174 = vmatmul.mubr.msk.f32.vlgmr.msra.gmra.mxu0 %vm356_vm1, %v7164_v7  ;;  %7202 = vmatprep.subr.mxu1 %v6142_v10 }
0x23e5   :  { %7203 = vmatpush3.msra.mxu1 %v6142_v10  ;;  %7187 = vmatprep.subr.mxu0 %v6138_v11 }
0x23e6   :  { %7204 = vmatprep.subr.mxu1 %v6141_v12  ;;  %7188 = vmatpush3.msra.mxu0 %v6138_v11 }
0x23e7   :  { %7205 = vmatpush3.msra.mxu1 %v6141_v12  ;;  %7189 = vmatprep.subr.mxu0 %v6137_v16 }
0x23e8   :  { %7207 = vmatmul.mubr.msk.f32.vlgmr.msra.gmra.mxu1 %vm356_vm1, %v7164_v7  ;;  %7220 = vmatprep.subr.mxu1 %v6152_v18 }
0x23e9   :  { %7221 = vmatpush3.msra.mxu1 %v6152_v18  ;;  %7190 = vmatpush3.msra.mxu0 %v6137_v16  ;;  %v5613_v18 = vld [vmem:[%s8805_s12 + $0x8] sm:$0xff] }
0x23ea   :  { %7222 = vmatprep.subr.mxu1 %v6151_v19  ;;  %7191 = vmatprep.subr.mxu0 %v6136_v58 }
0x23eb   :  { %7223 = vmatpush3.msra.mxu1 %v6151_v19  ;;  %7192 = vmatpush3.msra.mxu0 %v6136_v58  ;;  %v5612_v58 = vld [vmem:[%s8805_s12] sm:$0xff] }
0x23ec   :  { %7224 = vmatprep.subr.mxu1 %v6150_v20  ;;  %7193 = vmatprep.subr.mxu0 %v6135_v21 }
0x23ed   :  { %7225 = vmatpush3.msra.mxu1 %v6150_v20  ;;  %7194 = vmatpush3.msra.mxu0 %v6135_v21 }
0x23ee   :  { %7226 = vmatprep.subr.mxu1 %v6149_v41  ;;  %7209 = vmatprep.subr.mxu0 %v5362_v40 }
0x23ef   :  { %7227 = vmatpush3.msra.mxu1 %v6149_v41 }
0x2469   :  { %v4895_v51 = vpop.xlane.xlu1 %4894 }
0x246a   :  { %v4897_v14 = vmul.f32 0.03125, %v4895_v51  ;;  %v5618_v51 = vld [vmem:[%s8804_s26] sm:$0xff] }
0x246b   :  { %v4892_v52 = vpop.xlane.xlu0 %4891 }
0x246c   :  { %v8605_v53 = vsub.f32 %v4885_v25, %v4897_v14  ;;  %v4896_v29 = vmul.f32 0.03125, %v4892_v52  ;;  %v5623_v25 = vld [vmem:[%s8804_s26 + $0x28] sm:$0xff] }
0x246e   :  { %v8607_v54 = vsub.f32 %v4884_v48, %v4896_v29  ;;  %v4901_v55 = vmul.f32 %v8605_v53, %v8605_v53  ;;  %v5621_v48 = vld [vmem:[%s8804_s26 + $0x18] sm:$0xff]  ;;  %v7186_v14 = vpop.f32.mrf.mxu1 }
0x2470   :  { %v4905_v56 = vsel %vm356_vm1, %v4901_v55, 0.0  ;;  %v4900_v57 = vmul.f32 %v8607_v54, %v8607_v54 }
0x2471   :  { %4906 = vadd.xlane.f32.xlu1 %v4905_v56 }
0x2472   :  { %v4902_v59 = vsel %vm356_vm1, %v4900_v57, 0.0 }
0x2473   :  { %4903 = vadd.xlane.f32.xlu0 %v4902_v59 }
0x24a4   :  { %v7175_v52 = vpop.f32.mrf.mxu0 }
0x24a5   :  { %v5266_v10 = vadd.f32 %v7186_v14, %v7175_v52 }
0x24a6   :  { %v5179_v29 = vpop.f32.mrf.mxu0 }
0x24fa   :  { %v4907_v22 = vpop.xlane.xlu1 %4906 }
0x24fb   :  { %v4909_v23 = vmul.f32 0.03125, %v4907_v22 }
0x24fc   :  { %v4904_v60 = vpop.xlane.xlu0 %4903 }
0x24fd   :  { %v4911_v24 = vadd.f32 1e-06, %v4909_v23  ;;  %v4908_v26 = vmul.f32 0.03125, %v4904_v60 }
0x24ff   :  { %7355 = vrsqrt.f32 %v4911_v24  ;;  %v4910_v28 = vadd.f32 1e-06, %v4908_v26  ;;  %v5731_v24 = vld [vmem:[%s8806_s27 + $0x18] sm:$0xff]  ;;  %v5730_v26 = vld [vmem:[%s8806_s27 + $0x10] sm:$0xff] }
0x2500   :  { %7258 = vmatprep.subr.mxu1 %v5731_v24 }
0x2501   :  { %7357 = vrsqrt.f32 %v4910_v28  ;;  %v5729_v28 = vld [vmem:[%s8806_s27 + $0x8] sm:$0xff] }
0x250c   :  { %v7356_v30 = vpop.eup %7355 }
0x250d   :  { %v4915_v34 = vmul.f32 %v7356_v30, %v8605_v53  ;;  %v5260_v53 = vpop.f32.mrf.mxu1  ;;  %v5728_v30 = vld [vmem:[%s8806_s27] sm:$0xff] }
0x250e   :  { %v7358_v27 = vpop.eup %7357  ;;  %v5261_v7 = vadd.f32 %v5260_v53, %v5179_v29 }
0x250f   :  { %v4914_v35 = vmul.f32 %v7358_v27, %v8607_v54  ;;  %v4923_v36 = vmul.f32 %v6121_v33, %v4915_v34  ;;  %v7208_v54 = vpop.f32.mrf.mxu1 }
0x2511   :  { %v4922_v37 = vmul.f32 %v6121_v33, %v4914_v35  ;;  %v4931_v39 = vadd.f32 %v6122_v44, %v4923_v36  ;;  %v5434_v56 = vpop.f32.mrf.mxu1 }
0x2513   :  { %v4930_v38 = vadd.f32 %v6122_v44, %v4922_v37 }
0x2515   :  { %7195 = vmatprep.mubr.msk.f32.mxu0 %vm356_vm1, %v4930_v38  ;;  %7228 = vmatprep.mubr.msk.f32.mxu1 %vm356_vm1, %v4930_v38 }
0x2516   :  { %7196 = vmatmul.mubr.msk.f32.vlgmr.msra.gmra.mxu0 %vm356_vm1, %v4931_v39  ;;  %7229 = vmatmul.mubr.msk.f32.vlgmr.msra.gmra.mxu1 %vm356_vm1, %v4931_v39  ;;  %v5724_v39 = vld [vmem:[%s8807_s13] sm:$0xff] }
0x2517   :  { %7210 = vmatpush3.msra.mxu0 %v5362_v40  ;;  %7217 = vmatprep.mubr.msk.f32.mxu0 %vm356_vm1, %v8632_v3 }
0x2518   :  { %7211 = vmatprep.subr.mxu0 %v5361_v42  ;;  %7259 = vmatpush3.msra.mxu1 %v5731_v24 }
0x2519   :  { %7212 = vmatpush3.msra.mxu0 %v5361_v42  ;;  %7260 = vmatprep.subr.mxu1 %v5730_v26 }
0x251a   :  { %7213 = vmatprep.subr.mxu0 %v5360_v32  ;;  %7261 = vmatpush3.msra.mxu1 %v5730_v26 }
0x251b   :  { %7214 = vmatpush3.msra.mxu0 %v5360_v32  ;;  %7262 = vmatprep.subr.mxu1 %v5729_v28  ;;  %v5725_v32 = vld [vmem:[%s8807_s13 + $0x8] sm:$0xff] }
0x251c   :  { %7215 = vmatprep.subr.mxu0 %v5359_v15  ;;  %7263 = vmatpush3.msra.mxu1 %v5729_v28 }
0x251d   :  { %7216 = vmatpush3.msra.mxu0 %v5359_v15  ;;  %7264 = vmatprep.subr.mxu1 %v5728_v30 }
0x251e   :  { %7218 = vmatmul.mubr.msk.f32.vlgmr.msra.gmra.mxu0 %vm356_vm1, %v8624_v0  ;;  %7231 = vmatprep.subr.mxu0 %v5629_v13 }
0x251f   :  { %7232 = vmatpush3.msra.mxu0 %v5629_v13  ;;  %7265 = vmatpush3.msra.mxu1 %v5728_v30 }
0x2520   :  { %7233 = vmatprep.subr.mxu0 %v5628_v45 }
0x2521   :  { %7234 = vmatpush3.msra.mxu0 %v5628_v45 }
0x2522   :  { %7235 = vmatprep.subr.mxu0 %v5627_v46 }
0x2523   :  { %7236 = vmatpush3.msra.mxu0 %v5627_v46 }
0x2524   :  { %7237 = vmatprep.subr.mxu0 %v5626_v43 }
0x2525   :  { %7238 = vmatpush3.msra.mxu0 %v5626_v43 }
0x2526   :  { %7239 = vmatprep.subr.mxu0 %v5625_v31 }
0x2527   :  { %7240 = vmatpush3.msra.mxu0 %v5625_v31 }
0x2528   :  { %7241 = vmatprep.subr.mxu0 %v5624_v17 }
0x2529   :  { %7242 = vmatpush3.msra.mxu0 %v5624_v17 }
0x252a   :  { %7243 = vmatprep.subr.mxu0 %v5623_v25 }
0x252b   :  { %7244 = vmatpush3.msra.mxu0 %v5623_v25 }
0x252c   :  { %7245 = vmatprep.subr.mxu0 %v5622_v47 }
0x252d   :  { %7246 = vmatpush3.msra.mxu0 %v5622_v47 }
0x252e   :  { %7247 = vmatprep.subr.mxu0 %v5621_v48 }
0x252f   :  { %7248 = vmatpush3.msra.mxu0 %v5621_v48 }
0x2530   :  { %7249 = vmatprep.subr.mxu0 %v5620_v49 }
0x2531   :  { %7250 = vmatpush3.msra.mxu0 %v5620_v49 }
0x2532   :  { %7251 = vmatprep.subr.mxu0 %v5619_v50 }
0x2533   :  { %7252 = vmatpush3.msra.mxu0 %v5619_v50 }
0x2534   :  { %7253 = vmatprep.subr.mxu0 %v5618_v51 }
0x2535   :  { %7254 = vmatpush3.msra.mxu0 %v5618_v51 }
0x25d6   :  { %v7197_v55 = vpop.f32.mrf.mxu0  ;;  %v7230_v59 = vpop.f32.mrf.mxu1 }
0x25d7   :  { %v5356_v16 = vadd.f32 %v7197_v55, %v5266_v10 }
0x25d8   :  { %v5346_v57 = vpop.f32.mrf.mxu0  ;;  %v5589_v2 = vpop.f32.mrf.mxu1 }
0x25d9   :  { %v5355_v11 = vadd.f32 %v5346_v57, %v5261_v7 }
0x25de   :  { %v7219_v61 = vpop.f32.mrf.mxu0 }
0x25df   :  { %v5515_v62 = vadd.f32 %v7219_v61, %v7208_v54 }
0x25e0   :  { %v5509_v63 = vpop.f32.mrf.mxu0 }
0x25e1   :  { %v5599_v0 = vadd.f32 %v7230_v59, %v5515_v62  ;;  %v5510_v1 = vadd.f32 %v5509_v63, %v5434_v56 }
0x25e3   :  { %v6156_v3 = vmul.f32 -1.442695, %v5599_v0  ;;  %v5598_v4 = vadd.f32 %v5589_v2, %v5510_v1 }
0x25e5   :  { %7359 = vpow2.f32 %v6156_v3  ;;  %v6155_v5 = vmul.f32 -1.442695, %v5598_v4 }
0x25e7   :  { %7361 = vpow2.f32 %v6155_v5 }
0x25f2   :  { %v7360_v6 = vpop.eup %7359 }
0x25f3   :  { %v5607_v8 = vadd.f32 1.0, %v7360_v6 }
0x25f4   :  { %v7362_v9 = vpop.eup %7361 }
0x25f5   :  { %7363 = vrcp.f32 %v5607_v8  ;;  %v5606_v12 = vadd.f32 1.0, %v7362_v9 }
0x25f7   :  { %7365 = vrcp.f32 %v5606_v12 }
0x25f8   :  { %7367 = vtanh.f32 %v5355_v11 }
0x25f9   :  { %7369 = vtanh.f32 %v5356_v16 }
0x2602   :  { %v7364_v19 = vpop.eup %7363 }
0x2603   :  { %v5615_v21 = vmul.f32 %v7364_v19, %v5613_v18 }
0x2604   :  { %v7366_v20 = vpop.eup %7365 }
0x2605   :  { %v5614_v41 = vmul.f32 %v7366_v20, %v5612_v58  ;;  %v7368_v40 = vpop.eup %7367 }
0x2606   :  { %v7370_v22 = vpop.eup %7369 }
0x2607   :  { %v5616_v23 = vmul.f32 %v7368_v40, %v5614_v41  ;;  %v5617_v60 = vmul.f32 %v7370_v22, %v5615_v21 }
0x2609   :  { %7255 = vmatprep.mubr.msk.f32.mxu0 %vm5630_vm5, %v5616_v23 }
0x260a   :  { %7256 = vmatmul.mubr.msk.f32.vlgmr.msra.gmra.mxu0 %vm5630_vm5, %v5617_v60 }
0x26ca   :  { %v7257_v33 = vpop.f32.mrf.mxu0 }
0x26cb   :  { %v6160_v34 = vmul.f32 -1.442695, %v7257_v33 }
0x26cc   :  { %v5703_v27 = vpop.f32.mrf.mxu0 }
0x26cd   :  { %7371 = vpow2.f32 %v6160_v34  ;;  %v6159_v35 = vmul.f32 -1.442695, %v5703_v27 }
0x26cf   :  { %7373 = vpow2.f32 %v6159_v35 }
0x26da   :  { %v7372_v36 = vpop.eup %7371 }
0x26db   :  { %v5719_v44 = vadd.f32 1.0, %v7372_v36 }
0x26dc   :  { %v7374_v37 = vpop.eup %7373 }
0x26dd   :  { %v5718_v38 = vadd.f32 1.0, %v7374_v37  ;;  %7375 = vrcp.f32 %v5719_v44 }
0x26df   :  { %7377 = vrcp.f32 %v5718_v38 }
0x26ea   :  { %v7376_v42 = vpop.eup %7375 }
0x26eb   :  { %v5727_v45 = vadd.f32 %v7376_v42, %v5725_v32 }
0x26ec   :  { %v7378_v15 = vpop.eup %7377 }
0x26ed   :  { %v5726_v13 = vadd.f32 %v7378_v15, %v5724_v39 }
0x26ef   :  { %7266 = vmatprep.mubr.msk.f32.mxu1 %vm356_vm1, %v5726_v13 }
0x26f0   :  { %7267 = vmatmul.mubr.msk.f32.vlgmr.msra.gmra.mxu1 %vm356_vm1, %v5727_v45 }
0x27b0   :  { %v7268_v46 = vpop.f32.mrf.mxu1 }
0x27b1   :  { %5814 = vst [vmem:[%s8849_s30 + $0x8] sm:$0xff] %v7268_v46 }
0x27b2   :  { %v5804_v43 = vpop.f32.mrf.mxu1 }
0x27b3   :  { %5813 = vst [vmem:[%s8849_s30] sm:$0xff] %v5804_v43 }

</bundles_post_ra>
